<compile_context>
chip_gen: v6e
topology: v6e:2x2x1
jax: 0.10.0
libtpu: 0.0.40
codegen_flags: <defaults>
</compile_context>

<pallas_src>
import jax
import jax.numpy as jnp
from jax.experimental import pallas as pl
from jax.experimental.pallas import tpu as pltpu

LEAKY_SLOPE = 0.01   # torch.nn.LeakyReLU default
LANE = 128


def _leaky(x):
    return jnp.where(x > 0, x, LEAKY_SLOPE * x)


def _round_up(n, m):
    return ((n + m - 1) // m) * m


def _choose_btile(B, L, cpad, K):
    """Pick batch-tile size: fill MXU rows, keep grid >= 2 (v7x dual TC), fit VMEM."""
    per_elem_bytes = (K + 6) * max(L, 8) * cpad * 4          # activations + taps per element
    cap_vmem = max(1, (8 << 20) // per_elem_bytes)           # keep activations well under 8 MiB
    cap_cores = max(1, B // 2)                               # grid length >= 2 when B >= 2
    cap_rows = max(1, 1024 // max(L, 1))                     # conv matmul M <= ~1024 rows
    return int(max(1, min(B, cap_vmem, cap_cores, cap_rows)))


# ----------------------------------------------------------------------------
# Fused forward kernel: whole network, `btile` batch elements per grid step
# ----------------------------------------------------------------------------
def _build_fused_kernel(*, K, dilations, has_res, L, cpad, btile, pad0, n_dec=4):
    n_blocks = len(dilations)

    def kernel(*refs):
        it = iter(refs)
        x_ref = next(it)                                   # (1, btile, L, cpad)
        blk_refs = []
        for b in range(n_blocks):
            w1 = next(it); b1 = next(it); w2 = next(it); b2 = next(it)
            wr = br = None
            if has_res[b]:
                wr = next(it); br = next(it)
            blk_refs.append((w1, b1, w2, b2, wr, br))
        wlin = next(it); blin = next(it)
        dec = [(next(it), next(it)) for _ in range(n_dec)]  # decoder (w, b) x 4
        code_ref = next(it)                                 # (1, btile, cpad)
        y_ref = next(it)                                    # (1, btile, wlpad)
        xpad_ref = next(it)                                 # VMEM scratch (btile, pad0+Lr, cpad)

        # Zero the shared causal-pad rows once per grid step (sublane-aligned store).
        # Activation stores below never touch rows < pad0, so this stays valid for
        # every block / dilation in this step.
        if pad0 > 0:
            xpad_ref[:, pl.ds(0, pad0), :] = jnp.zeros((btile, pad0, cpad), jnp.float32)

        def matmul(a2d, w_ref, b_ref):
            # Operands cast to the (possibly bf16) weight dtype; f32 MXU accumulation.
            out = jnp.dot(a2d.astype(w_ref.dtype), w_ref[...],
                          preferred_element_type=jnp.float32)
            return out + b_ref[...]

        def causal_conv(h, d, w_ref, b_ref):
            # h: (btile, L, cpad) f32.  Store at fixed aligned offset pad0, gather the K
            # dilated taps, lane-concat, and do ONE MXU matmul with M = btile*L and
            # contraction depth K*cpad.
            xpad_ref[:, pl.ds(pad0, L), :] = h
            taps = jnp.concatenate(
                [xpad_ref[:, pl.ds(pad0 - (K - 1 - k) * d, L), :] for k in range(K)],
                axis=-1)                                     # (btile, L, K*cpad)
            out = matmul(taps.reshape(btile * L, K * cpad), w_ref, b_ref)
            return _leaky(out).reshape(btile, L, cpad)

        x = x_ref[0].astype(jnp.float32)                     # (btile, L, cpad), lane-dense

        for b in range(n_blocks):
            w1, b1, w2, b2, wr, br = blk_refs[b]
            d = dilations[b]
            h = causal_conv(x, d, w1, b1)
            h = causal_conv(h, d, w2, b2)
            if wr is not None:    # 1x1 up/down-sample projection on the residual path
                res = matmul(x.reshape(btile * L, cpad), wr, br).reshape(btile, L, cpad)
            else:
                res = x
            x = h + res

        # AdaptiveMaxPool1d(1): max over the time axis (f32).
        pooled = jnp.max(x, axis=1)                          # (btile, cpad)

        # Encoder Linear -> code.
        code = matmul(pooled, wlin, blin)                    # (btile, cpad)
        code_ref[0] = code.astype(code_ref.dtype)

        # 4-layer MLP decoder (LeakyReLU on the first three layers only).
        h = code
        for li, (w, bb) in enumerate(dec):
            h = matmul(h, w, bb)
            if li < n_dec - 1:
                h = _leaky(h)
        y_ref[0] = h.astype(y_ref.dtype)

    return kernel


# ----------------------------------------------------------------------------
# Wrapper: single pallas_call for the whole forward pass, btile elements / step
# ----------------------------------------------------------------------------
def causal_ae_forward(kparams, X, hp, btile=None):
    """X: (B, in_channels, L) as in PyTorch. Returns (Y, code)."""
    K = hp['kernel_size']
    wl = hp['window_length']
    cpad = kparams['cpad']
    wlpad = kparams['wlpad']
    dilations = kparams['dilations']
    has_res = kparams['has_res']

    B, cin, L = X.shape
    if btile is None:
        btile = _choose_btile(B, L, cpad, K)
    steps = -(-B // btile)
    b_pad = steps * btile

    # One-time boundary layout ops: channels-last, pad channels to the lane width,
    # pad the batch up to a multiple of btile, group into (steps, btile, L, cpad).
    x = jnp.transpose(X, (0, 2, 1)).astype(jnp.float32)
    x = jnp.pad(x, ((0, b_pad - B), (0, 0), (0, cpad - cin)))
    x = x.reshape(steps, btile, L, cpad)

    flat = [x]
    in_specs = [pl.BlockSpec((1, btile, L, cpad), lambda i: (i, 0, 0, 0))]

    def add_w(w):  # weights/biases are all 2D, constant block index across the grid
        flat.append(w)
        in_specs.append(pl.BlockSpec(w.shape, lambda i: (0, 0)))

    for b, blk in enumerate(kparams['blocks']):
        add_w(blk['w1']); add_w(blk['b1']); add_w(blk['w2']); add_w(blk['b2'])
        if has_res[b]:
            add_w(blk['wres']); add_w(blk['bres'])
    add_w(kparams['wlin']); add_w(kparams['blin'])
    for name in ('w1', 'b1', 'w2', 'b2', 'w3', 'b3', 'w4', 'b4'):
        add_w(kparams[name])

    max_pad = (K - 1) * max(dilations)
    pad0 = _round_up(max_pad, 8)                 # fixed, sublane-aligned pad offset
    lpad = pad0 + _round_up(L, 8)

    # Explicit VMEM budget (review item for v7x's 64 MiB total / 32 MiB default).
    weight_bytes = sum(int(a.size) * a.dtype.itemsize for a in flat[1:])
    block_bytes = 4 * btile * (L * cpad + cpad + wlpad)
    scratch_bytes = 4 * btile * lpad * cpad
    act_bytes = 4 * btile * L * cpad * (K + 6)
    est = 2 * (weight_bytes + block_bytes) + scratch_bytes + act_bytes
    vmem_limit = int(min(64 << 20, max(32 << 20, 2 * est)))

    kern = _build_fused_kernel(K=K, dilations=dilations, has_res=has_res,
                               L=L, cpad=cpad, btile=btile, pad0=pad0)

    code_p, y_p = pl.pallas_call(
        kern,
        grid=(steps,),
        in_specs=in_specs,
        out_shape=(jax.ShapeDtypeStruct((steps, btile, cpad), jnp.float32),
                   jax.ShapeDtypeStruct((steps, btile, wlpad), jnp.float32)),
        out_specs=(pl.BlockSpec((1, btile, cpad), lambda i: (i, 0, 0)),
                   pl.BlockSpec((1, btile, wlpad), lambda i: (i, 0, 0))),
        scratch_shapes=[pltpu.VMEM((btile, lpad, cpad), jnp.float32)],
        compiler_params=pltpu.CompilerParams(
            dimension_semantics=("parallel",),
            vmem_limit_bytes=vmem_limit),
    )(*flat)

    code = code_p.reshape(b_pad, cpad)[:B, :hp['out_channels']]      # (B, out_channels)
    Y = y_p.reshape(b_pad, wlpad)[:B, :wl].reshape(B, 1, wl)          # torch: Y.view(-1,1,wl)
    return Y, code


# ----------------------------------------------------------------------------
# Deterministic synthetic parameter init (logical / "torch" shapes)
# ----------------------------------------------------------------------------
def init_params(key, hp):
    K = hp['kernel_size']
    keys = list(jax.random.split(key, 64))

    def nxt():
        return keys.pop(0)

    params = {'blocks': []}
    in_ch = hp['in_channels']
    dilation = 1
    block_out = [hp['channels']] * hp['depth'] + [hp['reduced_size']]
    for out_ch in block_out:
        blk = {'dilation': dilation}
        blk['w1'] = 0.3 * jax.random.normal(nxt(), (K, in_ch, out_ch), jnp.float32)
        blk['b1'] = 0.1 * jax.random.normal(nxt(), (1, out_ch), jnp.float32)
        blk['w2'] = 0.3 * jax.random.normal(nxt(), (K, out_ch, out_ch), jnp.float32)
        blk['b2'] = 0.1 * jax.random.normal(nxt(), (1, out_ch), jnp.float32)
        if in_ch != out_ch:
            blk['wres'] = 0.3 * jax.random.normal(nxt(), (1, in_ch, out_ch), jnp.float32)
            blk['bres'] = 0.1 * jax.random.normal(nxt(), (1, out_ch), jnp.float32)
        params['blocks'].append(blk)
        in_ch = out_ch
        dilation *= 2

    def lin(cin, cout):
        return (0.3 * jax.random.normal(nxt(), (cin, cout), jnp.float32),
                0.1 * jax.random.normal(nxt(), (1, cout), jnp.float32))

    params['wlin'], params['blin'] = lin(hp['reduced_size'], hp['out_channels'])
    params['w1'], params['b1'] = lin(hp['out_channels'], 25)
    params['w2'], params['b2'] = lin(25, 50)
    params['w3'], params['b3'] = lin(50, 75)
    params['w4'], params['b4'] = lin(75, hp['window_length'])
    return params


def pack_params(params, hp, weight_dtype=jnp.bfloat16):
    """Zero-pad every channel dim to the 128-lane width (one-time, at init).

    Weight matrices are stored in `weight_dtype` (bf16 by default: MXU-native,
    halves weight VMEM/DMA bytes); biases stay f32 (added after f32 accumulation).
    """
    chan_dims = [hp['in_channels'], hp['channels'], hp['reduced_size'],
                 hp['out_channels'], 25, 50, 75]
    cpad = _round_up(max(chan_dims), LANE)
    wlpad = _round_up(hp['window_length'], LANE)

    def pack_conv(w):                       # (K, cin, cout) -> (K*cpad, cpad)
        Kk, ci, co = w.shape
        wp = jnp.zeros((Kk * cpad, cpad), jnp.float32)
        for k in range(Kk):
            wp = wp.at[k * cpad:k * cpad + ci, :co].set(w[k])
        return wp.astype(weight_dtype)

    def pack_mat(w, rows, cols):            # (cin, cout) -> (rows, cols)
        wp = jnp.zeros((rows, cols), jnp.float32).at[:w.shape[0], :w.shape[1]].set(w)
        return wp.astype(weight_dtype)

    def pack_vec(b, cols):                  # (1, cout) -> (1, cols), stays f32
        return jnp.zeros((1, cols), jnp.float32).at[:, :b.shape[1]].set(b)

    kp = {'cpad': cpad, 'wlpad': wlpad, 'blocks': []}
    dilations, has_res = [], []
    for blk in params['blocks']:
        dilations.append(blk['dilation'])
        has_res.append('wres' in blk)
        pblk = {'w1': pack_conv(blk['w1']), 'b1': pack_vec(blk['b1'], cpad),
                'w2': pack_conv(blk['w2']), 'b2': pack_vec(blk['b2'], cpad)}
        if 'wres' in blk:
            pblk['wres'] = pack_mat(blk['wres'][0], cpad, cpad)
            pblk['bres'] = pack_vec(blk['bres'], cpad)
        kp['blocks'].append(pblk)
    kp['dilations'] = tuple(dilations)
    kp['has_res'] = tuple(has_res)

    kp['wlin'] = pack_mat(params['wlin'], cpad, cpad)
    kp['blin'] = pack_vec(params['blin'], cpad)
    kp['w1'] = pack_mat(params['w1'], cpad, cpad); kp['b1'] = pack_vec(params['b1'], cpad)
    kp['w2'] = pack_mat(params['w2'], cpad, cpad); kp['b2'] = pack_vec(params['b2'], cpad)
    kp['w3'] = pack_mat(params['w3'], cpad, cpad); kp['b3'] = pack_vec(params['b3'], cpad)
    kp['w4'] = pack_mat(params['w4'], cpad, wlpad); kp['b4'] = pack_vec(params['b4'], wlpad)
    return kp


# ----------------------------------------------------------------------------
# Pure-JAX reference (unpadded f32 params) for correctness check
# ----------------------------------------------------------------------------
def _ref_conv(xpad, w, b, dilation, leaky, res=None):
    K = w.shape[0]
    L = xpad.shape[1] - (K - 1) * dilation
    out = jnp.zeros((xpad.shape[0], L, w.shape[2]), jnp.float32) + b
    for k in range(K):
        out = out + jnp.einsum('blc,cd->bld',
                               xpad[:, k * dilation:k * dilation + L, :], w[k])
    if leaky:
        out = _leaky(out)
    if res is not None:
        out = out + res
    return out


def ref_forward(params, X, hp):
    K = hp['kernel_size']
    x = jnp.transpose(X, (0, 2, 1)).astype(jnp.float32)
    for blk in params['blocks']:
        d = blk['dilation']
        pad = (K - 1) * d
        xpad = jnp.pad(x, ((0, 0), (pad, 0), (0, 0)))
        h = _ref_conv(xpad, blk['w1'], blk['b1'], d, True)
        hpad = jnp.pad(h, ((0, 0), (pad, 0), (0, 0)))
        res = (_ref_conv(x, blk['wres'], blk['bres'], 1, False)
               if 'wres' in blk else x)
        x = _ref_conv(hpad, blk['w2'], blk['b2'], d, True, res=res)
    pooled = jnp.max(x, axis=1)
    code = pooled @ params['wlin'] + params['blin']
    h = _leaky(code @ params['w1'] + params['b1'])
    h = _leaky(h @ params['w2'] + params['b2'])
    h = _leaky(h @ params['w3'] + params['b3'])
    y = h @ params['w4'] + params['b4']
    return y.reshape(-1, 1, hp['window_length']), code


# ----------------------------------------------------------------------------
if __name__ == "__main__":
    hp = dict(in_channels=1, channels=4, depth=2, reduced_size=8,
              out_channels=6, kernel_size=3, window_length=16)
    B = 8   # small batch; btile=4 -> grid of 2 steps (exercises batch tiling + 2 TCs)

    key = jax.random.PRNGKey(0)
    pkey, xkey = jax.random.split(key)
    params = init_params(pkey, hp)
    X = jax.random.normal(xkey, (B, hp['in_channels'], hp['window_length']),
                          jnp.float32)

    Y_ref, code_ref = ref_forward(params, X, hp)

    # 1) f32-weight run: validates the fused/batched kernel structure at tight tolerance.
    kp_f32 = pack_params(params, hp, weight_dtype=jnp.float32)
    Y32, code32 = causal_ae_forward(kp_f32, X, hp)
    jax.block_until_ready((Y32, code32))
    assert Y32.shape == (B, 1, hp['window_length'])
    assert code32.shape == (B, hp['out_channels'])
    assert jnp.allclose(Y32, Y_ref, atol=1e-3, rtol=1e-3)
    assert jnp.allclose(code32, code_ref, atol=1e-3, rtol=1e-3)

    # 2) bf16-weight run (the optimized path): checked at bf16-appropriate tolerance.
    kp_bf16 = pack_params(params, hp, weight_dtype=jnp.bfloat16)
    Y, code = causal_ae_forward(kp_bf16, X, hp)
    jax.block_until_ready((Y, code))
    assert Y.shape == (B, 1, hp['window_length'])
    assert code.shape == (B, hp['out_channels'])
    assert jnp.allclose(Y, Y_ref, atol=5e-2, rtol=5e-2)
    assert jnp.allclose(code, code_ref, atol=5e-2, rtol=5e-2)

    print("KERNEL_OK")
</pallas_src>

<mosaic_0001>
module attributes {stable_mosaic.version = 11 : i64} {
  func.func @kernel(%arg0: i32, %arg1: memref<1x4x16x128xf32, #tpu.memory_space<vmem>>, %arg2: memref<384x128xf32, #tpu.memory_space<vmem>>, %arg3: memref<1x128xf32, #tpu.memory_space<vmem>>, %arg4: memref<384x128xf32, #tpu.memory_space<vmem>>, %arg5: memref<1x128xf32, #tpu.memory_space<vmem>>, %arg6: memref<128x128xf32, #tpu.memory_space<vmem>>, %arg7: memref<1x128xf32, #tpu.memory_space<vmem>>, %arg8: memref<384x128xf32, #tpu.memory_space<vmem>>, %arg9: memref<1x128xf32, #tpu.memory_space<vmem>>, %arg10: memref<384x128xf32, #tpu.memory_space<vmem>>, %arg11: memref<1x128xf32, #tpu.memory_space<vmem>>, %arg12: memref<384x128xf32, #tpu.memory_space<vmem>>, %arg13: memref<1x128xf32, #tpu.memory_space<vmem>>, %arg14: memref<384x128xf32, #tpu.memory_space<vmem>>, %arg15: memref<1x128xf32, #tpu.memory_space<vmem>>, %arg16: memref<128x128xf32, #tpu.memory_space<vmem>>, %arg17: memref<1x128xf32, #tpu.memory_space<vmem>>, %arg18: memref<128x128xf32, #tpu.memory_space<vmem>>, %arg19: memref<1x128xf32, #tpu.memory_space<vmem>>, %arg20: memref<128x128xf32, #tpu.memory_space<vmem>>, %arg21: memref<1x128xf32, #tpu.memory_space<vmem>>, %arg22: memref<128x128xf32, #tpu.memory_space<vmem>>, %arg23: memref<1x128xf32, #tpu.memory_space<vmem>>, %arg24: memref<128x128xf32, #tpu.memory_space<vmem>>, %arg25: memref<1x128xf32, #tpu.memory_space<vmem>>, %arg26: memref<128x128xf32, #tpu.memory_space<vmem>>, %arg27: memref<1x128xf32, #tpu.memory_space<vmem>>, %arg28: memref<1x4x128xf32, #tpu.memory_space<vmem>>, %arg29: memref<1x4x128xf32, #tpu.memory_space<vmem>>, %arg30: memref<4x24x128xf32, #tpu.memory_space<vmem>>) attributes {dimension_semantics = [#tpu.dimension_semantics<parallel>], iteration_bounds = array<i64: 2>, scalar_prefetch = 0 : i64, scratch_operands = 1 : i64, tpu.core_type = #tpu.core_type<tc>, window_params = [{transform_indices = @transform_0, window_bounds = array<i64: 1, 4, 16, 128>}, {pipeline_mode = #tpu.pipeline_mode<synchronous>, transform_indices = @transform_1, window_bounds = array<i64: 384, 128>}, {pipeline_mode = #tpu.pipeline_mode<synchronous>, transform_indices = @transform_2, window_bounds = array<i64: 1, 128>}, {pipeline_mode = #tpu.pipeline_mode<synchronous>, transform_indices = @transform_3, window_bounds = array<i64: 384, 128>}, {pipeline_mode = #tpu.pipeline_mode<synchronous>, transform_indices = @transform_4, window_bounds = array<i64: 1, 128>}, {pipeline_mode = #tpu.pipeline_mode<synchronous>, transform_indices = @transform_5, window_bounds = array<i64: 128, 128>}, {pipeline_mode = #tpu.pipeline_mode<synchronous>, transform_indices = @transform_6, window_bounds = array<i64: 1, 128>}, {pipeline_mode = #tpu.pipeline_mode<synchronous>, transform_indices = @transform_7, window_bounds = array<i64: 384, 128>}, {pipeline_mode = #tpu.pipeline_mode<synchronous>, transform_indices = @transform_8, window_bounds = array<i64: 1, 128>}, {pipeline_mode = #tpu.pipeline_mode<synchronous>, transform_indices = @transform_9, window_bounds = array<i64: 384, 128>}, {pipeline_mode = #tpu.pipeline_mode<synchronous>, transform_indices = @transform_10, window_bounds = array<i64: 1, 128>}, {pipeline_mode = #tpu.pipeline_mode<synchronous>, transform_indices = @transform_11, window_bounds = array<i64: 384, 128>}, {pipeline_mode = #tpu.pipeline_mode<synchronous>, transform_indices = @transform_12, window_bounds = array<i64: 1, 128>}, {pipeline_mode = #tpu.pipeline_mode<synchronous>, transform_indices = @transform_13, window_bounds = array<i64: 384, 128>}, {pipeline_mode = #tpu.pipeline_mode<synchronous>, transform_indices = @transform_14, window_bounds = array<i64: 1, 128>}, {pipeline_mode = #tpu.pipeline_mode<synchronous>, transform_indices = @transform_15, window_bounds = array<i64: 128, 128>}, {pipeline_mode = #tpu.pipeline_mode<synchronous>, transform_indices = @transform_16, window_bounds = array<i64: 1, 128>}, {pipeline_mode = #tpu.pipeline_mode<synchronous>, transform_indices = @transform_17, window_bounds = array<i64: 128, 128>}, {pipeline_mode = #tpu.pipeline_mode<synchronous>, transform_indices = @transform_18, window_bounds = array<i64: 1, 128>}, {pipeline_mode = #tpu.pipeline_mode<synchronous>, transform_indices = @transform_19, window_bounds = array<i64: 128, 128>}, {pipeline_mode = #tpu.pipeline_mode<synchronous>, transform_indices = @transform_20, window_bounds = array<i64: 1, 128>}, {pipeline_mode = #tpu.pipeline_mode<synchronous>, transform_indices = @transform_21, window_bounds = array<i64: 128, 128>}, {pipeline_mode = #tpu.pipeline_mode<synchronous>, transform_indices = @transform_22, window_bounds = array<i64: 1, 128>}, {pipeline_mode = #tpu.pipeline_mode<synchronous>, transform_indices = @transform_23, window_bounds = array<i64: 128, 128>}, {pipeline_mode = #tpu.pipeline_mode<synchronous>, transform_indices = @transform_24, window_bounds = array<i64: 1, 128>}, {pipeline_mode = #tpu.pipeline_mode<synchronous>, transform_indices = @transform_25, window_bounds = array<i64: 128, 128>}, {pipeline_mode = #tpu.pipeline_mode<synchronous>, transform_indices = @transform_26, window_bounds = array<i64: 1, 128>}, {transform_indices = @transform_27, window_bounds = array<i64: 1, 4, 128>}, {transform_indices = @transform_28, window_bounds = array<i64: 1, 4, 128>}]} {
    %cst = arith.constant 0.000000e+00 : f32
    %0 = vector.broadcast %cst : f32 to vector<4x8x128xf32>
    %c0 = arith.constant 0 : index
    %c0_0 = arith.constant 0 : index
    %c0_1 = arith.constant 0 : index
    %1 = vector.load %arg30[%c0, %c0_0, %c0_1] : memref<4x24x128xf32, #tpu.memory_space<vmem>>, vector<4x8x128xf32>
    tpu.vector_store %arg30[%c0, %c0_0, %c0_1], %0 {strides = array<i32>} : memref<4x24x128xf32, #tpu.memory_space<vmem>>, vector<4x8x128xf32>,
    %c0_2 = arith.constant 0 : index
    %c0_3 = arith.constant 0 : index
    %c0_4 = arith.constant 0 : index
    %c0_5 = arith.constant 0 : index
    %2 = vector.load %arg1[%c0_2, %c0_3, %c0_4, %c0_5] : memref<1x4x16x128xf32, #tpu.memory_space<vmem>>, vector<1x4x16x128xf32>
    %3 = vector.shape_cast %2 : vector<1x4x16x128xf32> to vector<4x16x128xf32>
    %c0_6 = arith.constant 0 : index
    %c8 = arith.constant 8 : index
    %c0_7 = arith.constant 0 : index
    %4 = vector.load %arg30[%c0_6, %c8, %c0_7] : memref<4x24x128xf32, #tpu.memory_space<vmem>>, vector<4x16x128xf32>
    tpu.vector_store %arg30[%c0_6, %c8, %c0_7], %3 {strides = array<i32>} : memref<4x24x128xf32, #tpu.memory_space<vmem>>, vector<4x16x128xf32>,
    %c0_8 = arith.constant 0 : index
    %c6 = arith.constant 6 : index
    %c0_9 = arith.constant 0 : index
    %5 = vector.load %arg30[%c0_8, %c6, %c0_9] : memref<4x24x128xf32, #tpu.memory_space<vmem>>, vector<4x16x128xf32>
    %c0_10 = arith.constant 0 : index
    %c7 = arith.constant 7 : index
    %c0_11 = arith.constant 0 : index
    %6 = vector.load %arg30[%c0_10, %c7, %c0_11] : memref<4x24x128xf32, #tpu.memory_space<vmem>>, vector<4x16x128xf32>
    %c0_12 = arith.constant 0 : index
    %c8_13 = arith.constant 8 : index
    %c0_14 = arith.constant 0 : index
    %7 = vector.load %arg30[%c0_12, %c8_13, %c0_14] : memref<4x24x128xf32, #tpu.memory_space<vmem>>, vector<4x16x128xf32>
    %8 = tpu.concatenate %5, %6, %7 in 2 : vector<4x16x128xf32>, vector<4x16x128xf32>, vector<4x16x128xf32> -> vector<4x16x384xf32>
    %9 = vector.shape_cast %8 : vector<4x16x384xf32> to vector<64x384xf32>
    %c0_15 = arith.constant 0 : index
    %c0_16 = arith.constant 0 : index
    %10 = vector.load %arg2[%c0_15, %c0_16] : memref<384x128xf32, #tpu.memory_space<vmem>>, vector<384x128xf32>
    %cst_17 = arith.constant dense<0.000000e+00> : vector<64x128xf32>
    %11 = tpu.matmul %9, %10, %cst_17 {dimension_numbers = #tpu.dot_dimension_numbers<[1], [0], [0], [1], [0, 0, 1, 1], [], []>} : vector<64x384xf32>, vector<384x128xf32>, vector<64x128xf32> -> vector<64x128xf32>
    %c0_18 = arith.constant 0 : index
    %c0_19 = arith.constant 0 : index
    %12 = vector.load %arg3[%c0_18, %c0_19] : memref<1x128xf32, #tpu.memory_space<vmem>>, vector<1x128xf32>
    %13 = vector.broadcast %12 : vector<1x128xf32> to vector<64x128xf32>
    %14 = arith.addf %11, %13 : vector<64x128xf32>
    %cst_20 = arith.constant 0.000000e+00 : f32
    %15 = vector.broadcast %cst_20 : f32 to vector<64x128xf32>
    %16 = arith.cmpf ogt, %14, %15 : vector<64x128xf32>
    %cst_21 = arith.constant 0.00999999977 : f32
    %17 = vector.broadcast %cst_21 : f32 to vector<64x128xf32>
    %18 = arith.mulf %17, %14 : vector<64x128xf32>
    %19 = arith.select %16, %14, %18 : vector<64x128xi1>, vector<64x128xf32>
    %20 = vector.shape_cast %19 : vector<64x128xf32> to vector<4x16x128xf32>
    %c0_22 = arith.constant 0 : index
    %c8_23 = arith.constant 8 : index
    %c0_24 = arith.constant 0 : index
    %21 = vector.load %arg30[%c0_22, %c8_23, %c0_24] : memref<4x24x128xf32, #tpu.memory_space<vmem>>, vector<4x16x128xf32>
    tpu.vector_store %arg30[%c0_22, %c8_23, %c0_24], %20 {strides = array<i32>} : memref<4x24x128xf32, #tpu.memory_space<vmem>>, vector<4x16x128xf32>,
    %c0_25 = arith.constant 0 : index
    %c6_26 = arith.constant 6 : index
    %c0_27 = arith.constant 0 : index
    %22 = vector.load %arg30[%c0_25, %c6_26, %c0_27] : memref<4x24x128xf32, #tpu.memory_space<vmem>>, vector<4x16x128xf32>
    %c0_28 = arith.constant 0 : index
    %c7_29 = arith.constant 7 : index
    %c0_30 = arith.constant 0 : index
    %23 = vector.load %arg30[%c0_28, %c7_29, %c0_30] : memref<4x24x128xf32, #tpu.memory_space<vmem>>, vector<4x16x128xf32>
    %c0_31 = arith.constant 0 : index
    %c8_32 = arith.constant 8 : index
    %c0_33 = arith.constant 0 : index
    %24 = vector.load %arg30[%c0_31, %c8_32, %c0_33] : memref<4x24x128xf32, #tpu.memory_space<vmem>>, vector<4x16x128xf32>
    %25 = tpu.concatenate %22, %23, %24 in 2 : vector<4x16x128xf32>, vector<4x16x128xf32>, vector<4x16x128xf32> -> vector<4x16x384xf32>
    %26 = vector.shape_cast %25 : vector<4x16x384xf32> to vector<64x384xf32>
    %c0_34 = arith.constant 0 : index
    %c0_35 = arith.constant 0 : index
    %27 = vector.load %arg4[%c0_34, %c0_35] : memref<384x128xf32, #tpu.memory_space<vmem>>, vector<384x128xf32>
    %cst_36 = arith.constant dense<0.000000e+00> : vector<64x128xf32>
    %28 = tpu.matmul %26, %27, %cst_36 {dimension_numbers = #tpu.dot_dimension_numbers<[1], [0], [0], [1], [0, 0, 1, 1], [], []>} : vector<64x384xf32>, vector<384x128xf32>, vector<64x128xf32> -> vector<64x128xf32>
    %c0_37 = arith.constant 0 : index
    %c0_38 = arith.constant 0 : index
    %29 = vector.load %arg5[%c0_37, %c0_38] : memref<1x128xf32, #tpu.memory_space<vmem>>, vector<1x128xf32>
    %30 = vector.broadcast %29 : vector<1x128xf32> to vector<64x128xf32>
    %31 = arith.addf %28, %30 : vector<64x128xf32>
    %cst_39 = arith.constant 0.000000e+00 : f32
    %32 = vector.broadcast %cst_39 : f32 to vector<64x128xf32>
    %33 = arith.cmpf ogt, %31, %32 : vector<64x128xf32>
    %cst_40 = arith.constant 0.00999999977 : f32
    %34 = vector.broadcast %cst_40 : f32 to vector<64x128xf32>
    %35 = arith.mulf %34, %31 : vector<64x128xf32>
    %36 = arith.select %33, %31, %35 : vector<64x128xi1>, vector<64x128xf32>
    %37 = vector.shape_cast %36 : vector<64x128xf32> to vector<4x16x128xf32>
    %38 = vector.shape_cast %3 : vector<4x16x128xf32> to vector<64x128xf32>
    %c0_41 = arith.constant 0 : index
    %c0_42 = arith.constant 0 : index
    %39 = vector.load %arg6[%c0_41, %c0_42] : memref<128x128xf32, #tpu.memory_space<vmem>>, vector<128x128xf32>
    %cst_43 = arith.constant dense<0.000000e+00> : vector<64x128xf32>
    %40 = tpu.matmul %38, %39, %cst_43 {dimension_numbers = #tpu.dot_dimension_numbers<[1], [0], [0], [1], [0, 0, 1, 1], [], []>} : vector<64x128xf32>, vector<128x128xf32>, vector<64x128xf32> -> vector<64x128xf32>
    %c0_44 = arith.constant 0 : index
    %c0_45 = arith.constant 0 : index
    %41 = vector.load %arg7[%c0_44, %c0_45] : memref<1x128xf32, #tpu.memory_space<vmem>>, vector<1x128xf32>
    %42 = vector.broadcast %41 : vector<1x128xf32> to vector<64x128xf32>
    %43 = arith.addf %40, %42 : vector<64x128xf32>
    %44 = vector.shape_cast %43 : vector<64x128xf32> to vector<4x16x128xf32>
    %45 = arith.addf %37, %44 : vector<4x16x128xf32>
    %c0_46 = arith.constant 0 : index
    %c8_47 = arith.constant 8 : index
    %c0_48 = arith.constant 0 : index
    %46 = vector.load %arg30[%c0_46, %c8_47, %c0_48] : memref<4x24x128xf32, #tpu.memory_space<vmem>>, vector<4x16x128xf32>
    tpu.vector_store %arg30[%c0_46, %c8_47, %c0_48], %45 {strides = array<i32>} : memref<4x24x128xf32, #tpu.memory_space<vmem>>, vector<4x16x128xf32>,
    %c0_49 = arith.constant 0 : index
    %c4 = arith.constant 4 : index
    %c0_50 = arith.constant 0 : index
    %47 = vector.load %arg30[%c0_49, %c4, %c0_50] : memref<4x24x128xf32, #tpu.memory_space<vmem>>, vector<4x16x128xf32>
    %c0_51 = arith.constant 0 : index
    %c6_52 = arith.constant 6 : index
    %c0_53 = arith.constant 0 : index
    %48 = vector.load %arg30[%c0_51, %c6_52, %c0_53] : memref<4x24x128xf32, #tpu.memory_space<vmem>>, vector<4x16x128xf32>
    %c0_54 = arith.constant 0 : index
    %c8_55 = arith.constant 8 : index
    %c0_56 = arith.constant 0 : index
    %49 = vector.load %arg30[%c0_54, %c8_55, %c0_56] : memref<4x24x128xf32, #tpu.memory_space<vmem>>, vector<4x16x128xf32>
    %50 = tpu.concatenate %47, %48, %49 in 2 : vector<4x16x128xf32>, vector<4x16x128xf32>, vector<4x16x128xf32> -> vector<4x16x384xf32>
    %51 = vector.shape_cast %50 : vector<4x16x384xf32> to vector<64x384xf32>
    %c0_57 = arith.constant 0 : index
    %c0_58 = arith.constant 0 : index
    %52 = vector.load %arg8[%c0_57, %c0_58] : memref<384x128xf32, #tpu.memory_space<vmem>>, vector<384x128xf32>
    %cst_59 = arith.constant dense<0.000000e+00> : vector<64x128xf32>
    %53 = tpu.matmul %51, %52, %cst_59 {dimension_numbers = #tpu.dot_dimension_numbers<[1], [0], [0], [1], [0, 0, 1, 1], [], []>} : vector<64x384xf32>, vector<384x128xf32>, vector<64x128xf32> -> vector<64x128xf32>
    %c0_60 = arith.constant 0 : index
    %c0_61 = arith.constant 0 : index
    %54 = vector.load %arg9[%c0_60, %c0_61] : memref<1x128xf32, #tpu.memory_space<vmem>>, vector<1x128xf32>
    %55 = vector.broadcast %54 : vector<1x128xf32> to vector<64x128xf32>
    %56 = arith.addf %53, %55 : vector<64x128xf32>
    %cst_62 = arith.constant 0.000000e+00 : f32
    %57 = vector.broadcast %cst_62 : f32 to vector<64x128xf32>
    %58 = arith.cmpf ogt, %56, %57 : vector<64x128xf32>
    %cst_63 = arith.constant 0.00999999977 : f32
    %59 = vector.broadcast %cst_63 : f32 to vector<64x128xf32>
    %60 = arith.mulf %59, %56 : vector<64x128xf32>
    %61 = arith.select %58, %56, %60 : vector<64x128xi1>, vector<64x128xf32>
    %62 = vector.shape_cast %61 : vector<64x128xf32> to vector<4x16x128xf32>
    %c0_64 = arith.constant 0 : index
    %c8_65 = arith.constant 8 : index
    %c0_66 = arith.constant 0 : index
    %63 = vector.load %arg30[%c0_64, %c8_65, %c0_66] : memref<4x24x128xf32, #tpu.memory_space<vmem>>, vector<4x16x128xf32>
    tpu.vector_store %arg30[%c0_64, %c8_65, %c0_66], %62 {strides = array<i32>} : memref<4x24x128xf32, #tpu.memory_space<vmem>>, vector<4x16x128xf32>,
    %c0_67 = arith.constant 0 : index
    %c4_68 = arith.constant 4 : index
    %c0_69 = arith.constant 0 : index
    %64 = vector.load %arg30[%c0_67, %c4_68, %c0_69] : memref<4x24x128xf32, #tpu.memory_space<vmem>>, vector<4x16x128xf32>
    %c0_70 = arith.constant 0 : index
    %c6_71 = arith.constant 6 : index
    %c0_72 = arith.constant 0 : index
    %65 = vector.load %arg30[%c0_70, %c6_71, %c0_72] : memref<4x24x128xf32, #tpu.memory_space<vmem>>, vector<4x16x128xf32>
    %c0_73 = arith.constant 0 : index
    %c8_74 = arith.constant 8 : index
    %c0_75 = arith.constant 0 : index
    %66 = vector.load %arg30[%c0_73, %c8_74, %c0_75] : memref<4x24x128xf32, #tpu.memory_space<vmem>>, vector<4x16x128xf32>
    %67 = tpu.concatenate %64, %65, %66 in 2 : vector<4x16x128xf32>, vector<4x16x128xf32>, vector<4x16x128xf32> -> vector<4x16x384xf32>
    %68 = vector.shape_cast %67 : vector<4x16x384xf32> to vector<64x384xf32>
    %c0_76 = arith.constant 0 : index
    %c0_77 = arith.constant 0 : index
    %69 = vector.load %arg10[%c0_76, %c0_77] : memref<384x128xf32, #tpu.memory_space<vmem>>, vector<384x128xf32>
    %cst_78 = arith.constant dense<0.000000e+00> : vector<64x128xf32>
    %70 = tpu.matmul %68, %69, %cst_78 {dimension_numbers = #tpu.dot_dimension_numbers<[1], [0], [0], [1], [0, 0, 1, 1], [], []>} : vector<64x384xf32>, vector<384x128xf32>, vector<64x128xf32> -> vector<64x128xf32>
    %c0_79 = arith.constant 0 : index
    %c0_80 = arith.constant 0 : index
    %71 = vector.load %arg11[%c0_79, %c0_80] : memref<1x128xf32, #tpu.memory_space<vmem>>, vector<1x128xf32>
    %72 = vector.broadcast %71 : vector<1x128xf32> to vector<64x128xf32>
    %73 = arith.addf %70, %72 : vector<64x128xf32>
    %cst_81 = arith.constant 0.000000e+00 : f32
    %74 = vector.broadcast %cst_81 : f32 to vector<64x128xf32>
    %75 = arith.cmpf ogt, %73, %74 : vector<64x128xf32>
    %cst_82 = arith.constant 0.00999999977 : f32
    %76 = vector.broadcast %cst_82 : f32 to vector<64x128xf32>
    %77 = arith.mulf %76, %73 : vector<64x128xf32>
    %78 = arith.select %75, %73, %77 : vector<64x128xi1>, vector<64x128xf32>
    %79 = vector.shape_cast %78 : vector<64x128xf32> to vector<4x16x128xf32>
    %80 = arith.addf %79, %45 : vector<4x16x128xf32>
    %c0_83 = arith.constant 0 : index
    %c8_84 = arith.constant 8 : index
    %c0_85 = arith.constant 0 : index
    %81 = vector.load %arg30[%c0_83, %c8_84, %c0_85] : memref<4x24x128xf32, #tpu.memory_space<vmem>>, vector<4x16x128xf32>
    tpu.vector_store %arg30[%c0_83, %c8_84, %c0_85], %80 {strides = array<i32>} : memref<4x24x128xf32, #tpu.memory_space<vmem>>, vector<4x16x128xf32>,
    %c0_86 = arith.constant 0 : index
    %c0_87 = arith.constant 0 : index
    %c0_88 = arith.constant 0 : index
    %82 = vector.load %arg30[%c0_86, %c0_87, %c0_88] : memref<4x24x128xf32, #tpu.memory_space<vmem>>, vector<4x16x128xf32>
    %c0_89 = arith.constant 0 : index
    %c4_90 = arith.constant 4 : index
    %c0_91 = arith.constant 0 : index
    %83 = vector.load %arg30[%c0_89, %c4_90, %c0_91] : memref<4x24x128xf32, #tpu.memory_space<vmem>>, vector<4x16x128xf32>
    %c0_92 = arith.constant 0 : index
    %c8_93 = arith.constant 8 : index
    %c0_94 = arith.constant 0 : index
    %84 = vector.load %arg30[%c0_92, %c8_93, %c0_94] : memref<4x24x128xf32, #tpu.memory_space<vmem>>, vector<4x16x128xf32>
    %85 = tpu.concatenate %82, %83, %84 in 2 : vector<4x16x128xf32>, vector<4x16x128xf32>, vector<4x16x128xf32> -> vector<4x16x384xf32>
    %86 = vector.shape_cast %85 : vector<4x16x384xf32> to vector<64x384xf32>
    %c0_95 = arith.constant 0 : index
    %c0_96 = arith.constant 0 : index
    %87 = vector.load %arg12[%c0_95, %c0_96] : memref<384x128xf32, #tpu.memory_space<vmem>>, vector<384x128xf32>
    %cst_97 = arith.constant dense<0.000000e+00> : vector<64x128xf32>
    %88 = tpu.matmul %86, %87, %cst_97 {dimension_numbers = #tpu.dot_dimension_numbers<[1], [0], [0], [1], [0, 0, 1, 1], [], []>} : vector<64x384xf32>, vector<384x128xf32>, vector<64x128xf32> -> vector<64x128xf32>
    %c0_98 = arith.constant 0 : index
    %c0_99 = arith.constant 0 : index
    %89 = vector.load %arg13[%c0_98, %c0_99] : memref<1x128xf32, #tpu.memory_space<vmem>>, vector<1x128xf32>
    %90 = vector.broadcast %89 : vector<1x128xf32> to vector<64x128xf32>
    %91 = arith.addf %88, %90 : vector<64x128xf32>
    %cst_100 = arith.constant 0.000000e+00 : f32
    %92 = vector.broadcast %cst_100 : f32 to vector<64x128xf32>
    %93 = arith.cmpf ogt, %91, %92 : vector<64x128xf32>
    %cst_101 = arith.constant 0.00999999977 : f32
    %94 = vector.broadcast %cst_101 : f32 to vector<64x128xf32>
    %95 = arith.mulf %94, %91 : vector<64x128xf32>
    %96 = arith.select %93, %91, %95 : vector<64x128xi1>, vector<64x128xf32>
    %97 = vector.shape_cast %96 : vector<64x128xf32> to vector<4x16x128xf32>
    %c0_102 = arith.constant 0 : index
    %c8_103 = arith.constant 8 : index
    %c0_104 = arith.constant 0 : index
    %98 = vector.load %arg30[%c0_102, %c8_103, %c0_104] : memref<4x24x128xf32, #tpu.memory_space<vmem>>, vector<4x16x128xf32>
    tpu.vector_store %arg30[%c0_102, %c8_103, %c0_104], %97 {strides = array<i32>} : memref<4x24x128xf32, #tpu.memory_space<vmem>>, vector<4x16x128xf32>,
    %c0_105 = arith.constant 0 : index
    %c0_106 = arith.constant 0 : index
    %c0_107 = arith.constant 0 : index
    %99 = vector.load %arg30[%c0_105, %c0_106, %c0_107] : memref<4x24x128xf32, #tpu.memory_space<vmem>>, vector<4x16x128xf32>
    %c0_108 = arith.constant 0 : index
    %c4_109 = arith.constant 4 : index
    %c0_110 = arith.constant 0 : index
    %100 = vector.load %arg30[%c0_108, %c4_109, %c0_110] : memref<4x24x128xf32, #tpu.memory_space<vmem>>, vector<4x16x128xf32>
    %c0_111 = arith.constant 0 : index
    %c8_112 = arith.constant 8 : index
    %c0_113 = arith.constant 0 : index
    %101 = vector.load %arg30[%c0_111, %c8_112, %c0_113] : memref<4x24x128xf32, #tpu.memory_space<vmem>>, vector<4x16x128xf32>
    %102 = tpu.concatenate %99, %100, %101 in 2 : vector<4x16x128xf32>, vector<4x16x128xf32>, vector<4x16x128xf32> -> vector<4x16x384xf32>
    %103 = vector.shape_cast %102 : vector<4x16x384xf32> to vector<64x384xf32>
    %c0_114 = arith.constant 0 : index
    %c0_115 = arith.constant 0 : index
    %104 = vector.load %arg14[%c0_114, %c0_115] : memref<384x128xf32, #tpu.memory_space<vmem>>, vector<384x128xf32>
    %cst_116 = arith.constant dense<0.000000e+00> : vector<64x128xf32>
    %105 = tpu.matmul %103, %104, %cst_116 {dimension_numbers = #tpu.dot_dimension_numbers<[1], [0], [0], [1], [0, 0, 1, 1], [], []>} : vector<64x384xf32>, vector<384x128xf32>, vector<64x128xf32> -> vector<64x128xf32>
    %c0_117 = arith.constant 0 : index
    %c0_118 = arith.constant 0 : index
    %106 = vector.load %arg15[%c0_117, %c0_118] : memref<1x128xf32, #tpu.memory_space<vmem>>, vector<1x128xf32>
    %107 = vector.broadcast %106 : vector<1x128xf32> to vector<64x128xf32>
    %108 = arith.addf %105, %107 : vector<64x128xf32>
    %cst_119 = arith.constant 0.000000e+00 : f32
    %109 = vector.broadcast %cst_119 : f32 to vector<64x128xf32>
    %110 = arith.cmpf ogt, %108, %109 : vector<64x128xf32>
    %cst_120 = arith.constant 0.00999999977 : f32
    %111 = vector.broadcast %cst_120 : f32 to vector<64x128xf32>
    %112 = arith.mulf %111, %108 : vector<64x128xf32>
    %113 = arith.select %110, %108, %112 : vector<64x128xi1>, vector<64x128xf32>
    %114 = vector.shape_cast %113 : vector<64x128xf32> to vector<4x16x128xf32>
    %115 = vector.shape_cast %80 : vector<4x16x128xf32> to vector<64x128xf32>
    %c0_121 = arith.constant 0 : index
    %c0_122 = arith.constant 0 : index
    %116 = vector.load %arg16[%c0_121, %c0_122] : memref<128x128xf32, #tpu.memory_space<vmem>>, vector<128x128xf32>
    %cst_123 = arith.constant dense<0.000000e+00> : vector<64x128xf32>
    %117 = tpu.matmul %115, %116, %cst_123 {dimension_numbers = #tpu.dot_dimension_numbers<[1], [0], [0], [1], [0, 0, 1, 1], [], []>} : vector<64x128xf32>, vector<128x128xf32>, vector<64x128xf32> -> vector<64x128xf32>
    %c0_124 = arith.constant 0 : index
    %c0_125 = arith.constant 0 : index
    %118 = vector.load %arg17[%c0_124, %c0_125] : memref<1x128xf32, #tpu.memory_space<vmem>>, vector<1x128xf32>
    %119 = vector.broadcast %118 : vector<1x128xf32> to vector<64x128xf32>
    %120 = arith.addf %117, %119 : vector<64x128xf32>
    %121 = vector.shape_cast %120 : vector<64x128xf32> to vector<4x16x128xf32>
    %122 = arith.addf %114, %121 : vector<4x16x128xf32>
    %cst_126 = arith.constant dense<0xFF800000> : vector<4x128xf32>
    %123 = vector.multi_reduction <maximumf>, %122, %cst_126 [1] : vector<4x16x128xf32> to vector<4x128xf32>
    %c0_127 = arith.constant 0 : index
    %c0_128 = arith.constant 0 : index
    %124 = vector.load %arg18[%c0_127, %c0_128] : memref<128x128xf32, #tpu.memory_space<vmem>>, vector<128x128xf32>
    %cst_129 = arith.constant dense<0.000000e+00> : vector<4x128xf32>
    %125 = tpu.matmul %123, %124, %cst_129 {dimension_numbers = #tpu.dot_dimension_numbers<[1], [0], [0], [1], [0, 0, 1, 1], [], []>} : vector<4x128xf32>, vector<128x128xf32>, vector<4x128xf32> -> vector<4x128xf32>
    %c0_130 = arith.constant 0 : index
    %c0_131 = arith.constant 0 : index
    %126 = vector.load %arg19[%c0_130, %c0_131] : memref<1x128xf32, #tpu.memory_space<vmem>>, vector<1x128xf32>
    %127 = vector.broadcast %126 : vector<1x128xf32> to vector<4x128xf32>
    %128 = arith.addf %125, %127 : vector<4x128xf32>
    %c0_132 = arith.constant 0 : index
    %c0_133 = arith.constant 0 : index
    %c0_134 = arith.constant 0 : index
    %129 = vector.load %arg28[%c0_132, %c0_133, %c0_134] : memref<1x4x128xf32, #tpu.memory_space<vmem>>, vector<1x4x128xf32>
    %130 = vector.shape_cast %129 : vector<1x4x128xf32> to vector<4x128xf32>
    %131 = vector.shape_cast %128 : vector<4x128xf32> to vector<1x4x128xf32>
    tpu.vector_store %arg28[%c0_132, %c0_133, %c0_134], %131 {strides = array<i32>} : memref<1x4x128xf32, #tpu.memory_space<vmem>>, vector<1x4x128xf32>,
    %c0_135 = arith.constant 0 : index
    %c0_136 = arith.constant 0 : index
    %132 = vector.load %arg20[%c0_135, %c0_136] : memref<128x128xf32, #tpu.memory_space<vmem>>, vector<128x128xf32>
    %cst_137 = arith.constant dense<0.000000e+00> : vector<4x128xf32>
    %133 = tpu.matmul %128, %132, %cst_137 {dimension_numbers = #tpu.dot_dimension_numbers<[1], [0], [0], [1], [0, 0, 1, 1], [], []>} : vector<4x128xf32>, vector<128x128xf32>, vector<4x128xf32> -> vector<4x128xf32>
    %c0_138 = arith.constant 0 : index
    %c0_139 = arith.constant 0 : index
    %134 = vector.load %arg21[%c0_138, %c0_139] : memref<1x128xf32, #tpu.memory_space<vmem>>, vector<1x128xf32>
    %135 = vector.broadcast %134 : vector<1x128xf32> to vector<4x128xf32>
    %136 = arith.addf %133, %135 : vector<4x128xf32>
    %cst_140 = arith.constant 0.000000e+00 : f32
    %137 = vector.broadcast %cst_140 : f32 to vector<4x128xf32>
    %138 = arith.cmpf ogt, %136, %137 : vector<4x128xf32>
    %cst_141 = arith.constant 0.00999999977 : f32
    %139 = vector.broadcast %cst_141 : f32 to vector<4x128xf32>
    %140 = arith.mulf %139, %136 : vector<4x128xf32>
    %141 = arith.select %138, %136, %140 : vector<4x128xi1>, vector<4x128xf32>
    %c0_142 = arith.constant 0 : index
    %c0_143 = arith.constant 0 : index
    %142 = vector.load %arg22[%c0_142, %c0_143] : memref<128x128xf32, #tpu.memory_space<vmem>>, vector<128x128xf32>
    %cst_144 = arith.constant dense<0.000000e+00> : vector<4x128xf32>
    %143 = tpu.matmul %141, %142, %cst_144 {dimension_numbers = #tpu.dot_dimension_numbers<[1], [0], [0], [1], [0, 0, 1, 1], [], []>} : vector<4x128xf32>, vector<128x128xf32>, vector<4x128xf32> -> vector<4x128xf32>
    %c0_145 = arith.constant 0 : index
    %c0_146 = arith.constant 0 : index
    %144 = vector.load %arg23[%c0_145, %c0_146] : memref<1x128xf32, #tpu.memory_space<vmem>>, vector<1x128xf32>
    %145 = vector.broadcast %144 : vector<1x128xf32> to vector<4x128xf32>
    %146 = arith.addf %143, %145 : vector<4x128xf32>
    %cst_147 = arith.constant 0.000000e+00 : f32
    %147 = vector.broadcast %cst_147 : f32 to vector<4x128xf32>
    %148 = arith.cmpf ogt, %146, %147 : vector<4x128xf32>
    %cst_148 = arith.constant 0.00999999977 : f32
    %149 = vector.broadcast %cst_148 : f32 to vector<4x128xf32>
    %150 = arith.mulf %149, %146 : vector<4x128xf32>
    %151 = arith.select %148, %146, %150 : vector<4x128xi1>, vector<4x128xf32>
    %c0_149 = arith.constant 0 : index
    %c0_150 = arith.constant 0 : index
    %152 = vector.load %arg24[%c0_149, %c0_150] : memref<128x128xf32, #tpu.memory_space<vmem>>, vector<128x128xf32>
    %cst_151 = arith.constant dense<0.000000e+00> : vector<4x128xf32>
    %153 = tpu.matmul %151, %152, %cst_151 {dimension_numbers = #tpu.dot_dimension_numbers<[1], [0], [0], [1], [0, 0, 1, 1], [], []>} : vector<4x128xf32>, vector<128x128xf32>, vector<4x128xf32> -> vector<4x128xf32>
    %c0_152 = arith.constant 0 : index
    %c0_153 = arith.constant 0 : index
    %154 = vector.load %arg25[%c0_152, %c0_153] : memref<1x128xf32, #tpu.memory_space<vmem>>, vector<1x128xf32>
    %155 = vector.broadcast %154 : vector<1x128xf32> to vector<4x128xf32>
    %156 = arith.addf %153, %155 : vector<4x128xf32>
    %cst_154 = arith.constant 0.000000e+00 : f32
    %157 = vector.broadcast %cst_154 : f32 to vector<4x128xf32>
    %158 = arith.cmpf ogt, %156, %157 : vector<4x128xf32>
    %cst_155 = arith.constant 0.00999999977 : f32
    %159 = vector.broadcast %cst_155 : f32 to vector<4x128xf32>
    %160 = arith.mulf %159, %156 : vector<4x128xf32>
    %161 = arith.select %158, %156, %160 : vector<4x128xi1>, vector<4x128xf32>
    %c0_156 = arith.constant 0 : index
    %c0_157 = arith.constant 0 : index
    %162 = vector.load %arg26[%c0_156, %c0_157] : memref<128x128xf32, #tpu.memory_space<vmem>>, vector<128x128xf32>
    %cst_158 = arith.constant dense<0.000000e+00> : vector<4x128xf32>
    %163 = tpu.matmul %161, %162, %cst_158 {dimension_numbers = #tpu.dot_dimension_numbers<[1], [0], [0], [1], [0, 0, 1, 1], [], []>} : vector<4x128xf32>, vector<128x128xf32>, vector<4x128xf32> -> vector<4x128xf32>
    %c0_159 = arith.constant 0 : index
    %c0_160 = arith.constant 0 : index
    %164 = vector.load %arg27[%c0_159, %c0_160] : memref<1x128xf32, #tpu.memory_space<vmem>>, vector<1x128xf32>
    %165 = vector.broadcast %164 : vector<1x128xf32> to vector<4x128xf32>
    %166 = arith.addf %163, %165 : vector<4x128xf32>
    %c0_161 = arith.constant 0 : index
    %c0_162 = arith.constant 0 : index
    %c0_163 = arith.constant 0 : index
    %167 = vector.load %arg29[%c0_161, %c0_162, %c0_163] : memref<1x4x128xf32, #tpu.memory_space<vmem>>, vector<1x4x128xf32>
    %168 = vector.shape_cast %167 : vector<1x4x128xf32> to vector<4x128xf32>
    %169 = vector.shape_cast %166 : vector<4x128xf32> to vector<1x4x128xf32>
    tpu.vector_store %arg29[%c0_161, %c0_162, %c0_163], %169 {strides = array<i32>} : memref<1x4x128xf32, #tpu.memory_space<vmem>>, vector<1x4x128xf32>,
    return
  }
  func.func @transform_0(%arg0: i32) -> (i32, i32, i32, i32) {
    %c0_i32 = arith.constant 0 : i32
    %c0_i32_0 = arith.constant 0 : i32
    %c0_i32_1 = arith.constant 0 : i32
    %c0_i32_2 = arith.constant 0 : i32
    return %arg0, %c0_i32, %c0_i32_0, %c0_i32_1 : i32, i32, i32, i32
  }
  func.func @transform_1(%arg0: i32) -> (i32, i32) {
    %c0_i32 = arith.constant 0 : i32
    %c0_i32_0 = arith.constant 0 : i32
    %c0_i32_1 = arith.constant 0 : i32
    return %c0_i32, %c0_i32_0 : i32, i32
  }
  func.func @transform_2(%arg0: i32) -> (i32, i32) {
    %c0_i32 = arith.constant 0 : i32
    %c0_i32_0 = arith.constant 0 : i32
    %c0_i32_1 = arith.constant 0 : i32
    return %c0_i32, %c0_i32_0 : i32, i32
  }
  func.func @transform_3(%arg0: i32) -> (i32, i32) {
    %c0_i32 = arith.constant 0 : i32
    %c0_i32_0 = arith.constant 0 : i32
    %c0_i32_1 = arith.constant 0 : i32
    return %c0_i32, %c0_i32_0 : i32, i32
  }
  func.func @transform_4(%arg0: i32) -> (i32, i32) {
    %c0_i32 = arith.constant 0 : i32
    %c0_i32_0 = arith.constant 0 : i32
    %c0_i32_1 = arith.constant 0 : i32
    return %c0_i32, %c0_i32_0 : i32, i32
  }
  func.func @transform_5(%arg0: i32) -> (i32, i32) {
    %c0_i32 = arith.constant 0 : i32
    %c0_i32_0 = arith.constant 0 : i32
    %c0_i32_1 = arith.constant 0 : i32
    return %c0_i32, %c0_i32_0 : i32, i32
  }
  func.func @transform_6(%arg0: i32) -> (i32, i32) {
    %c0_i32 = arith.constant 0 : i32
    %c0_i32_0 = arith.constant 0 : i32
    %c0_i32_1 = arith.constant 0 : i32
    return %c0_i32, %c0_i32_0 : i32, i32
  }
  func.func @transform_7(%arg0: i32) -> (i32, i32) {
    %c0_i32 = arith.constant 0 : i32
    %c0_i32_0 = arith.constant 0 : i32
    %c0_i32_1 = arith.constant 0 : i32
    return %c0_i32, %c0_i32_0 : i32, i32
  }
  func.func @transform_8(%arg0: i32) -> (i32, i32) {
    %c0_i32 = arith.constant 0 : i32
    %c0_i32_0 = arith.constant 0 : i32
    %c0_i32_1 = arith.constant 0 : i32
    return %c0_i32, %c0_i32_0 : i32, i32
  }
  func.func @transform_9(%arg0: i32) -> (i32, i32) {
    %c0_i32 = arith.constant 0 : i32
    %c0_i32_0 = arith.constant 0 : i32
    %c0_i32_1 = arith.constant 0 : i32
    return %c0_i32, %c0_i32_0 : i32, i32
  }
  func.func @transform_10(%arg0: i32) -> (i32, i32) {
    %c0_i32 = arith.constant 0 : i32
    %c0_i32_0 = arith.constant 0 : i32
    %c0_i32_1 = arith.constant 0 : i32
    return %c0_i32, %c0_i32_0 : i32, i32
  }
  func.func @transform_11(%arg0: i32) -> (i32, i32) {
    %c0_i32 = arith.constant 0 : i32
    %c0_i32_0 = arith.constant 0 : i32
    %c0_i32_1 = arith.constant 0 : i32
    return %c0_i32, %c0_i32_0 : i32, i32
  }
  func.func @transform_12(%arg0: i32) -> (i32, i32) {
    %c0_i32 = arith.constant 0 : i32
    %c0_i32_0 = arith.constant 0 : i32
    %c0_i32_1 = arith.constant 0 : i32
    return %c0_i32, %c0_i32_0 : i32, i32
  }
  func.func @transform_13(%arg0: i32) -> (i32, i32) {
    %c0_i32 = arith.constant 0 : i32
    %c0_i32_0 = arith.constant 0 : i32
    %c0_i32_1 = arith.constant 0 : i32
    return %c0_i32, %c0_i32_0 : i32, i32
  }
  func.func @transform_14(%arg0: i32) -> (i32, i32) {
    %c0_i32 = arith.constant 0 : i32
    %c0_i32_0 = arith.constant 0 : i32
    %c0_i32_1 = arith.constant 0 : i32
    return %c0_i32, %c0_i32_0 : i32, i32
  }
  func.func @transform_15(%arg0: i32) -> (i32, i32) {
    %c0_i32 = arith.constant 0 : i32
    %c0_i32_0 = arith.constant 0 : i32
    %c0_i32_1 = arith.constant 0 : i32
    return %c0_i32, %c0_i32_0 : i32, i32
  }
  func.func @transform_16(%arg0: i32) -> (i32, i32) {
    %c0_i32 = arith.constant 0 : i32
    %c0_i32_0 = arith.constant 0 : i32
    %c0_i32_1 = arith.constant 0 : i32
    return %c0_i32, %c0_i32_0 : i32, i32
  }
  func.func @transform_17(%arg0: i32) -> (i32, i32) {
    %c0_i32 = arith.constant 0 : i32
    %c0_i32_0 = arith.constant 0 : i32
    %c0_i32_1 = arith.constant 0 : i32
    return %c0_i32, %c0_i32_0 : i32, i32
  }
  func.func @transform_18(%arg0: i32) -> (i32, i32) {
    %c0_i32 = arith.constant 0 : i32
    %c0_i32_0 = arith.constant 0 : i32
    %c0_i32_1 = arith.constant 0 : i32
    return %c0_i32, %c0_i32_0 : i32, i32
  }
  func.func @transform_19(%arg0: i32) -> (i32, i32) {
    %c0_i32 = arith.constant 0 : i32
    %c0_i32_0 = arith.constant 0 : i32
    %c0_i32_1 = arith.constant 0 : i32
    return %c0_i32, %c0_i32_0 : i32, i32
  }
  func.func @transform_20(%arg0: i32) -> (i32, i32) {
    %c0_i32 = arith.constant 0 : i32
    %c0_i32_0 = arith.constant 0 : i32
    %c0_i32_1 = arith.constant 0 : i32
    return %c0_i32, %c0_i32_0 : i32, i32
  }
  func.func @transform_21(%arg0: i32) -> (i32, i32) {
    %c0_i32 = arith.constant 0 : i32
    %c0_i32_0 = arith.constant 0 : i32
    %c0_i32_1 = arith.constant 0 : i32
    return %c0_i32, %c0_i32_0 : i32, i32
  }
  func.func @transform_22(%arg0: i32) -> (i32, i32) {
    %c0_i32 = arith.constant 0 : i32
    %c0_i32_0 = arith.constant 0 : i32
    %c0_i32_1 = arith.constant 0 : i32
    return %c0_i32, %c0_i32_0 : i32, i32
  }
  func.func @transform_23(%arg0: i32) -> (i32, i32) {
    %c0_i32 = arith.constant 0 : i32
    %c0_i32_0 = arith.constant 0 : i32
    %c0_i32_1 = arith.constant 0 : i32
    return %c0_i32, %c0_i32_0 : i32, i32
  }
  func.func @transform_24(%arg0: i32) -> (i32, i32) {
    %c0_i32 = arith.constant 0 : i32
    %c0_i32_0 = arith.constant 0 : i32
    %c0_i32_1 = arith.constant 0 : i32
    return %c0_i32, %c0_i32_0 : i32, i32
  }
  func.func @transform_25(%arg0: i32) -> (i32, i32) {
    %c0_i32 = arith.constant 0 : i32
    %c0_i32_0 = arith.constant 0 : i32
    %c0_i32_1 = arith.constant 0 : i32
    return %c0_i32, %c0_i32_0 : i32, i32
  }
  func.func @transform_26(%arg0: i32) -> (i32, i32) {
    %c0_i32 = arith.constant 0 : i32
    %c0_i32_0 = arith.constant 0 : i32
    %c0_i32_1 = arith.constant 0 : i32
    return %c0_i32, %c0_i32_0 : i32, i32
  }
  func.func @transform_27(%arg0: i32) -> (i32, i32, i32) {
    %c0_i32 = arith.constant 0 : i32
    %c0_i32_0 = arith.constant 0 : i32
    %c0_i32_1 = arith.constant 0 : i32
    return %arg0, %c0_i32, %c0_i32_0 : i32, i32, i32
  }
  func.func @transform_28(%arg0: i32) -> (i32, i32, i32) {
    %c0_i32 = arith.constant 0 : i32
    %c0_i32_0 = arith.constant 0 : i32
    %c0_i32_1 = arith.constant 0 : i32
    return %arg0, %c0_i32, %c0_i32_0 : i32, i32, i32
  }
}

</mosaic_0001>

<bundles_post_ra>
// kernel: tpu_custom_call.1
= control target key start
LH: loop header
LB: loop body
LE: loop exit
PB: predicated region body
PF: predicated region fallthrough
CT: control target
= control target key end

     0   :  { %s6808_s0 = inlined_call_operand.hbm [shape: f32[2,4,16,128], index: 0, kind: input, shape index: {}]   ;;  %s6809_s1 = inlined_call_operand.hbm [shape: f32[384,128], index: 1, kind: input, shape index: {}]   ;;  %s6810_s2 = inlined_call_operand.vmem [shape: f32[1,128], index: 2, kind: input, shape index: {}]   ;;  %s6811_s3 = inlined_call_operand.hbm [shape: f32[384,128], index: 3, kind: input, shape index: {}]   ;;  %s6812_s4 = inlined_call_operand.vmem [shape: f32[1,128], index: 4, kind: input, shape index: {}]   ;;  %s6813_s5 = inlined_call_operand.hbm [shape: f32[128,128], index: 5, kind: input, shape index: {}]   ;;  %s6814_s6 = inlined_call_operand.vmem [shape: f32[1,128], index: 6, kind: input, shape index: {}]   ;;  %s6815_s7 = inlined_call_operand.hbm [shape: f32[384,128], index: 7, kind: input, shape index: {}]   ;;  %s6816_s8 = inlined_call_operand.vmem [shape: f32[1,128], index: 8, kind: input, shape index: {}]   ;;  %s6817_s9 = inlined_call_operand.hbm [shape: f32[384,128], index: 9, kind: input, shape index: {}]   ;;  %s6818_s10 = inlined_call_operand.vmem [shape: f32[1,128], index: 10, kind: input, shape index: {}]   ;;  %s6819_s11 = inlined_call_operand.hbm [shape: f32[384,128], index: 11, kind: input, shape index: {}]   ;;  %s6820_s12 = inlined_call_operand.vmem [shape: f32[1,128], index: 12, kind: input, shape index: {}]   ;;  %s6821_s13 = inlined_call_operand.hbm [shape: f32[384,128], index: 13, kind: input, shape index: {}]   ;;  %s6822_s14 = inlined_call_operand.vmem [shape: f32[1,128], index: 14, kind: input, shape index: {}]   ;;  %s6823_s15 = inlined_call_operand.hbm [shape: f32[128,128], index: 15, kind: input, shape index: {}]   ;;  %s6824_s16 = inlined_call_operand.vmem [shape: f32[1,128], index: 16, kind: input, shape index: {}]   ;;  %s6825_s17 = inlined_call_operand.hbm [shape: f32[128,128], index: 17, kind: input, shape index: {}]   ;;  %s6826_s18 = inlined_call_operand.vmem [shape: f32[1,128], index: 18, kind: input, shape index: {}]   ;;  %s6827_s19 = inlined_call_operand.hbm [shape: f32[128,128], index: 19, kind: input, shape index: {}]   ;;  %s6828_s20 = inlined_call_operand.vmem [shape: f32[1,128], index: 20, kind: input, shape index: {}]   ;;  %s6829_s21 = inlined_call_operand.hbm [shape: f32[128,128], index: 21, kind: input, shape index: {}]   ;;  %s6830_s22 = inlined_call_operand.vmem [shape: f32[1,128], index: 22, kind: input, shape index: {}]   ;;  %s6831_s23 = inlined_call_operand.hbm [shape: f32[128,128], index: 23, kind: input, shape index: {}]   ;;  %s6832_s24 = inlined_call_operand.vmem [shape: f32[1,128], index: 24, kind: input, shape index: {}]   ;;  %s6833_s25 = inlined_call_operand.hbm [shape: f32[128,128], index: 25, kind: input, shape index: {}]   ;;  %s6834_s26 = inlined_call_operand.vmem [shape: f32[1,128], index: 26, kind: input, shape index: {}]   ;;  %s6835_s27 = inlined_call_operand.hbm [shape: f32[2,4,128], index: 27, kind: output, shape index: {0}]   ;;  %s6836_s28 = inlined_call_operand.hbm [shape: f32[2,4,128], index: 28, kind: output, shape index: {1}]  }
   0x1   :  { %6848 = sst [smem:[#allocation39_spill]] %s6808_s0 }
   0x2   :  { %6849 = sst [smem:[#allocation40_spill]] %s6809_s1 }
   0x3   :  { %6850 = sst [smem:[#allocation41_spill]] %s6810_s2 }
   0x4   :  { %6851 = sst [smem:[#allocation42_spill]] %s6811_s3 }
   0x5   :  { %6852 = sst [smem:[#allocation43_spill]] %s6812_s4 }
   0x6   :  { %6853 = sst [smem:[#allocation44_spill]] %s6813_s5 }
   0x7   :  { %6854 = sst [smem:[#allocation45_spill]] %s6814_s6 }
   0x8   :  { %6855 = sst [smem:[#allocation46_spill]] %s6815_s7 }
   0x9   :  { %6856 = sst [smem:[#allocation47_spill]] %s6816_s8 }
   0xa   :  { %6857 = sst [smem:[#allocation48_spill]] %s6817_s9 }
   0xb   :  { %6858 = sst [smem:[#allocation49_spill]] %s6818_s10 }
   0xc   :  { %6859 = sst [smem:[#allocation50_spill]] %s6819_s11 }
   0xd   :  { %6860 = sst [smem:[#allocation51_spill]] %s6820_s12 }
   0xe   :  { %6861 = sst [smem:[#allocation52_spill]] %s6821_s13 }
   0xf   :  { %6862 = sst [smem:[#allocation53_spill]] %s6822_s14 }
  0x10   :  { %6863 = sst [smem:[#allocation54_spill]] %s6823_s15 }
  0x11   :  { %6864 = sst [smem:[#allocation55_spill]] %s6824_s16 }
  0x12   :  { %6865 = sst [smem:[#allocation56_spill]] %s6825_s17 }
  0x13   :  { %6866 = sst [smem:[#allocation57_spill]] %s6827_s19 }
  0x14   :  { %6867 = sst [smem:[#allocation58_spill]] %s6829_s21 }
  0x15   :  { %6868 = sst [smem:[#allocation59_spill]] %s6831_s23 }
  0x16   :  { %6869 = sst [smem:[#allocation60_spill]] %s6832_s24 }
  0x17   :  { %6870 = sst [smem:[#allocation61_spill]] %s6834_s26 }
  0x18   :  { %6871 = sst [smem:[#allocation62_spill]] %s6835_s27 }
  0x19   :  { %6872 = sst [smem:[#allocation63_spill]] %s6836_s28 }
  0x1a   :  { %34 = vsyncpa [#allocation4], 0 }
  0x1b   :  { %36 = vsyncpa [#allocation4 + $0x1], 0 }
  0x1c   :  { %37 = vsyncpa [#allocation7], 0 }
  0x1d   :  { %38 = vsyncpa [#allocation10], 0 }
  0x1e   :  { %39 = vsyncpa [#allocation13], 0 }
  0x1f   :  { %40 = vsyncpa [#allocation16], 0 }
  0x20   :  { %41 = vsyncpa [#allocation19], 0 }
  0x21   :  { %42 = vsyncpa [#allocation22], 0 }
  0x22   :  { %43 = vsyncpa [#allocation25], 0 }
  0x23   :  { %44 = vsyncpa [#allocation5], 0 }
  0x24   :  { %46 = vsyncpa [#allocation5 + $0x1], 0 }
  0x25   :  { %47 = vsyncpa [#allocation28], 0 }
  0x26   :  { %49 = vsyncpa [#allocation28 + $0x1], 0  ;;  %s6094_s8 = smov 0   ;;  %s6096_s5 = smov 0  }
  0x27   :  { %s6098_s9 = smov 0   ;;  %s6100_s30 = smov 0  }
  0x28 LB: > { %s5929_s3 = smov [#allocation6]   ;;  %s6115_s10 = sadd.s32 4294967295, %s5927_s30   ;;  %s5927_s30 = sphi %s6100_s30, %s6931_s30   ;;  %s5923_s9 = sphi %s6098_s9, %s6930_s9   ;;  %s5919_s5 = sphi %s6096_s5, %s6929_s5   ;;  %s5915_s8 = sphi %s6094_s8, %s6928_s8  }
  0x29   : > { %s696_s6 = sshll.u32 %s5929_s3, 4  ;;  %p4056_p0 = scmp.ge.s32.totalorder %s5927_s30, 1  ;;  %s697_s6 = int_to_ptr.vmem [resolvable:$true] %s696_s6 }
  0x2a   : > { %p6842_p1 = scmp.eq.s32.totalorder %s6115_s10, 0  ;;  %p684_p2 = scmp.lt.s32.totalorder %s5927_s30, 3 }
  0x2b   : > { %s5930_s11 = smov [#allocation9]   ;;  %s5931_s7 = smov [#allocation12]  }
  0x2c   : > { %p6120_p3 = pnand %p4056_p0, %p684_p2  ;;  %s728_s29 = sshll.u32 %s5930_s11, 4  ;;  %s6133_s29 = int_to_ptr.vmem [resolvable:$true] %s728_s29 }
  0x2d   : > { %s760_s12 = sshll.u32 %s5931_s7, 4  ;;  %s5450_s4 = scalar_lea.vmem %s697_s6, 6144  ;;  %s6135_s12 = int_to_ptr.vmem [resolvable:$true] %s760_s12 }
  0x2e   : > { %s6873_s0 = scalar_select %p6120_p3, 1, 0 }
  0x2f   : > { %p5309_p5 = pneg %p6120_p3  ;;  %p5451_p8 = scmp.ne.s32.totalorder %s697_s6, %s5450_s4 }
  0x30   : > { %p5458_p11 = scmp.lt.s32.totalorder %s697_s6, %s697_s6  ;;  %p5459_p12 = scmp.lt.s32.totalorder %s5450_s4, %s5450_s4 }
  0x31   : > { %p6129_p6 = pnand %p5309_p5, %p6842_p1 }
  0x32   : > { %p5460_p13 = por %p5459_p12, %p5458_p11 }
  0x33   : > { %p6139_p7 = pneg %p6129_p6 }
  0x35   : > { %p5453_p9 = pnand %p5451_p8, %p6139_p7 }
  0x37   : > { %p5454_p10 = pneg %p5453_p9 }
  0x39   : > { %p5461_p0 = pnand %p5460_p13, %p5454_p10 }
  0x3b   : > { %5464 = shalt.err (!%p5461_p0)
}
  0x3c   : > { %s6840_s3 = smov 128   ;;  %s6841_s11 = smov 8  }
  0x3d   : > { %s6876_s26 = sld [smem:[#allocation40_spill]]  ;;  %s5476_s27 = scalar_lea.vmem %s6133_s29, 2048 }
  0x3e   : > { %p5477_p2 = scmp.ne.s32.totalorder %s6133_s29, %s5476_s27  ;;  %p5484_p9 = scmp.lt.s32.totalorder %s6133_s29, %s6133_s29 }
  0x3f   : > { %p5485_p10 = scmp.lt.s32.totalorder %s5476_s27, %s5476_s27 }
  0x40   : > { %p5479_p5 = pnand %p5477_p2, %p6139_p7 }
  0x41   : > { %p5486_p11 = por %p5485_p10, %p5484_p9 }
  0x42   : > { %p5480_p8 = pneg %p5479_p5 }
  0x43   : > { %5312 = dma.hbm_to_vmem [thread:$0]  (!%p6129_p6), %s6876_s26, 6144, %s697_s6, [#allocation7], %s6840_s3, %s6840_s3, %s6841_s11  }
  0x44   : > { %p5487_p12 = pnand %p5486_p11, %p5480_p8 }
  0x46   : > { %5490 = shalt.err (!%p5487_p12)
}
  0x47   : > { %s6877_s26 = sld [smem:[#allocation44_spill]]  ;;  %s5502_s6 = scalar_lea.vmem %s6135_s12, 6144 }
  0x48   : > { %p5503_p13 = scmp.ne.s32.totalorder %s6135_s12, %s5502_s6  ;;  %p5510_p5 = scmp.lt.s32.totalorder %s6135_s12, %s6135_s12 }
  0x49   : > { %p5511_p8 = scmp.lt.s32.totalorder %s5502_s6, %s5502_s6 }
  0x4a   : > { %p5505_p0 = pnand %p5503_p13, %p6139_p7 }
  0x4b   : > { %p5512_p9 = por %p5511_p8, %p5510_p5 }
  0x4c   : > { %p5506_p2 = pneg %p5505_p0 }
  0x4d   : > { %5318 = dma.hbm_to_vmem [thread:$0]  (!%p6129_p6), %s6877_s26, 2048, %s6133_s29, [#allocation10], %s6840_s3, %s6840_s3, %s6841_s11  }
  0x4e   : > { %p5513_p10 = pnand %p5512_p9, %p5506_p2 }
  0x50   : > { %5516 = shalt.err (!%p5513_p10)
}
  0x51   : > { %s6878_s29 = sld [smem:[#allocation48_spill]]  ;;  %s5934_s4 = smov [#allocation15]  }
  0x52   : > { %s792_s28 = sshll.u32 %s5934_s4, 4  ;;  %s5935_s26 = smov [#allocation18]   ;;  %s793_s28 = int_to_ptr.vmem [resolvable:$true] %s792_s28 }
  0x53   : > { %s824_s24 = sshll.u32 %s5935_s26, 4  ;;  %s5528_s6 = scalar_lea.vmem %s793_s28, 6144  ;;  %s825_s24 = int_to_ptr.vmem [resolvable:$true] %s824_s24 }
  0x54   : > { %p5529_p11 = scmp.ne.s32.totalorder %s793_s28, %s5528_s6  ;;  %p5536_p0 = scmp.lt.s32.totalorder %s793_s28, %s793_s28 }
  0x55   : > { %p5537_p2 = scmp.lt.s32.totalorder %s5528_s6, %s5528_s6 }
  0x56   : > { %p5531_p12 = pnand %p5529_p11, %p6139_p7 }
  0x57   : > { %5324 = dma.hbm_to_vmem [thread:$0]  (!%p6129_p6), %s6878_s29, 6144, %s6135_s12, [#allocation13], %s6840_s3, %s6840_s3, %s6841_s11  }
  0x58   : > { %p5532_p13 = pneg %p5531_p12  ;;  %p5538_p5 = por %p5537_p2, %p5536_p0 }
  0x5a   : > { %p5539_p8 = pnand %p5538_p5, %p5532_p13 }
  0x5c   : > { %5542 = shalt.err (!%p5539_p8)
}
  0x5d   : > { %s6879_s13 = sld [smem:[#allocation52_spill]]  ;;  %s5554_s7 = scalar_lea.vmem %s825_s24, 2048 }
  0x5e   : > { %p5555_p9 = scmp.ne.s32.totalorder %s825_s24, %s5554_s7  ;;  %p5562_p12 = scmp.lt.s32.totalorder %s825_s24, %s825_s24 }
  0x5f   : > { %p5563_p0 = scmp.lt.s32.totalorder %s5554_s7, %s5554_s7 }
  0x60   : > { %p5557_p10 = pnand %p5555_p9, %p6139_p7 }
  0x61   : > { %p5564_p13 = por %p5563_p0, %p5562_p12 }
  0x62   : > { %p5558_p11 = pneg %p5557_p10 }
  0x63   : > { %5330 = dma.hbm_to_vmem [thread:$0]  (!%p6129_p6), %s6879_s13, 6144, %s793_s28, [#allocation16], %s6840_s3, %s6840_s3, %s6841_s11  }
  0x64   : > { %p5565_p2 = pnand %p5564_p13, %p5558_p11 }
  0x66   : > { %5568 = shalt.err (!%p5565_p2)
}
  0x67   : > { %s6880_s17 = sld [smem:[#allocation56_spill]]  ;;  %s5936_s28 = smov [#allocation21]  }
  0x68   : > { %s856_s26 = sshll.u32 %s5936_s28, 4  ;;  %s5937_s6 = smov [#allocation8]   ;;  %s857_s26 = int_to_ptr.vmem [resolvable:$true] %s856_s26 }
  0x69   : > { %s712_s12 = sshll.u32 %s5937_s6, 4  ;;  %s5580_s27 = scalar_lea.vmem %s857_s26, 2048  ;;  %s713_s12 = int_to_ptr.vmem [resolvable:$true] %s712_s12 }
  0x6a   : > { %p5581_p5 = scmp.ne.s32.totalorder %s857_s26, %s5580_s27  ;;  %p5588_p10 = scmp.lt.s32.totalorder %s857_s26, %s857_s26 }
  0x6b   : > { %p5589_p11 = scmp.lt.s32.totalorder %s5580_s27, %s5580_s27 }
  0x6c   : > { %p5583_p8 = pnand %p5581_p5, %p6139_p7 }
  0x6d   : > { %5336 = dma.hbm_to_vmem [thread:$0]  (!%p6129_p6), %s6880_s17, 2048, %s825_s24, [#allocation19], %s6840_s3, %s6840_s3, %s6841_s11  }
  0x6e   : > { %p5584_p9 = pneg %p5583_p8  ;;  %p5590_p12 = por %p5589_p11, %p5588_p10 }
  0x70   : > { %p5591_p0 = pnand %p5590_p12, %p5584_p9 }
  0x72   : > { %5594 = shalt.err (!%p5591_p0)
}
  0x73   : > { %s6881_s21 = sld [smem:[#allocation58_spill]]  ;;  %s5606_s29 = scalar_lea.vmem %s713_s12, 6144 }
  0x74   : > { %p5607_p13 = scmp.ne.s32.totalorder %s713_s12, %s5606_s29  ;;  %p5614_p8 = scmp.lt.s32.totalorder %s713_s12, %s713_s12 }
  0x75   : > { %p5615_p10 = scmp.lt.s32.totalorder %s5606_s29, %s5606_s29 }
  0x76   : > { %p5609_p2 = pnand %p5607_p13, %p6139_p7 }
  0x77   : > { %p5616_p9 = por %p5615_p10, %p5614_p8 }
  0x78   : > { %p5610_p5 = pneg %p5609_p2 }
  0x79   : > { %5342 = dma.hbm_to_vmem [thread:$0]  (!%p6129_p6), %s6881_s21, 2048, %s857_s26, [#allocation22], %s6840_s3, %s6840_s3, %s6841_s11  }
  0x7a   : > { %p5617_p11 = pnand %p5616_p9, %p5610_p5 }
  0x7c   : > { %5620 = shalt.err (!%p5617_p11)
}
  0x7d   : > { %s6882_s6 = sld [smem:[#allocation42_spill]]  ;;  %s5938_s26 = smov [#allocation11]  }
  0x7e   : > { %s744_s27 = sshll.u32 %s5938_s26, 4  ;;  %s5939_s24 = smov [#allocation14]   ;;  %s745_s27 = int_to_ptr.vmem [resolvable:$true] %s744_s27 }
  0x7f   : > { %s776_s7 = sshll.u32 %s5939_s24, 4  ;;  %s5632_s13 = scalar_lea.vmem %s745_s27, 6144  ;;  %s777_s7 = int_to_ptr.vmem [resolvable:$true] %s776_s7 }
  0x80   : > { %p5633_p12 = scmp.ne.s32.totalorder %s745_s27, %s5632_s13  ;;  %p5640_p2 = scmp.lt.s32.totalorder %s745_s27, %s745_s27 }
  0x81   : > { %p5641_p5 = scmp.lt.s32.totalorder %s5632_s13, %s5632_s13 }
  0x82   : > { %p5635_p0 = pnand %p5633_p12, %p6139_p7 }
  0x83   : > { %5315 = dma.hbm_to_vmem [thread:$0]  (!%p6129_p6), %s6882_s6, 6144, %s713_s12, [#allocation7], %s6840_s3, %s6840_s3, %s6841_s11  }
  0x84   : > { %p5636_p13 = pneg %p5635_p0  ;;  %p5642_p8 = por %p5641_p5, %p5640_p2 }
  0x86   : > { %p5643_p10 = pnand %p5642_p8, %p5636_p13 }
  0x88   : > { %5646 = shalt.err (!%p5643_p10)
}
  0x89   : > { %s6883_s4 = sld [smem:[#allocation46_spill]]  ;;  %s5658_s28 = scalar_lea.vmem %s777_s7, 6144 }
  0x8a   : > { %p5659_p9 = scmp.ne.s32.totalorder %s777_s7, %s5658_s28  ;;  %p5666_p0 = scmp.lt.s32.totalorder %s777_s7, %s777_s7 }
  0x8b   : > { %p5667_p2 = scmp.lt.s32.totalorder %s5658_s28, %s5658_s28 }
  0x8c   : > { %p5661_p11 = pnand %p5659_p9, %p6139_p7 }
  0x8d   : > { %p5668_p13 = por %p5667_p2, %p5666_p0 }
  0x8e   : > { %p5662_p12 = pneg %p5661_p11 }
  0x8f   : > { %5321 = dma.hbm_to_vmem [thread:$0]  (!%p6129_p6), %s6883_s4, 6144, %s745_s27, [#allocation10], %s6840_s3, %s6840_s3, %s6841_s11  }
  0x90   : > { %p5669_p5 = pnand %p5668_p13, %p5662_p12 }
  0x92   : > { %5672 = shalt.err (!%p5669_p5)
}
  0x93   : > { %s6884_s26 = sld [smem:[#allocation50_spill]]  ;;  %s5940_s27 = smov [#allocation17]  }
  0x94   : > { %s808_s24 = sshll.u32 %s5940_s27, 4  ;;  %s5941_s12 = smov [#allocation20]   ;;  %s809_s24 = int_to_ptr.vmem [resolvable:$true] %s808_s24 }
  0x95   : > { %s840_s29 = sshll.u32 %s5941_s12, 4  ;;  %s5684_s4 = scalar_lea.vmem %s809_s24, 2048  ;;  %s841_s29 = int_to_ptr.vmem [resolvable:$true] %s840_s29 }
  0x96   : > { %p5685_p8 = scmp.ne.s32.totalorder %s809_s24, %s5684_s4  ;;  %p5692_p11 = scmp.lt.s32.totalorder %s809_s24, %s809_s24 }
  0x97   : > { %p5693_p12 = scmp.lt.s32.totalorder %s5684_s4, %s5684_s4 }
  0x98   : > { %p5687_p10 = pnand %p5685_p8, %p6139_p7 }
  0x99   : > { %5327 = dma.hbm_to_vmem [thread:$0]  (!%p6129_p6), %s6884_s26, 6144, %s777_s7, [#allocation13], %s6840_s3, %s6840_s3, %s6841_s11  }
  0x9a   : > { %p5688_p9 = pneg %p5687_p10  ;;  %p5694_p0 = por %p5693_p12, %p5692_p11 }
  0x9c   : > { %p5695_p2 = pnand %p5694_p0, %p5688_p9 }
  0x9e   : > { %5698 = shalt.err (!%p5695_p2)
}
  0x9f   : > { %s6885_s15 = sld [smem:[#allocation54_spill]]  ;;  %s5710_s13 = scalar_lea.vmem %s841_s29, 2048 }
  0xa0   : > { %p5711_p13 = scmp.ne.s32.totalorder %s841_s29, %s5710_s13  ;;  %p5718_p10 = scmp.lt.s32.totalorder %s841_s29, %s841_s29 }
  0xa1   : > { %p5719_p11 = scmp.lt.s32.totalorder %s5710_s13, %s5710_s13 }
  0xa2   : > { %p5713_p5 = pnand %p5711_p13, %p6139_p7 }
  0xa3   : > { %p5720_p9 = por %p5719_p11, %p5718_p10 }
  0xa4   : > { %p5714_p8 = pneg %p5713_p5 }
  0xa5   : > { %5333 = dma.hbm_to_vmem [thread:$0]  (!%p6129_p6), %s6885_s15, 2048, %s809_s24, [#allocation16], %s6840_s3, %s6840_s3, %s6841_s11  }
  0xa6   : > { %p5721_p12 = pnand %p5720_p9, %p5714_p8 }
  0xa8   : > { %5724 = shalt.err (!%p5721_p12)
}
  0xa9   : > { %s6886_s19 = sld [smem:[#allocation57_spill]]  ;;  %s5942_s27 = smov [#allocation23]  }
  0xaa   : > { %s872_s24 = sshll.u32 %s5942_s27, 4  ;;  %s5943_s12 = smov [#allocation24]   ;;  %s873_s24 = int_to_ptr.vmem [resolvable:$true] %s872_s24 }
  0xab   : > { %s888_s4 = sshll.u32 %s5943_s12, 4  ;;  %s5736_s7 = scalar_lea.vmem %s873_s24, 2048  ;;  %s889_s4 = int_to_ptr.vmem [resolvable:$true] %s888_s4 }
  0xac   : > { %p5737_p0 = scmp.ne.s32.totalorder %s873_s24, %s5736_s7  ;;  %p5744_p5 = scmp.lt.s32.totalorder %s873_s24, %s873_s24 }
  0xad   : > { %p5745_p8 = scmp.lt.s32.totalorder %s5736_s7, %s5736_s7 }
  0xae   : > { %p5739_p2 = pnand %p5737_p0, %p6139_p7 }
  0xaf   : > { %5339 = dma.hbm_to_vmem [thread:$0]  (!%p6129_p6), %s6886_s19, 2048, %s841_s29, [#allocation19], %s6840_s3, %s6840_s3, %s6841_s11  }
  0xb0   : > { %p5740_p13 = pneg %p5739_p2  ;;  %p5746_p10 = por %p5745_p8, %p5744_p5 }
  0xb2   : > { %p5747_p11 = pnand %p5746_p10, %p5740_p13 }
  0xb4   : > { %5750 = shalt.err (!%p5747_p11)
}
  0xb5   : > { %s6887_s23 = sld [smem:[#allocation59_spill]]  ;;  %s5762_s13 = scalar_lea.vmem %s889_s4, 2048 }
  0xb6   : > { %p5763_p9 = scmp.ne.s32.totalorder %s889_s4, %s5762_s13  ;;  %p5770_p2 = scmp.lt.s32.totalorder %s889_s4, %s889_s4 }
  0xb7   : > { %p5771_p5 = scmp.lt.s32.totalorder %s5762_s13, %s5762_s13 }
  0xb8   : > { %p5765_p12 = pnand %p5763_p9, %p6139_p7 }
  0xb9   : > { %p5772_p13 = por %p5771_p5, %p5770_p2 }
  0xba   : > { %p5766_p0 = pneg %p5765_p12 }
  0xbb   : > { %5345 = dma.hbm_to_vmem [thread:$0]  (!%p6129_p6), %s6887_s23, 2048, %s873_s24, [#allocation22], %s6840_s3, %s6840_s3, %s6841_s11  }
  0xbc   : > { %p5773_p8 = pnand %p5772_p13, %p5766_p0 }
  0xbe   : > { %5776 = shalt.err (!%p5773_p8)
}
  0xbf   : > { %5348 = dma.hbm_to_vmem [thread:$0]  (!%p6129_p6), %s6833_s25, 2048, %s889_s4, [#allocation25], %s6840_s3, %s6840_s3, %s6841_s11  }
  0xc0   : > { %s4055_s2 = sadd.s32 4294967294, %s5927_s30   ;;  %s6285_s1 = sadd.s32 1, %s5927_s30  }
  0xc1   : > { %s62_s27 = sadd.s32 1, %s5923_s9  ;;  %s59_s24 = ssub.s32 %s5927_s30, %s6285_s1 }
  0xc2   : > { %p69_p7 = scmp.ne.s32.totalorder %s5923_s9, %s5919_s5  ;;  %p60_p10 = scmp.eq.s32.totalorder %s59_s24, 0 }
  0xc3   : > { %p70_p11 = scmp.eq.s32.totalorder %s5927_s30, 0  ;;  %p75_p9 = scmp.ne.s32.totalorder %s5919_s5, %s5915_s8 }
  0xc4   : > { %p645_p12 = scmp.eq.s32.totalorder %s6115_s10, 1  ;;  %p651_p5 = scmp.eq.s32.totalorder %s4055_s2, 1 }
  0xc5   : > { %s6297_s12 = scalar_select %p60_p10, %s5923_s9, %s62_s27  }
  0xc6   : > { %p71_p0 = por %p70_p11, %p69_p7  ;;  %p6301_p2 = por %p6842_p1, %p75_p9 }
  0xc7   : > { %p6305_p6 = por %p645_p12, %p69_p7  ;;  %p5373_p13 = scmp.lt.s32.totalorder %s5927_s30, 2 }
  0xc8   : > { %s6888_s7 = scalar_select %p6301_p2, 1, 0 }
  0xc9   : > { %s6889_s4 = scalar_select %p6305_p6, 1, 0 }
  0xca   : > { %s905_s29 = sand.u32 1, %s5923_s9   ;;  %p6311_p8 = por %p651_p5, %p75_p9 }
  0xcb   : > { %s4071_s13 = sshll.u32 %s905_s29, 6  ;;  %s4110_s6 = sshll.u32 %s5927_s30, 10 }
  0xcc   : > { %s6890_s28 = scalar_select %p6311_p8, 1, 0 }
  0xcd   : > { %s6891_s24 = sld [smem:[#allocation39_spill]]  ;;  %s909_s11 = scalar_lea.vmem [#allocation3], %s4071_s13 }
  0xce   : > { %s916_s15 = sshll.u32 %s909_s11, 4  ;;  %p6321_p7 = pnand %p5373_p13, %p71_p0  ;;  %s6325_s15 = int_to_ptr.vmem [resolvable:$true] %s916_s15 }
  0xcf   : > { %s6327_s17 = scalar_lea.sflag [#allocation4], %s905_s29 }
  0xd0   : > { %p5779_p11 = pneg %p6321_p7 }
  0xd3   : > { %s6319_s3 = scalar_lea.hbm %s6891_s24, %s4110_s6  ;;  %s5782_s13 = scalar_lea.hbm %s6891_s24, 2048 }
  0xd4   : > { %s5777_s19 = scalar_lea.hbm %s6319_s3, 1024  ;;  %p5783_p0 = scmp.lt.s32.totalorder %s6319_s3, %s6891_s24 }
  0xd5   : > { %p5778_p10 = scmp.ne.s32.totalorder %s6319_s3, %s5777_s19  ;;  %p5784_p5 = scmp.lt.s32.totalorder %s5782_s13, %s5777_s19 }
  0xd7   : > { %p5780_p9 = pnand %p5779_p11, %p5778_p10  ;;  %p5785_p13 = por %p5784_p5, %p5783_p0 }
  0xd9   : > { %p5781_p12 = pneg %p5780_p9 }
  0xdb   : > { %p5786_p4 = pnand %p5785_p13, %p5781_p12 }
  0xdd   : > { %5789 = shalt.err (!%p5786_p4)
}
  0xde   : > { %s5790_s29 = scalar_lea.vmem %s6325_s15, 1024  ;;  %s5944_s21 = smov [#allocation3]  }
  0xdf   : > { %p5791_p1 = scmp.ne.s32.totalorder %s6325_s15, %s5790_s29  ;;  %s5795_s23 = sshll.u32 %s5944_s21, 4  ;;  %s5796_s23 = int_to_ptr.vmem [resolvable:$false] %s5795_s23 }
  0xe0   : > { %s5797_s6 = scalar_lea.vmem %s5796_s23, 2048  ;;  %p5798_p9 = scmp.lt.s32.totalorder %s6325_s15, %s5796_s23 }
  0xe1   : > { %p5793_p8 = pnand %p5791_p1, %p5779_p11  ;;  %p5799_p6 = scmp.lt.s32.totalorder %s5797_s6, %s5790_s29 }
  0xe3   : > { %p5794_p10 = pneg %p5793_p8  ;;  %p5800_p2 = por %p5799_p6, %p5798_p9 }
  0xe5   : > { %p5801_p3 = pnand %p5800_p2, %p5794_p10 }
  0xe7   : > { %5804 = shalt.err (!%p5801_p3)
}
  0xe8   : > { %s6893_s19 = smov 8   ;;  %s6894_s26 = smov 128  }
  0xe9   : > { %5352 = dma.hbm_to_vmem [thread:$0]  (!%p6321_p7), %s6319_s3, 1024, %s6325_s15, %s6327_s17, %s6894_s26, %s6894_s26, %s6893_s19  }
  0xea   : > { %p6895_p1 = scmp.ne.s32.totalorder %s6873_s0, 0 }
  0xeb   : > { %s6354_s21 = sand.u32 (!%p6895_p1), 1, %s5919_s5   ;;  %p6896_p3 = scmp.ne.s32.totalorder (!%p6895_p1), %s6888_s7, 0 }
  0xec   : > { %928 = sbr.rel (%p6895_p1) target bundleno = 2647 (0xa57), region = 128  ;;  %s4075_s23 = sshll.u32 (!%p6895_p1), %s6354_s21, 6 }
  0xed   : > { %s931_s13 = scalar_lea.sflag (!%p6895_p1), [#allocation4], %s6354_s21  ;;  %s6358_s11 = scalar_lea.vmem (!%p6895_p1), [#allocation3], %s4075_s23 }
  0xf1   : > { %5874 = dma.done.wait (%p6896_p3), %s931_s13, 1024  }
  0xf2   : > { %5876 = vsyncadd (%p6896_p3), %s931_s13, 4294966272  ;;  %p6897_p4 = scmp.eq.s32.totalorder %s6115_s10, 0 }
  0xf4   : > { %5878 = dma.done.wait (%p6897_p4), [#allocation7], 12288   ;;  %p6898_p2 = pmov %p6897_p4 }
  0xf6   : > { %5880 = vsyncadd (%p6898_p2), [#allocation7], 4294955008  ;;  %p6899_p6 = pmov %p6898_p2 }
  0xf7   : > { %p6900_p8 = pmov %p6898_p2 }
  0xf8   : > { %5882 = dma.done.wait (%p6899_p6), [#allocation10], 8192  }
  0xf9   : > { %5884 = vsyncadd (%p6900_p8), [#allocation10], 4294959104  ;;  %p6901_p7 = pmov %p6898_p2 }
  0xfa   : > { %p6902_p11 = pmov %p6898_p2 }
  0xfb   : > { %5886 = dma.done.wait (%p6901_p7), [#allocation13], 12288  }
  0xfc   : > { %5888 = vsyncadd (%p6902_p11), [#allocation13], 4294955008  ;;  %p6903_p12 = pmov %p6898_p2 }
  0xfd   : > { %p6904_p0 = pmov %p6898_p2 }
  0xfe   : > { %5890 = dma.done.wait (%p6903_p12), [#allocation16], 8192  }
  0xff   : > { %5892 = vsyncadd (%p6904_p0), [#allocation16], 4294959104  ;;  %p6905_p5 = pmov %p6904_p0 }
 0x100   : > { %p6906_p13 = pmov %p6904_p0 }
 0x101   : > { %5894 = dma.done.wait (%p6905_p5), [#allocation19], 4096  }
 0x102   : > { %5896 = vsyncadd (%p6906_p13), [#allocation19], 4294963200  ;;  %p6907_p10 = pmov %p6904_p0 }
 0x103   : > { %p6908_p9 = pmov %p6904_p0 }
 0x104   : > { %5898 = dma.done.wait (%p6907_p10), [#allocation22], 4096  }
 0x105   : > { %5900 = vsyncadd (%p6908_p9), [#allocation22], 4294963200  ;;  %p6909_p1 = pmov %p6904_p0 }
 0x106   : > { %p6910_p3 = pmov %p6904_p0 }
 0x107   : > { %5902 = dma.done.wait (%p6909_p1), [#allocation25], 2048  }
 0x108   : > { %5904 = vsyncadd (%p6910_p3), [#allocation25], 4294965248  ;;  %v5945_v0 = vmov 0.0   ;;  %v1139_v1 = vld [vmem:[#allocation6 + $0xf8] sm:$0xff]  ;;  %v1138_v3 = vld [vmem:[#allocation6 + $0xf0] sm:$0xff]  ;;  %s6911_s0 = sld [smem:[#allocation41_spill]] }
 0x109   : > { %1064 = vst [vmem:[#allocation2] sm:$0xff] %v5945_v0  ;;  %1065 = vst [vmem:[#allocation2 + $0x18] sm:$0xff] %v5945_v0  ;;  %v1123_v2 = vld [vmem:[#allocation6 + $0x78] sm:$0xff]  ;;  %4111 = vmatprep.subr.mxu0 %v1139_v1  ;;  %v1122_v5 = vld [vmem:[#allocation6 + $0x70] sm:$0xff]  ;;  %s6912_s2 = sld [smem:[#allocation43_spill]]  ;;  %p6921_p2 = scmp.ne.s32.totalorder %s6889_s4, 0 }
 0x10a   : > { %1066 = vst [vmem:[#allocation2 + $0x30] sm:$0xff] %v5945_v0  ;;  %1067 = vst [vmem:[#allocation2 + $0x48] sm:$0xff] %v5945_v0  ;;  %v1155_v4 = vld [vmem:[#allocation6 + $0x178] sm:$0xff]  ;;  %4112 = vmatpush3.msra.mxu0 %v1123_v2  ;;  %v1137_v6 = vld [vmem:[#allocation6 + $0xe8] sm:$0xff]  ;;  %s6913_s6 = sld [smem:[#allocation45_spill]]  ;;  %s5947_s17 = smov [#allocation26]  }
 0x10b   : > { %4724 = vmatprep.subr.mxu1 %v1155_v4  ;;  %v1154_v7 = vld [vmem:[#allocation6 + $0x170] sm:$0xff]  ;;  %4113 = vmatprep.subr.mxu0 %v1138_v3  ;;  %v1121_v8 = vld [vmem:[#allocation6 + $0x68] sm:$0xff]  ;;  %v1136_v10 = vld [vmem:[#allocation6 + $0xe0] sm:$0xff]  ;;  %s6914_s23 = sld [smem:[#allocation47_spill]] }
 0x10c   : > { %4725 = vmatpush3.msra.mxu1 %v1155_v4  ;;  %v1153_v9 = vld [vmem:[#allocation6 + $0x168] sm:$0xff]  ;;  %4114 = vmatpush3.msra.mxu0 %v1122_v5  ;;  %v1120_v11 = vld [vmem:[#allocation6 + $0x60] sm:$0xff]  ;;  %v1135_v13 = vld [vmem:[#allocation6 + $0xd8] sm:$0xff]  ;;  %s6915_s15 = sld [smem:[#allocation49_spill]] }
 0x10d   : > { %4726 = vmatprep.subr.mxu1 %v1154_v7  ;;  %4115 = vmatprep.subr.mxu0 %v1137_v6  ;;  %v1152_v12 = vld [vmem:[#allocation6 + $0x160] sm:$0xff]  ;;  %v1119_v14 = vld [vmem:[#allocation6 + $0x58] sm:$0xff]  ;;  %v1134_v16 = vld [vmem:[#allocation6 + $0xd0] sm:$0xff]  ;;  %s6916_s3 = sld [smem:[#allocation51_spill]] }
 0x10e   : > { %4727 = vmatpush3.msra.mxu1 %v1154_v7  ;;  %4116 = vmatpush3.msra.mxu0 %v1121_v8  ;;  %v1151_v15 = vld [vmem:[#allocation6 + $0x158] sm:$0xff]  ;;  %v1118_v17 = vld [vmem:[#allocation6 + $0x50] sm:$0xff]  ;;  %v1133_v19 = vld [vmem:[#allocation6 + $0xc8] sm:$0xff]  ;;  %s6917_s14 = sld [smem:[#allocation53_spill]] }
 0x10f   : > { %4728 = vmatprep.subr.mxu1 %v1153_v9  ;;  %4117 = vmatprep.subr.mxu0 %v1136_v10  ;;  %v1150_v18 = vld [vmem:[#allocation6 + $0x150] sm:$0xff]  ;;  %v1117_v20 = vld [vmem:[#allocation6 + $0x48] sm:$0xff]  ;;  %v1132_v22 = vld [vmem:[#allocation6 + $0xc0] sm:$0xff]  ;;  %s6918_s16 = sld [smem:[#allocation55_spill]] }
 0x110   : > { %4729 = vmatpush3.msra.mxu1 %v1153_v9  ;;  %4118 = vmatpush3.msra.mxu0 %v1120_v11  ;;  %v1149_v21 = vld [vmem:[#allocation6 + $0x148] sm:$0xff]  ;;  %v1116_v23 = vld [vmem:[#allocation6 + $0x40] sm:$0xff]  ;;  %v1131_v25 = vld [vmem:[#allocation6 + $0xb8] sm:$0xff]  ;;  %s6919_s7 = sld [smem:[#allocation60_spill]] }
 0x111   : > { %4730 = vmatprep.subr.mxu1 %v1152_v12  ;;  %4119 = vmatprep.subr.mxu0 %v1135_v13  ;;  %v1148_v24 = vld [vmem:[#allocation6 + $0x140] sm:$0xff]  ;;  %v1115_v26 = vld [vmem:[#allocation6 + $0x38] sm:$0xff]  ;;  %v1130_v27 = vld [vmem:[#allocation6 + $0xb0] sm:$0xff]  ;;  %s6920_s19 = sld [smem:[#allocation62_spill]] }
 0x112   : > { %4731 = vmatpush3.msra.mxu1 %v1152_v12  ;;  %4120 = vmatpush3.msra.mxu0 %v1119_v14  ;;  %v1147_v28 = vld [vmem:[#allocation6 + $0x138] sm:$0xff]  ;;  %v1114_v29 = vld [vmem:[#allocation6 + $0x30] sm:$0xff]  ;;  %v6393_v30 = vld [vmem:[%s6358_s11] sm:$0xff] }
 0x113   : > { %4732 = vmatprep.subr.mxu1 %v1151_v15  ;;  %4121 = vmatprep.subr.mxu0 %v1134_v16  ;;  %v1146_v31 = vld [vmem:[#allocation6 + $0x130] sm:$0xff]  ;;  %1076 = vst [vmem:[#allocation2 + $0x8] sm:$0xff] %v6393_v30  ;;  %v6397_v32 = vld [vmem:[%s6358_s11 + $0x8] sm:$0xff]  ;;  %v6405_v34 = vld [vmem:[%s6358_s11 + $0x18] sm:$0xff] }
 0x114   : > { %4733 = vmatpush3.msra.mxu1 %v1151_v15  ;;  %4122 = vmatpush3.msra.mxu0 %v1118_v17  ;;  %v6400_v33 = vld [vmem:[%s6358_s11 + $0x10] sm:$0xff]  ;;  %1077 = vst [vmem:[#allocation2 + $0x10] sm:$0xff] %v6397_v32  ;;  %v6408_v35 = vld [vmem:[%s6358_s11 + $0x20] sm:$0xff]  ;;  %v6411_v36 = vld [vmem:[%s6358_s11 + $0x28] sm:$0xff] }
 0x115   : > { %4734 = vmatprep.subr.mxu1 %v1150_v18  ;;  %4123 = vmatprep.subr.mxu0 %v1133_v19  ;;  %1078 = vst [vmem:[#allocation2 + $0x20] sm:$0xff] %v6400_v33  ;;  %v1129_v37 = vld [vmem:[#allocation6 + $0xa8] sm:$0xff]  ;;  %1079 = vst [vmem:[#allocation2 + $0x28] sm:$0xff] %v6405_v34  ;;  %v6417_v38 = vld [vmem:[%s6358_s11 + $0x30] sm:$0xff] }
 0x116   : > { %4735 = vmatpush3.msra.mxu1 %v1150_v18  ;;  %4124 = vmatpush3.msra.mxu0 %v1117_v20  ;;  %1080 = vst [vmem:[#allocation2 + $0x38] sm:$0xff] %v6408_v35  ;;  %1081 = vst [vmem:[#allocation2 + $0x40] sm:$0xff] %v6411_v36  ;;  %v6420_v39 = vld [vmem:[%s6358_s11 + $0x38] sm:$0xff]  ;;  %v1113_v40 = vld [vmem:[#allocation6 + $0x28] sm:$0xff]  ;;  %s3798_s11 = scalar_lea.sflag [#allocation5], %s6354_s21 }
 0x117   : > { %4736 = vmatprep.subr.mxu1 %v1149_v21  ;;  %4125 = vmatprep.subr.mxu0 %v1132_v22  ;;  %v1145_v41 = vld [vmem:[#allocation6 + $0x128] sm:$0xff]  ;;  %1082 = vst [vmem:[#allocation2 + $0x50] sm:$0xff] %v6417_v38  ;;  %1083 = vst [vmem:[#allocation2 + $0x58] sm:$0xff] %v6420_v39  ;;  %v1128_v42 = vld [vmem:[#allocation6 + $0xa0] sm:$0xff] }
 0x118   : > { %4737 = vmatpush3.msra.mxu1 %v1149_v21  ;;  %4126 = vmatpush3.msra.mxu0 %v1116_v23  ;;  %v1112_v43 = vld [vmem:[#allocation6 + $0x20] sm:$0xff]  ;;  %v1127_v45 = vld [vmem:[#allocation6 + $0x98] sm:$0xff]  ;;  %v1126_v48 = vld [vmem:[#allocation6 + $0x90] sm:$0xff] }
 0x119   : > { %4738 = vmatprep.subr.mxu1 %v1148_v24  ;;  %4127 = vmatprep.subr.mxu0 %v1131_v25  ;;  %v1144_v44 = vld [vmem:[#allocation6 + $0x120] sm:$0xff]  ;;  %v1111_v46 = vld [vmem:[#allocation6 + $0x18] sm:$0xff]  ;;  %v1110_v49 = vld [vmem:[#allocation6 + $0x10] sm:$0xff] }
 0x11a   : > { %4739 = vmatpush3.msra.mxu1 %v1148_v24  ;;  %4128 = vmatpush3.msra.mxu0 %v1115_v26  ;;  %v1143_v47 = vld [vmem:[#allocation6 + $0x118] sm:$0xff]  ;;  %v1142_v50 = vld [vmem:[#allocation6 + $0x110] sm:$0xff]  ;;  %v1125_v51 = vld [vmem:[#allocation6 + $0x88] sm:$0xff] }
 0x11b   : > { %4740 = vmatprep.subr.mxu1 %v1147_v28  ;;  %4129 = vmatprep.subr.mxu0 %v1130_v27  ;;  %v1109_v52 = vld [vmem:[#allocation6 + $0x8] sm:$0xff]  ;;  %v1124_v54 = vld [vmem:[#allocation6 + $0x80] sm:$0xff]  ;;  %v1460_v60 = vld [vmem:[#allocation8 + $0xf8] sm:$0xff] }
 0x11c   : > { %4741 = vmatpush3.msra.mxu1 %v1147_v28  ;;  %4130 = vmatpush3.msra.mxu0 %v1114_v29  ;;  %v1141_v53 = vld [vmem:[#allocation6 + $0x108] sm:$0xff]  ;;  %v1108_v56 = vld [vmem:[#allocation6] sm:$0xff]  ;;  %v1476_v62 = vld [vmem:[#allocation8 + $0x178] sm:$0xff] }
 0x11d   : > { %4742 = vmatprep.subr.mxu1 %v1146_v31  ;;  %4131 = vmatprep.subr.mxu0 %v1129_v37  ;;  %v1092_v55 = vld [vmem:[#allocation2 + $0x7] sm:$0xff]  ;;  %v1093_v59 = vld [vmem:[#allocation2 + $0xf] sm:$0xff]  ;;  %v1094_v63 = vld [vmem:[#allocation2 + $0x1f] sm:$0xff] }
 0x11e   : > { %4743 = vmatpush3.msra.mxu1 %v1146_v31  ;;  %4132 = vmatpush3.msra.mxu0 %v1113_v40  ;;  %v1084_v57 = vld [vmem:[#allocation2 + $0x6] sm:$0xff]  ;;  %v1085_v61 = vld [vmem:[#allocation2 + $0xe] sm:$0xff]  ;;  %v1444_v0 = vld [vmem:[#allocation8 + $0x78] sm:$0xff] }
 0x11f   : > { %4744 = vmatprep.subr.mxu1 %v1145_v41  ;;  %4133 = vmatprep.subr.mxu0 %v1128_v42  ;;  %v1140_v58 = vld [vmem:[#allocation6 + $0x100] sm:$0xff]  ;;  %v1459_v1 = vld [vmem:[#allocation8 + $0xf0] sm:$0xff]  ;;  %v1458_v4 = vld [vmem:[#allocation8 + $0xe8] sm:$0xff] }
 0x120   : > { %4745 = vmatpush3.msra.mxu1 %v1145_v41  ;;  %4134 = vmatpush3.msra.mxu0 %v1112_v43  ;;  %v1443_v2 = vld [vmem:[#allocation8 + $0x70] sm:$0xff]  ;;  %v1086_v3 = vld [vmem:[#allocation2 + $0x1e] sm:$0xff]  ;;  %v1095_v5 = vld [vmem:[#allocation2 + $0x27] sm:$0xff] }
 0x121   : > { %4746 = vmatprep.subr.mxu1 %v1144_v44  ;;  %4135 = vmatprep.subr.mxu0 %v1127_v45  ;;  %v1442_v6 = vld [vmem:[#allocation8 + $0x68] sm:$0xff]  ;;  %v1457_v7 = vld [vmem:[#allocation8 + $0xe0] sm:$0xff]  ;;  %v1475_v9 = vld [vmem:[#allocation8 + $0x170] sm:$0xff] }
 0x122   : > { %4747 = vmatpush3.msra.mxu1 %v1144_v44  ;;  %4136 = vmatpush3.msra.mxu0 %v1111_v46  ;;  %v1087_v8 = vld [vmem:[#allocation2 + $0x26] sm:$0xff]  ;;  %v1096_v10 = vld [vmem:[#allocation2 + $0x37] sm:$0xff]  ;;  %v1098_v21 = vld [vmem:[#allocation2 + $0x4f] sm:$0xff] }
 0x123   : > { %4748 = vmatprep.subr.mxu1 %v1143_v47  ;;  %4137 = vmatprep.subr.mxu0 %v1126_v48  ;;  %v1441_v11 = vld [vmem:[#allocation8 + $0x60] sm:$0xff]  ;;  %v1456_v12 = vld [vmem:[#allocation8 + $0xd8] sm:$0xff]  ;;  %v1474_v15 = vld [vmem:[#allocation8 + $0x168] sm:$0xff] }
 0x124   : > { %4749 = vmatpush3.msra.mxu1 %v1143_v47  ;;  %4138 = vmatpush3.msra.mxu0 %v1110_v49  ;;  %v1440_v13 = vld [vmem:[#allocation8 + $0x58] sm:$0xff]  ;;  %v1455_v17 = vld [vmem:[#allocation8 + $0xd0] sm:$0xff]  ;;  %v1473_v18 = vld [vmem:[#allocation8 + $0x160] sm:$0xff] }
 0x125   : > { %4750 = vmatprep.subr.mxu1 %v1142_v50  ;;  %4139 = vmatprep.subr.mxu0 %v1125_v51  ;;  %v1088_v14 = vld [vmem:[#allocation2 + $0x36] sm:$0xff]  ;;  %v1097_v16 = vld [vmem:[#allocation2 + $0x3f] sm:$0xff]  ;;  %v1090_v22 = vld [vmem:[#allocation2 + $0x4e] sm:$0xff] }
 0x126   : > { %4751 = vmatpush3.msra.mxu1 %v1142_v50  ;;  %4140 = vmatpush3.msra.mxu0 %v1109_v52  ;;  %v1439_v19 = vld [vmem:[#allocation8 + $0x50] sm:$0xff]  ;;  %v1089_v20 = vld [vmem:[#allocation2 + $0x3e] sm:$0xff]  ;;  %v1470_v27 = vld [vmem:[#allocation8 + $0x148] sm:$0xff] }
 0x127   : > { %4752 = vmatprep.subr.mxu1 %v1141_v53  ;;  %4141 = vmatprep.subr.mxu0 %v1124_v54  ;;  %v1099_v23 = vld [vmem:[#allocation2 + $0x57] sm:$0xff]  ;;  %v1469_v28 = vld [vmem:[#allocation8 + $0x140] sm:$0xff]  ;;  %v1454_v31 = vld [vmem:[#allocation8 + $0xc8] sm:$0xff] }
 0x128   : > { %1227 = vmatprep.mubr.f32.mxu0 %v1092_v55  ;;  %4142 = vmatpush3.msra.mxu0 %v1108_v56  ;;  %v1091_v24 = vld [vmem:[#allocation2 + $0x56] sm:$0xff]  ;;  %v1438_v37 = vld [vmem:[#allocation8 + $0x48] sm:$0xff]  ;;  %v1453_v41 = vld [vmem:[#allocation8 + $0xc0] sm:$0xff] }
 0x129   : > { %4753 = vmatpush3.msra.mxu1 %v1141_v53  ;;  %1228 = vmatmul.mubr.f32.vlgmr.msra.gmra.mxu0 %v1084_v57  ;;  %v1472_v25 = vld [vmem:[#allocation8 + $0x158] sm:$0xff]  ;;  %v1471_v26 = vld [vmem:[#allocation8 + $0x150] sm:$0xff]  ;;  %v1437_v42 = vld [vmem:[#allocation8 + $0x40] sm:$0xff] }
 0x12a   : > { %4754 = vmatprep.subr.mxu1 %v1140_v58  ;;  %4756 = vmatprep.mubr.f32.mxu1 %v6393_v30  ;;  %v1468_v29 = vld [vmem:[#allocation8 + $0x138] sm:$0xff]  ;;  %v1467_v40 = vld [vmem:[#allocation8 + $0x130] sm:$0xff]  ;;  %v1466_v43 = vld [vmem:[#allocation8 + $0x128] sm:$0xff] }
 0x12b   : > { %4755 = vmatpush3.msra.mxu1 %v1140_v58  ;;  %1232 = vmatprep.mubr.f32.mxu0 %v1093_v59  ;;  %v1452_v44 = vld [vmem:[#allocation8 + $0xb8] sm:$0xff]  ;;  %v1465_v46 = vld [vmem:[#allocation8 + $0x120] sm:$0xff]  ;;  %v1451_v47 = vld [vmem:[#allocation8 + $0xb0] sm:$0xff] }
 0x12c   : > { %4757 = vmatmul.mubr.f32.vlgmr.msra.gmra.mxu1 %v6397_v32  ;;  %4191 = vmatprep.subr.mxu0 %v1460_v60  ;;  %v1436_v45 = vld [vmem:[#allocation8 + $0x38] sm:$0xff]  ;;  %v1435_v48 = vld [vmem:[#allocation8 + $0x30] sm:$0xff]  ;;  %v1450_v50 = vld [vmem:[#allocation8 + $0xa8] sm:$0xff] }
 0x12d   : > { %4759 = vmatprep.mubr.f32.mxu1 %v6400_v33  ;;  %1233 = vmatmul.mubr.f32.gmra.mxu0 %v1085_v61  ;;  %v1464_v49 = vld [vmem:[#allocation8 + $0x118] sm:$0xff]  ;;  %v1434_v51 = vld [vmem:[#allocation8 + $0x28] sm:$0xff]  ;;  %v1463_v52 = vld [vmem:[#allocation8 + $0x110] sm:$0xff] }
 0x12e   : > { %4768 = vmatprep.subr.mxu1 %v1476_v62  ;;  %1237 = vmatprep.mubr.f32.mxu0 %v1094_v63  ;;  %v1449_v53 = vld [vmem:[#allocation8 + $0xa0] sm:$0xff]  ;;  %v1462_v55 = vld [vmem:[#allocation8 + $0x108] sm:$0xff]  ;;  %v1448_v56 = vld [vmem:[#allocation8 + $0x98] sm:$0xff] }
 0x12f   : > { %4192 = vmatpush3.msra.mxu0 %v1444_v0  ;;  %4769 = vmatpush3.msra.mxu1 %v1476_v62  ;;  %v1433_v54 = vld [vmem:[#allocation8 + $0x20] sm:$0xff]  ;;  %v1432_v57 = vld [vmem:[#allocation8 + $0x18] sm:$0xff]  ;;  %v1447_v59 = vld [vmem:[#allocation8 + $0x90] sm:$0xff] }
 0x130   : > { %4760 = vmatmul.mubr.f32.gmra.mxu1 %v6405_v34  ;;  %4193 = vmatprep.subr.mxu0 %v1459_v1  ;;  %v1461_v58 = vld [vmem:[#allocation8 + $0x100] sm:$0xff]  ;;  %v1431_v60 = vld [vmem:[#allocation8 + $0x10] sm:$0xff]  ;;  %v1446_v61 = vld [vmem:[#allocation8 + $0x88] sm:$0xff] }
 0x131   : > { %4762 = vmatprep.mubr.f32.mxu1 %v6408_v35  ;;  %4194 = vmatpush3.msra.mxu0 %v1443_v2  ;;  %v1430_v62 = vld [vmem:[#allocation8 + $0x8] sm:$0xff]  ;;  %v1445_v63 = vld [vmem:[#allocation8 + $0x80] sm:$0xff]  ;;  %v1733_v1 = vld [vmem:[#allocation9 + $0x78] sm:$0xff] }
 0x132   : > { %1238 = vmatmul.mubr.f32.gmra.mxu0 %v1086_v3  ;;  %4195 = vmatprep.subr.mxu0 %v1458_v4  ;;  %v1429_v0 = vld [vmem:[#allocation8] sm:$0xff] }
 0x133   : > { %1242 = vmatprep.mubr.f32.mxu0 %v1095_v5  ;;  %4196 = vmatpush3.msra.mxu0 %v1442_v6  ;;  %v6435_v5 = vld [vmem:[%s6911_s0] ss:$0 sm:$0xff]  ;;  %s5809_s0 = sshll.u32 %s5947_s17, 4  ;;  %s5810_s0 = int_to_ptr.vmem [resolvable:$false] %s5809_s0 }
 0x134   : > { %4763 = vmatmul.mubr.f32.gmra.mxu1 %v6411_v36  ;;  %4197 = vmatprep.subr.mxu0 %v1457_v7 }
 0x135   : > { %4765 = vmatprep.mubr.f32.mxu1 %v6417_v38  ;;  %4770 = vmatprep.subr.mxu1 %v1475_v9 }
 0x136   : > { %1243 = vmatmul.mubr.f32.gmra.mxu0 %v1087_v8  ;;  %4771 = vmatpush3.msra.mxu1 %v1475_v9 }
 0x137   : > { %1247 = vmatprep.mubr.f32.mxu0 %v1096_v10  ;;  %4198 = vmatpush3.msra.mxu0 %v1441_v11 }
 0x138   : > { %4766 = vmatmul.mubr.f32.gmra.mxu1 %v6420_v39  ;;  %4199 = vmatprep.subr.mxu0 %v1456_v12 }
 0x139   : > { %4200 = vmatpush3.msra.mxu0 %v1440_v13  ;;  %4772 = vmatprep.subr.mxu1 %v1474_v15 }
 0x13a   : > { %1248 = vmatmul.mubr.f32.gmra.mxu0 %v1088_v14  ;;  %4773 = vmatpush3.msra.mxu1 %v1474_v15 }
 0x13b   : > { %1252 = vmatprep.mubr.f32.mxu0 %v1097_v16  ;;  %4201 = vmatprep.subr.mxu0 %v1455_v17 }
 0x13c   : > { %4774 = vmatprep.subr.mxu1 %v1473_v18  ;;  %4202 = vmatpush3.msra.mxu0 %v1439_v19 }
 0x13d   : > { %4775 = vmatpush3.msra.mxu1 %v1473_v18  ;;  %4203 = vmatprep.subr.mxu0 %v1454_v31 }
 0x13e   : > { %1253 = vmatmul.mubr.f32.gmra.mxu0 %v1089_v20  ;;  %4776 = vmatprep.subr.mxu1 %v1472_v25 }
 0x13f   : > { %1257 = vmatprep.mubr.f32.mxu0 %v1098_v21  ;;  %4777 = vmatpush3.msra.mxu1 %v1472_v25 }
 0x140   : > { %4778 = vmatprep.subr.mxu1 %v1471_v26  ;;  %4204 = vmatpush3.msra.mxu0 %v1438_v37 }
 0x141   : > { %4779 = vmatpush3.msra.mxu1 %v1471_v26  ;;  %4205 = vmatprep.subr.mxu0 %v1453_v41 }
 0x142   : > { %1258 = vmatmul.mubr.f32.gmra.mxu0 %v1090_v22  ;;  %4780 = vmatprep.subr.mxu1 %v1470_v27 }
 0x143   : > { %1262 = vmatprep.mubr.f32.mxu0 %v1099_v23  ;;  %4781 = vmatpush3.msra.mxu1 %v1470_v27 }
 0x144   : > { %4782 = vmatprep.subr.mxu1 %v1469_v28  ;;  %4206 = vmatpush3.msra.mxu0 %v1437_v42 }
 0x145   : > { %4783 = vmatpush3.msra.mxu1 %v1469_v28  ;;  %4207 = vmatprep.subr.mxu0 %v1452_v44 }
 0x146   : > { %1263 = vmatmul.mubr.f32.gmra.mxu0 %v1091_v24  ;;  %4784 = vmatprep.subr.mxu1 %v1468_v29 }
 0x147   : > { %4785 = vmatpush3.msra.mxu1 %v1468_v29  ;;  %4208 = vmatpush3.msra.mxu0 %v1436_v45 }
 0x148   : > { %4786 = vmatprep.subr.mxu1 %v1467_v40  ;;  %4209 = vmatprep.subr.mxu0 %v1451_v47 }
 0x149   : > { %4787 = vmatpush3.msra.mxu1 %v1467_v40  ;;  %4210 = vmatpush3.msra.mxu0 %v1435_v48  ;;  %v1732_v48 = vld [vmem:[#allocation9 + $0x70] sm:$0xff] }
 0x14a   : > { %4788 = vmatprep.subr.mxu1 %v1466_v43  ;;  %4211 = vmatprep.subr.mxu0 %v1450_v50 }
 0x14b   : > { %4789 = vmatpush3.msra.mxu1 %v1466_v43  ;;  %4212 = vmatpush3.msra.mxu0 %v1434_v51 }
 0x14c   : > { %4790 = vmatprep.subr.mxu1 %v1465_v46  ;;  %4213 = vmatprep.subr.mxu0 %v1449_v53  ;;  %v1731_v53 = vld [vmem:[#allocation9 + $0x68] sm:$0xff] }
 0x14d   : > { %4791 = vmatpush3.msra.mxu1 %v1465_v46  ;;  %4214 = vmatpush3.msra.mxu0 %v1433_v54 }
 0x14e   : > { %4792 = vmatprep.subr.mxu1 %v1464_v49  ;;  %4215 = vmatprep.subr.mxu0 %v1448_v56 }
 0x14f   : > { %4793 = vmatpush3.msra.mxu1 %v1464_v49  ;;  %4216 = vmatpush3.msra.mxu0 %v1432_v57 }
 0x150   : > { %4794 = vmatprep.subr.mxu1 %v1463_v52  ;;  %4217 = vmatprep.subr.mxu0 %v1447_v59 }
 0x151   : > { %4795 = vmatpush3.msra.mxu1 %v1463_v52  ;;  %4218 = vmatpush3.msra.mxu0 %v1431_v60  ;;  %v1730_v60 = vld [vmem:[#allocation9 + $0x60] sm:$0xff] }
 0x152   : > { %4796 = vmatprep.subr.mxu1 %v1462_v55  ;;  %4219 = vmatprep.subr.mxu0 %v1446_v61 }
 0x153   : > { %4797 = vmatpush3.msra.mxu1 %v1462_v55  ;;  %4220 = vmatpush3.msra.mxu0 %v1430_v62 }
 0x154   : > { %4798 = vmatprep.subr.mxu1 %v1461_v58  ;;  %4221 = vmatprep.subr.mxu0 %v1445_v63 }
 0x155   : > { %4799 = vmatpush3.msra.mxu1 %v1461_v58  ;;  %4222 = vmatpush3.msra.mxu0 %v1429_v0 }
 0x156   : > { %4812 = vmatprep.subr.mxu0 %v1733_v1 }
 0x1e9   : > { %v4143_v2 = vpop.f32.mrf.mxu0 }
 0x1eb   : > { %v4144_v3 = vpop.f32.mrf.mxu0 }
 0x1ec   : > { %v4758_v4 = vpop.f32.mrf.mxu1  ;;  %v4145_v6 = vadd.f32 %v4144_v3, %v4143_v2 }
 0x1ed   : > { %v4146_v7 = vpop.f32.mrf.mxu0 }
 0x1ee   : > { %v1230_v8 = vadd.f32 %v4145_v6, %v6435_v5  ;;  %v1334_v9 = vpop.f32.mrf.mxu1 }
 0x1ef   : > { %v4147_v10 = vpop.f32.mrf.mxu0 }
 0x1f0   : > { %v1335_v11 = vadd.f32 %v1334_v9, %v1230_v8  ;;  %v4148_v12 = vadd.f32 %v4147_v10, %v4146_v7  ;;  %v4761_v17 = vpop.f32.mrf.mxu1  ;;  %v1728_v9 = vld [vmem:[#allocation9 + $0x50] sm:$0xff] }
 0x1f2   : > { %v4149_v13 = vpop.f32.mrf.mxu0  ;;  %vm1373_vm0 = vcmp.gt.f32.partialorder %v1335_v11, 0.0  ;;  %v1381_v14 = vmul.f32 0.01, %v1335_v11  ;;  %v1235_v15 = vadd.f32 %v4148_v12, %v6435_v5  ;;  %v1344_v24 = vpop.f32.mrf.mxu1 }
 0x1f4   : > { %v4150_v16 = vpop.f32.mrf.mxu0  ;;  %v1389_v18 = vsel %vm1373_vm0, %v1335_v11, %v1381_v14  ;;  %v1340_v19 = vadd.f32 %v4758_v4, %v1235_v15  ;;  %v4764_v41 = vpop.f32.mrf.mxu1  ;;  %v1727_v14 = vld [vmem:[#allocation9 + $0x48] sm:$0xff] }
 0x1f5   : > { %v4151_v20 = vadd.f32 %v4150_v16, %v4149_v13  ;;  %1397 = vst [vmem:[#allocation2 + $0x8] sm:$0xff] %v1389_v18  ;;  %4800 = vmatprep.mubr.f32.mxu1 %v1389_v18 }
 0x1f6   : > { %v4152_v21 = vpop.f32.mrf.mxu0  ;;  %vm1374_vm1 = vcmp.gt.f32.partialorder %v1340_v19, 0.0  ;;  %v1382_v22 = vmul.f32 0.01, %v1340_v19  ;;  %v1354_v51 = vpop.f32.mrf.mxu1 }
 0x1f7   : > { %v1240_v23 = vadd.f32 %v4151_v20, %v6435_v5  ;;  %v1726_v20 = vld [vmem:[#allocation9 + $0x40] sm:$0xff] }
 0x1f8   : > { %v4153_v25 = vpop.f32.mrf.mxu0  ;;  %v1390_v26 = vsel %vm1374_vm1, %v1340_v19, %v1382_v22  ;;  %v4767_v0 = vpop.f32.mrf.mxu1 }
 0x1f9   : > { %v1345_v27 = vadd.f32 %v1344_v24, %v1240_v23  ;;  %v4154_v28 = vadd.f32 %v4153_v25, %v4152_v21  ;;  %1398 = vst [vmem:[#allocation2 + $0x10] sm:$0xff] %v1390_v26  ;;  %4801 = vmatmul.mubr.f32.vlgmr.msra.gmra.mxu1 %v1390_v26  ;;  %v1725_v23 = vld [vmem:[#allocation9 + $0x38] sm:$0xff] }
 0x1fa   : > { %v4155_v29 = vpop.f32.mrf.mxu0  ;;  %v1364_v12 = vpop.f32.mrf.mxu1 }
 0x1fb   : > { %vm1375_vm2 = vcmp.gt.f32.partialorder %v1345_v27, 0.0  ;;  %v1383_v31 = vmul.f32 0.01, %v1345_v27  ;;  %v1245_v37 = vadd.f32 %v4154_v28, %v6435_v5  ;;  %v1724_v28 = vld [vmem:[#allocation9 + $0x30] sm:$0xff] }
 0x1fc   : > { %v4156_v40 = vpop.f32.mrf.mxu0  ;;  %v1413_v45 = vld [vmem:[#allocation2 + $0x7] sm:$0xff] }
 0x1fd   : > { %v1391_v42 = vsel %vm1375_vm2, %v1345_v27, %v1383_v31  ;;  %v1350_v43 = vadd.f32 %v4761_v17, %v1245_v37  ;;  %v4157_v44 = vadd.f32 %v4156_v40, %v4155_v29  ;;  %v1405_v46 = vld [vmem:[#allocation2 + $0x6] sm:$0xff]  ;;  %1548 = vmatprep.mubr.f32.mxu0 %v1413_v45  ;;  %v1720_v45 = vld [vmem:[#allocation9 + $0x10] sm:$0xff] }
 0x1fe   : > { %1399 = vst [vmem:[#allocation2 + $0x20] sm:$0xff] %v1391_v42  ;;  %v4158_v47 = vpop.f32.mrf.mxu0  ;;  %4803 = vmatprep.mubr.f32.mxu1 %v1391_v42  ;;  %1549 = vmatmul.mubr.f32.vlgmr.msra.gmra.mxu0 %v1405_v46  ;;  %v1721_v42 = vld [vmem:[#allocation9 + $0x18] sm:$0xff]  ;;  %v1719_v46 = vld [vmem:[#allocation9 + $0x8] sm:$0xff] }
 0x1ff   : > { %vm1376_vm3 = vcmp.gt.f32.partialorder %v1350_v43, 0.0  ;;  %v1384_v49 = vmul.f32 0.01, %v1350_v43  ;;  %v1250_v50 = vadd.f32 %v4157_v44, %v6435_v5  ;;  %4813 = vmatpush3.msra.mxu0 %v1733_v1  ;;  %v1729_v1 = vld [vmem:[#allocation9 + $0x58] sm:$0xff] }
 0x200   : > { %v4159_v52 = vpop.f32.mrf.mxu0  ;;  %4814 = vmatprep.subr.mxu0 %v1732_v48  ;;  %v1414_v57 = vld [vmem:[#allocation2 + $0xf] sm:$0xff] }
 0x201   : > { %v1392_v54 = vsel %vm1376_vm3, %v1350_v43, %v1384_v49  ;;  %v1355_v55 = vadd.f32 %v1354_v51, %v1250_v50  ;;  %v4160_v56 = vadd.f32 %v4159_v52, %v4158_v47  ;;  %v1406_v58 = vld [vmem:[#allocation2 + $0xe] sm:$0xff]  ;;  %4815 = vmatpush3.msra.mxu0 %v1732_v48  ;;  %1553 = vmatprep.mubr.f32.mxu0 %v1414_v57  ;;  %v1718_v49 = vld [vmem:[#allocation9] sm:$0xff]  ;;  %v1933_v50 = vld [vmem:[#allocation11 + $0x178] sm:$0xff] }
 0x202   : > { %1400 = vst [vmem:[#allocation2 + $0x28] sm:$0xff] %v1392_v54  ;;  %v4161_v59 = vpop.f32.mrf.mxu0  ;;  %4816 = vmatprep.subr.mxu0 %v1731_v53  ;;  %1554 = vmatmul.mubr.f32.gmra.mxu0 %v1406_v58  ;;  %v1931_v51 = vld [vmem:[#allocation11 + $0x168] sm:$0xff]  ;;  %v1898_v57 = vld [vmem:[#allocation11 + $0x60] sm:$0xff]  ;;  %v1913_v58 = vld [vmem:[#allocation11 + $0xd8] sm:$0xff] }
 0x203   : > { %vm1377_vm4 = vcmp.gt.f32.partialorder %v1355_v55, 0.0  ;;  %v1385_v61 = vmul.f32 0.01, %v1355_v55  ;;  %v1255_v62 = vadd.f32 %v4160_v56, %v6435_v5  ;;  %4817 = vmatpush3.msra.mxu0 %v1731_v53  ;;  %4804 = vmatmul.mubr.f32.gmra.mxu1 %v1392_v54  ;;  %v1915_v52 = vld [vmem:[#allocation11 + $0xe8] sm:$0xff]  ;;  %v1926_v56 = vld [vmem:[#allocation11 + $0x140] sm:$0xff] }
 0x204   : > { %v4162_v63 = vpop.f32.mrf.mxu0  ;;  %4818 = vmatprep.subr.mxu0 %v1730_v60  ;;  %v1927_v53 = vld [vmem:[#allocation11 + $0x148] sm:$0xff] }
 0x205   : > { %v1393_v2 = vsel %vm1377_vm4, %v1355_v55, %v1385_v61  ;;  %v1360_v3 = vadd.f32 %v4764_v41, %v1255_v62  ;;  %v4163_v4 = vadd.f32 %v4162_v63, %v4161_v59  ;;  %v1415_v6 = vld [vmem:[#allocation2 + $0x1f] sm:$0xff]  ;;  %4819 = vmatpush3.msra.mxu0 %v1730_v60  ;;  %v1899_v54 = vld [vmem:[#allocation11 + $0x68] sm:$0xff]  ;;  %v1912_v61 = vld [vmem:[#allocation11 + $0xd0] sm:$0xff] }
 0x206   : > { %v1407_v7 = vld [vmem:[#allocation2 + $0x1e] sm:$0xff]  ;;  %1401 = vst [vmem:[#allocation2 + $0x38] sm:$0xff] %v1393_v2  ;;  %v4164_v8 = vpop.f32.mrf.mxu0  ;;  %1558 = vmatprep.mubr.f32.mxu0 %v1415_v6  ;;  %4820 = vmatprep.subr.mxu0 %v1729_v1  ;;  %v1896_v62 = vld [vmem:[#allocation11 + $0x50] sm:$0xff] }
 0x207   : > { %vm1378_vm5 = vcmp.gt.f32.partialorder %v1360_v3, 0.0  ;;  %v1386_v10 = vmul.f32 0.01, %v1360_v3  ;;  %v1260_v11 = vadd.f32 %v4163_v4, %v6435_v5  ;;  %1559 = vmatmul.mubr.f32.gmra.mxu0 %v1407_v7  ;;  %4806 = vmatprep.mubr.f32.mxu1 %v1393_v2  ;;  %v1722_v41 = vld [vmem:[#allocation9 + $0x20] sm:$0xff]  ;;  %v1925_v59 = vld [vmem:[#allocation11 + $0x138] sm:$0xff]  ;;  %v1924_v63 = vld [vmem:[#allocation11 + $0x130] sm:$0xff] }
 0x208   : > { %4821 = vmatpush3.msra.mxu0 %v1729_v1  ;;  %v4165_v13 = vpop.f32.mrf.mxu0  ;;  %v1914_v55 = vld [vmem:[#allocation11 + $0xe0] sm:$0xff]  ;;  %v1897_v60 = vld [vmem:[#allocation11 + $0x58] sm:$0xff]  ;;  %v1923_v1 = vld [vmem:[#allocation11 + $0x128] sm:$0xff] }
 0x209   : > { %v1394_v15 = vsel %vm1378_vm5, %v1360_v3, %v1386_v10  ;;  %v1365_v16 = vadd.f32 %v1364_v12, %v1260_v11  ;;  %v4166_v17 = vadd.f32 %v4165_v13, %v4164_v8  ;;  %4822 = vmatprep.subr.mxu0 %v1728_v9  ;;  %v1416_v18 = vld [vmem:[#allocation2 + $0x27] sm:$0xff]  ;;  %v1909_v7 = vld [vmem:[#allocation11 + $0xb8] sm:$0xff]  ;;  %v1908_v10 = vld [vmem:[#allocation11 + $0xb0] sm:$0xff] }
 0x20a   : > { %v1408_v19 = vld [vmem:[#allocation2 + $0x26] sm:$0xff]  ;;  %1402 = vst [vmem:[#allocation2 + $0x40] sm:$0xff] %v1394_v15  ;;  %4823 = vmatpush3.msra.mxu0 %v1728_v9  ;;  %1563 = vmatprep.mubr.f32.mxu0 %v1416_v18  ;;  %v1921_v8 = vld [vmem:[#allocation11 + $0x118] sm:$0xff]  ;;  %v1920_v11 = vld [vmem:[#allocation11 + $0x110] sm:$0xff] }
 0x20b   : > { %vm1379_vm6 = vcmp.gt.f32.partialorder %v1365_v16, 0.0  ;;  %v1387_v21 = vmul.f32 0.01, %v1365_v16  ;;  %v1265_v22 = vadd.f32 %v4166_v17, %v6435_v5  ;;  %4824 = vmatprep.subr.mxu0 %v1727_v14  ;;  %1564 = vmatmul.mubr.f32.gmra.mxu0 %v1408_v19  ;;  %v1723_v5 = vld [vmem:[#allocation9 + $0x28] sm:$0xff]  ;;  %v1910_v3 = vld [vmem:[#allocation11 + $0xc0] sm:$0xff]  ;;  %v1893_v9 = vld [vmem:[#allocation11 + $0x38] sm:$0xff] }
 0x20c   : > { %4825 = vmatpush3.msra.mxu0 %v1727_v14  ;;  %4807 = vmatmul.mubr.f32.gmra.mxu1 %v1394_v15  ;;  %v1895_v2 = vld [vmem:[#allocation11 + $0x48] sm:$0xff]  ;;  %v1922_v4 = vld [vmem:[#allocation11 + $0x120] sm:$0xff]  ;;  %v1892_v12 = vld [vmem:[#allocation11 + $0x30] sm:$0xff] }
 0x20d   : > { %v1395_v24 = vsel %vm1379_vm6, %v1365_v16, %v1387_v21  ;;  %v1370_v25 = vadd.f32 %v4767_v0, %v1265_v22  ;;  %4826 = vmatprep.subr.mxu0 %v1726_v20  ;;  %v1417_v26 = vld [vmem:[#allocation2 + $0x37] sm:$0xff]  ;;  %v1911_v0 = vld [vmem:[#allocation11 + $0xc8] sm:$0xff]  ;;  %v1894_v6 = vld [vmem:[#allocation11 + $0x40] sm:$0xff] }
 0x20e   : > { %v1409_v27 = vld [vmem:[#allocation2 + $0x36] sm:$0xff]  ;;  %1403 = vst [vmem:[#allocation2 + $0x50] sm:$0xff] %v1395_v24  ;;  %4827 = vmatpush3.msra.mxu0 %v1726_v20  ;;  %1568 = vmatprep.mubr.f32.mxu0 %v1417_v26  ;;  %v1907_v13 = vld [vmem:[#allocation11 + $0xa8] sm:$0xff]  ;;  %v1906_v16 = vld [vmem:[#allocation11 + $0xa0] sm:$0xff] }
 0x20f   : > { %vm1380_vm7 = vcmp.gt.f32.partialorder %v1370_v25, 0.0  ;;  %v1388_v29 = vmul.f32 0.01, %v1370_v25  ;;  %4828 = vmatprep.subr.mxu0 %v1725_v23  ;;  %1569 = vmatmul.mubr.f32.gmra.mxu0 %v1409_v27  ;;  %v1919_v14 = vld [vmem:[#allocation11 + $0x108] sm:$0xff]  ;;  %v1918_v17 = vld [vmem:[#allocation11 + $0x100] sm:$0xff]  ;;  %v1905_v19 = vld [vmem:[#allocation11 + $0x98] sm:$0xff] }
 0x210   : > { %4829 = vmatpush3.msra.mxu0 %v1725_v23  ;;  %4809 = vmatprep.mubr.f32.mxu1 %v1395_v24  ;;  %v1891_v15 = vld [vmem:[#allocation11 + $0x28] sm:$0xff]  ;;  %v1890_v18 = vld [vmem:[#allocation11 + $0x20] sm:$0xff]  ;;  %v1889_v20 = vld [vmem:[#allocation11 + $0x18] sm:$0xff] }
 0x211   : > { %v1396_v31 = vsel %vm1380_vm7, %v1370_v25, %v1388_v29  ;;  %4830 = vmatprep.subr.mxu0 %v1724_v28  ;;  %v1418_v37 = vld [vmem:[#allocation2 + $0x3f] sm:$0xff]  ;;  %v1904_v21 = vld [vmem:[#allocation11 + $0x90] sm:$0xff]  ;;  %v1903_v23 = vld [vmem:[#allocation11 + $0x88] sm:$0xff] }
 0x212   : > { %v1410_v40 = vld [vmem:[#allocation2 + $0x3e] sm:$0xff]  ;;  %1404 = vst [vmem:[#allocation2 + $0x58] sm:$0xff] %v1396_v31  ;;  %4831 = vmatpush3.msra.mxu0 %v1724_v28  ;;  %1573 = vmatprep.mubr.f32.mxu0 %v1418_v37  ;;  %v1888_v22 = vld [vmem:[#allocation11 + $0x10] sm:$0xff]  ;;  %v1887_v24 = vld [vmem:[#allocation11 + $0x8] sm:$0xff] }
 0x213   : > { %4832 = vmatprep.subr.mxu0 %v1723_v5  ;;  %1574 = vmatmul.mubr.f32.gmra.mxu0 %v1410_v40  ;;  %v1902_v25 = vld [vmem:[#allocation11 + $0x80] sm:$0xff]  ;;  %v2238_v27 = vld [vmem:[#allocation12 + $0xf8] sm:$0xff] }
 0x214   : > { %4833 = vmatpush3.msra.mxu0 %v1723_v5  ;;  %4810 = vmatmul.mubr.f32.gmra.mxu1 %v1396_v31  ;;  %v1886_v26 = vld [vmem:[#allocation11] sm:$0xff]  ;;  %v6453_v28 = vld [vmem:[#allocation12 + $0x178] sm:$0xff] }
 0x215   : > { %4834 = vmatprep.subr.mxu0 %v1722_v41  ;;  %v1419_v43 = vld [vmem:[#allocation2 + $0x4f] sm:$0xff] }
 0x216   : > { %v1411_v44 = vld [vmem:[#allocation2 + $0x4e] sm:$0xff]  ;;  %4835 = vmatpush3.msra.mxu0 %v1722_v41  ;;  %1578 = vmatprep.mubr.f32.mxu0 %v1419_v43 }
 0x217   : > { %4836 = vmatprep.subr.mxu0 %v1721_v42  ;;  %1579 = vmatmul.mubr.f32.gmra.mxu0 %v1411_v44 }
 0x218   : > { %4837 = vmatpush3.msra.mxu0 %v1721_v42 }
 0x219   : > { %4838 = vmatprep.subr.mxu0 %v1720_v45  ;;  %v1420_v47 = vld [vmem:[#allocation2 + $0x57] sm:$0xff] }
 0x21a   : > { %v1412_v48 = vld [vmem:[#allocation2 + $0x56] sm:$0xff]  ;;  %4839 = vmatpush3.msra.mxu0 %v1720_v45  ;;  %1583 = vmatprep.mubr.f32.mxu0 %v1420_v47 }
 0x21b   : > { %4840 = vmatprep.subr.mxu0 %v1719_v46  ;;  %1584 = vmatmul.mubr.f32.gmra.mxu0 %v1412_v48 }
 0x21c   : > { %4841 = vmatpush3.msra.mxu0 %v1719_v46  ;;  %4844 = vmatprep.mubr.f32.mxu0 %v6393_v30  ;;  %v1932_v30 = vld [vmem:[#allocation11 + $0x170] sm:$0xff] }
 0x21d   : > { %4842 = vmatprep.subr.mxu0 %v1718_v49 }
 0x21e   : > { %4843 = vmatpush3.msra.mxu0 %v1718_v49 }
 0x21f   : > { %4845 = vmatmul.mubr.f32.vlgmr.msra.gmra.mxu0 %v6397_v32  ;;  %4856 = vmatprep.subr.mxu0 %v1933_v50  ;;  %v1930_v32 = vld [vmem:[#allocation11 + $0x160] sm:$0xff] }
 0x220   : > { %4847 = vmatprep.mubr.f32.mxu0 %v6400_v33  ;;  %4857 = vmatpush3.msra.mxu0 %v1933_v50  ;;  %v1917_v33 = vld [vmem:[#allocation11 + $0xf8] sm:$0xff]  ;;  %v4092_v50 = vld [vmem:[%s6912_s2] ss:$0 sm:$0xff]  ;;  %s6846_s2 = sshll.u32 %s6115_s10, 6 }
 0x221   : > { %4858 = vmatprep.subr.mxu0 %v1932_v30  ;;  %4295 = vmatprep.subr.mxu1 %v1917_v33  ;;  %s3814_s26 = scalar_lea.hbm %s6920_s19, %s6846_s2 }
 0x222   : > { %4859 = vmatpush3.msra.mxu0 %v1932_v30 }
 0x223   : > { %4848 = vmatmul.mubr.f32.gmra.mxu0 %v6405_v34  ;;  %4860 = vmatprep.subr.mxu0 %v1931_v51  ;;  %v1929_v34 = vld [vmem:[#allocation11 + $0x158] sm:$0xff] }
 0x224   : > { %4850 = vmatprep.mubr.f32.mxu0 %v6408_v35  ;;  %4861 = vmatpush3.msra.mxu0 %v1931_v51  ;;  %v1901_v35 = vld [vmem:[#allocation11 + $0x78] sm:$0xff] }
 0x225   : > { %4862 = vmatprep.subr.mxu0 %v1930_v32  ;;  %4296 = vmatpush3.msra.mxu1 %v1901_v35 }
 0x226   : > { %4863 = vmatpush3.msra.mxu0 %v1930_v32 }
 0x227   : > { %4851 = vmatmul.mubr.f32.gmra.mxu0 %v6411_v36  ;;  %4864 = vmatprep.subr.mxu0 %v1929_v34  ;;  %v1916_v36 = vld [vmem:[#allocation11 + $0xf0] sm:$0xff] }
 0x228   : > { %4853 = vmatprep.mubr.f32.mxu0 %v6417_v38  ;;  %v1900_v38 = vld [vmem:[#allocation11 + $0x70] sm:$0xff]  ;;  %4865 = vmatpush3.msra.mxu0 %v1929_v34 }
 0x229   : > { %4297 = vmatprep.subr.mxu1 %v1916_v36 }
 0x22a   : > { %4298 = vmatpush3.msra.mxu1 %v1900_v38 }
 0x22b   : > { %4854 = vmatmul.mubr.f32.gmra.mxu0 %v6420_v39  ;;  %v1928_v39 = vld [vmem:[#allocation11 + $0x150] sm:$0xff]  ;;  %4299 = vmatprep.subr.mxu1 %v1915_v52 }
 0x22c   : > { %4866 = vmatprep.subr.mxu0 %v1928_v39  ;;  %4300 = vmatpush3.msra.mxu1 %v1899_v54 }
 0x22d   : > { %4867 = vmatpush3.msra.mxu0 %v1928_v39  ;;  %4301 = vmatprep.subr.mxu1 %v1914_v55 }
 0x22e   : > { %4868 = vmatprep.subr.mxu0 %v1927_v53  ;;  %4302 = vmatpush3.msra.mxu1 %v1898_v57 }
 0x22f   : > { %4869 = vmatpush3.msra.mxu0 %v1927_v53  ;;  %4303 = vmatprep.subr.mxu1 %v1913_v58 }
 0x230   : > { %4870 = vmatprep.subr.mxu0 %v1926_v56  ;;  %4304 = vmatpush3.msra.mxu1 %v1897_v60 }
 0x231   : > { %4871 = vmatpush3.msra.mxu0 %v1926_v56  ;;  %4305 = vmatprep.subr.mxu1 %v1912_v61 }
 0x232   : > { %4872 = vmatprep.subr.mxu0 %v1925_v59  ;;  %4306 = vmatpush3.msra.mxu1 %v1896_v62 }
 0x233   : > { %4873 = vmatpush3.msra.mxu0 %v1925_v59  ;;  %4307 = vmatprep.subr.mxu1 %v1911_v0 }
 0x234   : > { %4874 = vmatprep.subr.mxu0 %v1924_v63  ;;  %4308 = vmatpush3.msra.mxu1 %v1895_v2 }
 0x235   : > { %4875 = vmatpush3.msra.mxu0 %v1924_v63  ;;  %4309 = vmatprep.subr.mxu1 %v1910_v3 }
 0x236   : > { %4876 = vmatprep.subr.mxu0 %v1923_v1  ;;  %4310 = vmatpush3.msra.mxu1 %v1894_v6 }
 0x237   : > { %4877 = vmatpush3.msra.mxu0 %v1923_v1  ;;  %4311 = vmatprep.subr.mxu1 %v1909_v7  ;;  %v6462_v1 = vld [vmem:[%s6913_s6] ss:$0 sm:$0xff]  ;;  %s6847_s6 = sshll.u32 %s6354_s21, 2 }
 0x238   : > { %4878 = vmatprep.subr.mxu0 %v1922_v4  ;;  %4312 = vmatpush3.msra.mxu1 %v1893_v9 }
 0x239   : > { %4879 = vmatpush3.msra.mxu0 %v1922_v4  ;;  %4313 = vmatprep.subr.mxu1 %v1908_v10 }
 0x23a   : > { %4880 = vmatprep.subr.mxu0 %v1921_v8  ;;  %4314 = vmatpush3.msra.mxu1 %v1892_v12 }
 0x23b   : > { %4881 = vmatpush3.msra.mxu0 %v1921_v8  ;;  %4315 = vmatprep.subr.mxu1 %v1907_v13 }
 0x23c   : > { %4882 = vmatprep.subr.mxu0 %v1920_v11  ;;  %4316 = vmatpush3.msra.mxu1 %v1891_v15 }
 0x23d   : > { %4883 = vmatpush3.msra.mxu0 %v1920_v11  ;;  %4317 = vmatprep.subr.mxu1 %v1906_v16 }
 0x23e   : > { %4884 = vmatprep.subr.mxu0 %v1919_v14  ;;  %4318 = vmatpush3.msra.mxu1 %v1890_v18 }
 0x23f   : > { %4885 = vmatpush3.msra.mxu0 %v1919_v14  ;;  %4319 = vmatprep.subr.mxu1 %v1905_v19 }
 0x240   : > { %4886 = vmatprep.subr.mxu0 %v1918_v17  ;;  %4320 = vmatpush3.msra.mxu1 %v1889_v20 }
 0x241   : > { %4887 = vmatpush3.msra.mxu0 %v1918_v17  ;;  %4321 = vmatprep.subr.mxu1 %v1904_v21 }
 0x242   : > { %4322 = vmatpush3.msra.mxu1 %v1888_v22  ;;  %4900 = vmatprep.subr.mxu0 %v6453_v28 }
 0x243   : > { %4323 = vmatprep.subr.mxu1 %v1903_v23 }
 0x244   : > { %4324 = vmatpush3.msra.mxu1 %v1887_v24 }
 0x245   : > { %4325 = vmatprep.subr.mxu1 %v1902_v25 }
 0x246   : > { %4326 = vmatpush3.msra.mxu1 %v1886_v26 }
 0x247   : > { %4375 = vmatprep.subr.mxu1 %v2238_v27 }
 0x2b9   : > { %v4802_v45 = vpop.f32.mrf.mxu1 }
 0x2bb   : > { %v1655_v30 = vpop.f32.mrf.mxu1 }
 0x2be   : > { %v4223_v29 = vpop.f32.mrf.mxu0 }
 0x2c0   : > { %v4224_v5 = vpop.f32.mrf.mxu0 }
 0x2c1   : > { %v4225_v48 = vadd.f32 %v4224_v5, %v4223_v29 }
 0x2c2   : > { %v4226_v31 = vpop.f32.mrf.mxu0 }
 0x2c3   : > { %v4805_v34 = vpop.f32.mrf.mxu1  ;;  %v1551_v35 = vadd.f32 %v4225_v48, %v4092_v50  ;;  %v2252_v48 = vld [vmem:[#allocation12 + $0x168] sm:$0xff] }
 0x2c4   : > { %v4227_v37 = vpop.f32.mrf.mxu0 }
 0x2c5   : > { %v4228_v46 = vadd.f32 %v4227_v37, %v4226_v31  ;;  %v1665_v55 = vpop.f32.mrf.mxu1  ;;  %v1656_v56 = vadd.f32 %v1655_v30, %v1551_v35 }
 0x2c7   : > { %v4229_v40 = vpop.f32.mrf.mxu0  ;;  %v1556_v51 = vadd.f32 %v4228_v46, %v4092_v50  ;;  %v1702_v3 = vmul.f32 0.01, %v1656_v56  ;;  %vm1694_vm9 = vcmp.gt.f32.partialorder %v1656_v56, 0.0 }
 0x2c9   : > { %v4230_v41 = vpop.f32.mrf.mxu0  ;;  %v1661_v39 = vadd.f32 %v4802_v45, %v1556_v51  ;;  %v1710_v22 = vsel %vm1694_vm9, %v1656_v56, %v1702_v3  ;;  %v2235_v3 = vld [vmem:[#allocation12 + $0xe0] sm:$0xff] }
 0x2ca   : > { %v4231_v36 = vadd.f32 %v4230_v41, %v4229_v40  ;;  %v2253_v41 = vld [vmem:[#allocation12 + $0x170] sm:$0xff] }
 0x2cb   : > { %v4232_v42 = vpop.f32.mrf.mxu0  ;;  %v1703_v0 = vmul.f32 0.01, %v1661_v39  ;;  %vm1695_vm8 = vcmp.gt.f32.partialorder %v1661_v39, 0.0 }
 0x2cc   : > { %v1561_v57 = vadd.f32 %v4231_v36, %v4092_v50  ;;  %v4808_v60 = vpop.f32.mrf.mxu1 }
 0x2cd   : > { %v4233_v43 = vpop.f32.mrf.mxu0  ;;  %v1711_v13 = vsel %vm1695_vm8, %v1661_v39, %v1703_v0 }
 0x2ce   : > { %v4234_v32 = vadd.f32 %v4233_v43, %v4232_v42  ;;  %v1666_v4 = vadd.f32 %v1665_v55, %v1561_v57  ;;  %v1675_v9 = vpop.f32.mrf.mxu1  ;;  %v2222_v55 = vld [vmem:[#allocation12 + $0x78] sm:$0xff] }
 0x2cf   : > { %v4235_v44 = vpop.f32.mrf.mxu0 }
 0x2d0   : > { %v1566_v52 = vadd.f32 %v4234_v32, %v4092_v50  ;;  %v1704_v19 = vmul.f32 0.01, %v1666_v4  ;;  %vm1696_vm11 = vcmp.gt.f32.partialorder %v1666_v4, 0.0 }
 0x2d1   : > { %v4236_v47 = vpop.f32.mrf.mxu0 }
 0x2d2   : > { %v4237_v58 = vadd.f32 %v4236_v47, %v4235_v44  ;;  %v1671_v61 = vadd.f32 %v4805_v34, %v1566_v52  ;;  %v1712_v44 = vsel %vm1696_vm11, %v1666_v4, %v1704_v19  ;;  %v2219_v4 = vld [vmem:[#allocation12 + $0x60] sm:$0xff] }
 0x2d3   : > { %v4238_v49 = vpop.f32.mrf.mxu0 }
 0x2d4   : > { %v1571_v6 = vadd.f32 %v4237_v58, %v4092_v50  ;;  %v1705_v15 = vmul.f32 0.01, %v1671_v61  ;;  %v4811_v16 = vpop.f32.mrf.mxu1  ;;  %vm1697_vm10 = vcmp.gt.f32.partialorder %v1671_v61, 0.0  ;;  %v2237_v58 = vld [vmem:[#allocation12 + $0xf0] sm:$0xff] }
 0x2d5   : > { %v4239_v33 = vpop.f32.mrf.mxu0 }
 0x2d6   : > { %v4240_v53 = vadd.f32 %v4239_v33, %v4238_v49  ;;  %v1676_v20 = vadd.f32 %v1675_v9, %v1571_v6  ;;  %v1713_v27 = vsel %vm1697_vm10, %v1671_v61, %v1705_v15  ;;  %v1685_v31 = vpop.f32.mrf.mxu1  ;;  %v2251_v33 = vld [vmem:[#allocation12 + $0x160] sm:$0xff]  ;;  %v2221_v61 = vld [vmem:[#allocation12 + $0x70] sm:$0xff]  ;;  %v2218_v9 = vld [vmem:[#allocation12 + $0x58] sm:$0xff] }
 0x2d7   : > { %v4241_v38 = vpop.f32.mrf.mxu0 }
 0x2d8   : > { %v1576_v62 = vadd.f32 %v4240_v53, %v4092_v50  ;;  %v1706_v42 = vmul.f32 0.01, %v1676_v20  ;;  %vm1698_vm13 = vcmp.gt.f32.partialorder %v1676_v20, 0.0 }
 0x2d9   : > { %v4242_v54 = vpop.f32.mrf.mxu0 }
 0x2da   : > { %v4243_v7 = vadd.f32 %v4242_v54, %v4241_v38  ;;  %v1681_v11 = vadd.f32 %v4808_v60, %v1576_v62  ;;  %v1714_v35 = vsel %vm1698_vm13, %v1676_v20, %v1706_v42  ;;  %v2244_v42 = vld [vmem:[#allocation12 + $0x128] sm:$0xff] }
 0x2db   : > { %v4244_v59 = vpop.f32.mrf.mxu0 }
 0x2dc   : > { %v1581_v21 = vadd.f32 %v4243_v7, %v4092_v50  ;;  %v1707_v5 = vmul.f32 0.01, %v1681_v11  ;;  %vm1699_vm12 = vcmp.gt.f32.partialorder %v1681_v11, 0.0  ;;  %v2234_v7 = vld [vmem:[#allocation12 + $0xd8] sm:$0xff] }
 0x2dd   : > { %v4245_v63 = vpop.f32.mrf.mxu0 }
 0x2de   : > { %v4246_v2 = vadd.f32 %v4245_v63, %v4244_v59  ;;  %v1686_v43 = vadd.f32 %v1685_v31, %v1581_v21  ;;  %v1715_v49 = vsel %vm1699_vm12, %v1681_v11, %v1707_v5  ;;  %v2236_v63 = vld [vmem:[#allocation12 + $0xe8] sm:$0xff]  ;;  %v2217_v11 = vld [vmem:[#allocation12 + $0x50] sm:$0xff]  ;;  %v2246_v5 = vld [vmem:[#allocation12 + $0x138] sm:$0xff] }
 0x2df   : > { %v4846_v8 = vpop.f32.mrf.mxu0  ;;  %v2245_v31 = vld [vmem:[#allocation12 + $0x130] sm:$0xff] }
 0x2e0   : > { %v1813_v10 = vadd.f32 %v4846_v8, %v6462_v1  ;;  %v1586_v12 = vadd.f32 %v4246_v2, %v4092_v50  ;;  %v1708_v34 = vmul.f32 0.01, %v1686_v43  ;;  %vm1700_vm15 = vcmp.gt.f32.partialorder %v1686_v43, 0.0 }
 0x2e1   : > { %v1807_v14 = vpop.f32.mrf.mxu0 }
 0x2e2   : > { %v6465_v17 = vadd.f32 %v1813_v10, %v1711_v13  ;;  %v1808_v18 = vadd.f32 %v6462_v1, %v1807_v14  ;;  %v1691_v26 = vadd.f32 %v4811_v16, %v1586_v12  ;;  %v1716_v59 = vsel %vm1700_vm15, %v1686_v43, %v1708_v34  ;;  %v2233_v10 = vld [vmem:[#allocation12 + $0xd0] sm:$0xff]  ;;  %v2230_v43 = vld [vmem:[#allocation12 + $0xb8] sm:$0xff]  ;;  %v2211_v34 = vld [vmem:[#allocation12 + $0x20] sm:$0xff] }
 0x2e3   : > { %v4849_v23 = vpop.f32.mrf.mxu0 }
 0x2e4   : > { %1855 = vst [vmem:[#allocation2 + $0x10] sm:$0xff] %v6465_v17  ;;  %v6469_v24 = vadd.f32 %v1808_v18, %v1710_v22  ;;  %v1823_v25 = vadd.f32 %v4849_v23, %v6462_v1  ;;  %v1709_v30 = vmul.f32 0.01, %v1691_v26  ;;  %vm1701_vm14 = vcmp.gt.f32.partialorder %v1691_v26, 0.0  ;;  %v2250_v22 = vld [vmem:[#allocation12 + $0x158] sm:$0xff]  ;;  %v2249_v23 = vld [vmem:[#allocation12 + $0x150] sm:$0xff] }
 0x2e5   : > { %v1817_v29 = vpop.f32.mrf.mxu0 }
 0x2e6   : > { %1854 = vst [vmem:[#allocation2 + $0x8] sm:$0xff] %v6469_v24  ;;  %v6473_v37 = vadd.f32 %v1823_v25, %v1713_v27  ;;  %v1818_v40 = vadd.f32 %v6462_v1, %v1817_v29  ;;  %4888 = vmatprep.mubr.f32.mxu0 %v6469_v24  ;;  %v1717_v39 = vsel %vm1701_vm14, %v1691_v26, %v1709_v30  ;;  %v2248_v25 = vld [vmem:[#allocation12 + $0x148] sm:$0xff]  ;;  %v2247_v26 = vld [vmem:[#allocation12 + $0x140] sm:$0xff] }
 0x2e7   : > { %v4852_v45 = vpop.f32.mrf.mxu0  ;;  %4889 = vmatmul.mubr.f32.vlgmr.msra.gmra.mxu0 %v6465_v17  ;;  %v2232_v27 = vld [vmem:[#allocation12 + $0xc8] sm:$0xff] }
 0x2e8   : > { %1857 = vst [vmem:[#allocation2 + $0x28] sm:$0xff] %v6473_v37  ;;  %v6480_v46 = vadd.f32 %v1818_v40, %v1712_v44  ;;  %v1833_v47 = vadd.f32 %v4852_v45, %v6462_v1  ;;  %4901 = vmatpush3.msra.mxu0 %v6453_v28  ;;  %v2216_v29 = vld [vmem:[#allocation12 + $0x48] sm:$0xff]  ;;  %v2231_v40 = vld [vmem:[#allocation12 + $0xc0] sm:$0xff]  ;;  %v2214_v44 = vld [vmem:[#allocation12 + $0x38] sm:$0xff] }
 0x2e9   : > { %v1827_v50 = vpop.f32.mrf.mxu0  ;;  %4902 = vmatprep.subr.mxu0 %v2253_v41  ;;  %v2243_v45 = vld [vmem:[#allocation12 + $0x120] sm:$0xff]  ;;  %v2212_v30 = vld [vmem:[#allocation12 + $0x28] sm:$0xff] }
 0x2ea   : > { %1856 = vst [vmem:[#allocation2 + $0x20] sm:$0xff] %v6480_v46  ;;  %v6485_v51 = vadd.f32 %v1833_v47, %v1715_v49  ;;  %v1828_v32 = vadd.f32 %v6462_v1, %v1827_v50  ;;  %4891 = vmatprep.mubr.f32.mxu0 %v6480_v46  ;;  %4903 = vmatpush3.msra.mxu0 %v2253_v41  ;;  %v2215_v41 = vld [vmem:[#allocation12 + $0x40] sm:$0xff]  ;;  %v2229_v47 = vld [vmem:[#allocation12 + $0xb0] sm:$0xff]  ;;  %v2242_v49 = vld [vmem:[#allocation12 + $0x118] sm:$0xff] }
 0x2eb   : > { %v4855_v28 = vpop.f32.mrf.mxu0  ;;  %4892 = vmatmul.mubr.f32.gmra.mxu0 %v6473_v37  ;;  %4904 = vmatprep.subr.mxu0 %v2252_v48  ;;  %v2228_v50 = vld [vmem:[#allocation12 + $0xa8] sm:$0xff] }
 0x2ec   : > { %1859 = vst [vmem:[#allocation2 + $0x40] sm:$0xff] %v6485_v51  ;;  %v6492_v36 = vadd.f32 %v1828_v32, %v1714_v35  ;;  %v1843_v38 = vadd.f32 %v4855_v28, %v6462_v1  ;;  %4905 = vmatpush3.msra.mxu0 %v2252_v48  ;;  %v2213_v48 = vld [vmem:[#allocation12 + $0x30] sm:$0xff]  ;;  %v2240_v35 = vld [vmem:[#allocation12 + $0x108] sm:$0xff]  ;;  %v2226_v28 = vld [vmem:[#allocation12 + $0x98] sm:$0xff] }
 0x2ed   : > { %v1837_v52 = vpop.f32.mrf.mxu0  ;;  %v1870_v53 = vld [vmem:[#allocation2 + $0x6] sm:$0xff]  ;;  %4906 = vmatprep.subr.mxu0 %v2251_v33  ;;  %v1871_v60 = vld [vmem:[#allocation2 + $0xe] sm:$0xff] }
 0x2ee   : > { %v1862_v54 = vld [vmem:[#allocation2 + $0x4] sm:$0xff]  ;;  %1858 = vst [vmem:[#allocation2 + $0x38] sm:$0xff] %v6492_v36  ;;  %v6496_v56 = vadd.f32 %v1843_v38, %v1717_v39  ;;  %v1838_v57 = vadd.f32 %v6462_v1, %v1837_v52  ;;  %2005 = vmatprep.mubr.f32.mxu1 %v1870_v53  ;;  %4894 = vmatprep.mubr.f32.mxu0 %v6492_v36  ;;  %v1863_v0 = vld [vmem:[#allocation2 + $0xc] sm:$0xff]  ;;  %v2210_v38 = vld [vmem:[#allocation12 + $0x18] sm:$0xff] }
 0x2ef   : > { %2006 = vmatmul.mubr.f32.vlgmr.msra.gmra.mxu1 %v1862_v54  ;;  %4895 = vmatmul.mubr.f32.gmra.mxu0 %v6485_v51  ;;  %v2220_v1 = vld [vmem:[#allocation12 + $0x68] sm:$0xff]  ;;  %v2241_v32 = vld [vmem:[#allocation12 + $0x110] sm:$0xff]  ;;  %v2239_v39 = vld [vmem:[#allocation12 + $0x100] sm:$0xff] }
 0x2f0   : > { %1861 = vst [vmem:[#allocation2 + $0x58] sm:$0xff] %v6496_v56  ;;  %v6503_v62 = vadd.f32 %v1838_v57, %v1716_v59  ;;  %2010 = vmatprep.mubr.f32.mxu1 %v1871_v60  ;;  %4376 = vmatpush3.msra.mxu1 %v2222_v55  ;;  %v2225_v52 = vld [vmem:[#allocation12 + $0x90] sm:$0xff]  ;;  %v2224_v54 = vld [vmem:[#allocation12 + $0x88] sm:$0xff]  ;;  %v2223_v57 = vld [vmem:[#allocation12 + $0x80] sm:$0xff] }
 0x2f1   : > { %4377 = vmatprep.subr.mxu1 %v2237_v58  ;;  %4907 = vmatpush3.msra.mxu0 %v2251_v33  ;;  %v1872_v2 = vld [vmem:[#allocation2 + $0x1e] sm:$0xff]  ;;  %v1873_v8 = vld [vmem:[#allocation2 + $0x26] sm:$0xff]  ;;  %v2209_v53 = vld [vmem:[#allocation12 + $0x10] sm:$0xff] }
 0x2f2   : > { %1860 = vst [vmem:[#allocation2 + $0x50] sm:$0xff] %v6503_v62  ;;  %4897 = vmatprep.mubr.f32.mxu0 %v6503_v62  ;;  %4378 = vmatpush3.msra.mxu1 %v2221_v61  ;;  %v1864_v6 = vld [vmem:[#allocation2 + $0x1c] sm:$0xff]  ;;  %v1865_v12 = vld [vmem:[#allocation2 + $0x24] sm:$0xff] }
 0x2f3   : > { %2011 = vmatmul.mubr.f32.gmra.mxu1 %v1863_v0  ;;  %4898 = vmatmul.mubr.f32.gmra.mxu0 %v6496_v56  ;;  %v2227_v33 = vld [vmem:[#allocation12 + $0xa0] sm:$0xff]  ;;  %v2208_v55 = vld [vmem:[#allocation12 + $0x8] sm:$0xff]  ;;  %v2567_v59 = vld [vmem:[#allocation14 + $0xf8] sm:$0xff] }
 0x2f4   : > { %2015 = vmatprep.mubr.f32.mxu1 %v1872_v2  ;;  %4379 = vmatprep.subr.mxu1 %v2236_v63  ;;  %v2207_v58 = vld [vmem:[#allocation12] sm:$0xff]  ;;  %v2583_v60 = vld [vmem:[#allocation14 + $0x178] sm:$0xff] }
 0x2f5   : > { %4380 = vmatpush3.msra.mxu1 %v2220_v1  ;;  %v1874_v13 = vld [vmem:[#allocation2 + $0x36] sm:$0xff]  ;;  %v1875_v15 = vld [vmem:[#allocation2 + $0x3e] sm:$0xff]  ;;  %4908 = vmatprep.subr.mxu0 %v2250_v22 }
 0x2f6   : > { %4381 = vmatprep.subr.mxu1 %v2235_v3  ;;  %v1866_v14 = vld [vmem:[#allocation2 + $0x34] sm:$0xff]  ;;  %v1867_v16 = vld [vmem:[#allocation2 + $0x3c] sm:$0xff]  ;;  %4909 = vmatpush3.msra.mxu0 %v2250_v22 }
 0x2f7   : > { %2016 = vmatmul.mubr.f32.gmra.mxu1 %v1864_v6  ;;  %4910 = vmatprep.subr.mxu0 %v2249_v23  ;;  %v6511_v1 = vld [vmem:[%s6914_s23] ss:$0 sm:$0xff]  ;;  %s6692_s23 = scalar_lea.vmem [#allocation26], %s6847_s6 }
 0x2f8   : > { %2020 = vmatprep.mubr.f32.mxu1 %v1873_v8  ;;  %4382 = vmatpush3.msra.mxu1 %v2219_v4  ;;  %s3816_s13 = sshll.u32 %s6692_s23, 4  ;;  %s3817_s13 = int_to_ptr.vmem [resolvable:$true] %s3816_s13 }
 0x2f9   : > { %4383 = vmatprep.subr.mxu1 %v2234_v7  ;;  %v1876_v18 = vld [vmem:[#allocation2 + $0x4e] sm:$0xff]  ;;  %v1877_v20 = vld [vmem:[#allocation2 + $0x56] sm:$0xff]  ;;  %4911 = vmatpush3.msra.mxu0 %v2249_v23  ;;  %p5812_p7 = scmp.lt.s32.totalorder %s3817_s13, %s5810_s0 }
 0x2fa   : > { %4384 = vmatpush3.msra.mxu1 %v2218_v9  ;;  %v1868_v19 = vld [vmem:[#allocation2 + $0x4c] sm:$0xff]  ;;  %v1869_v21 = vld [vmem:[#allocation2 + $0x54] sm:$0xff]  ;;  %4912 = vmatprep.subr.mxu0 %v2248_v25 }
 0x2fb   : > { %2021 = vmatmul.mubr.f32.gmra.mxu1 %v1865_v12  ;;  %4385 = vmatprep.subr.mxu1 %v2233_v10 }
 0x2fc   : > { %2025 = vmatprep.mubr.f32.mxu1 %v1874_v13  ;;  %4386 = vmatpush3.msra.mxu1 %v2217_v11 }
 0x2fd   : > { %4913 = vmatpush3.msra.mxu0 %v2248_v25  ;;  %4387 = vmatprep.subr.mxu1 %v2232_v27 }
 0x2fe   : > { %4914 = vmatprep.subr.mxu0 %v2247_v26  ;;  %4388 = vmatpush3.msra.mxu1 %v2216_v29  ;;  %v2582_v29 = vld [vmem:[#allocation14 + $0x170] sm:$0xff] }
 0x2ff   : > { %2026 = vmatmul.mubr.f32.gmra.mxu1 %v1866_v14  ;;  %4915 = vmatpush3.msra.mxu0 %v2247_v26 }
 0x300   : > { %2030 = vmatprep.mubr.f32.mxu1 %v1875_v15  ;;  %4916 = vmatprep.subr.mxu0 %v2246_v5 }
 0x301   : > { %4917 = vmatpush3.msra.mxu0 %v2246_v5  ;;  %4389 = vmatprep.subr.mxu1 %v2231_v40 }
 0x302   : > { %4918 = vmatprep.subr.mxu0 %v2245_v31  ;;  %4390 = vmatpush3.msra.mxu1 %v2215_v41 }
 0x303   : > { %2031 = vmatmul.mubr.f32.gmra.mxu1 %v1867_v16  ;;  %4919 = vmatpush3.msra.mxu0 %v2245_v31 }
 0x304   : > { %2035 = vmatprep.mubr.f32.mxu1 %v1876_v18  ;;  %4920 = vmatprep.subr.mxu0 %v2244_v42 }
 0x305   : > { %4391 = vmatprep.subr.mxu1 %v2230_v43  ;;  %4921 = vmatpush3.msra.mxu0 %v2244_v42  ;;  %v2581_v43 = vld [vmem:[#allocation14 + $0x168] sm:$0xff] }
 0x306   : > { %4392 = vmatpush3.msra.mxu1 %v2214_v44  ;;  %4922 = vmatprep.subr.mxu0 %v2243_v45 }
 0x307   : > { %2036 = vmatmul.mubr.f32.gmra.mxu1 %v1868_v19  ;;  %4393 = vmatprep.subr.mxu1 %v2229_v47 }
 0x308   : > { %2040 = vmatprep.mubr.f32.mxu1 %v1877_v20  ;;  %4923 = vmatpush3.msra.mxu0 %v2243_v45 }
 0x309   : > { %4394 = vmatpush3.msra.mxu1 %v2213_v48  ;;  %4924 = vmatprep.subr.mxu0 %v2242_v49 }
 0x30a   : > { %4395 = vmatprep.subr.mxu1 %v2228_v50  ;;  %4925 = vmatpush3.msra.mxu0 %v2242_v49  ;;  %v2551_v50 = vld [vmem:[#allocation14 + $0x78] sm:$0xff] }
 0x30b   : > { %2041 = vmatmul.mubr.f32.gmra.mxu1 %v1869_v21  ;;  %4926 = vmatprep.subr.mxu0 %v2241_v32 }
 0x30c   : > { %4396 = vmatpush3.msra.mxu1 %v2212_v30  ;;  %4927 = vmatpush3.msra.mxu0 %v2241_v32  ;;  %v2566_v32 = vld [vmem:[#allocation14 + $0xf0] sm:$0xff] }
 0x30d   : > { %4397 = vmatprep.subr.mxu1 %v2227_v33  ;;  %4928 = vmatprep.subr.mxu0 %v2240_v35 }
 0x30e   : > { %4398 = vmatpush3.msra.mxu1 %v2211_v34  ;;  %4929 = vmatpush3.msra.mxu0 %v2240_v35 }
 0x30f   : > { %4399 = vmatprep.subr.mxu1 %v2226_v28  ;;  %4930 = vmatprep.subr.mxu0 %v2239_v39 }
 0x310   : > { %4400 = vmatpush3.msra.mxu1 %v2210_v38  ;;  %4931 = vmatpush3.msra.mxu0 %v2239_v39 }
 0x311   : > { %4401 = vmatprep.subr.mxu1 %v2225_v52  ;;  %4944 = vmatprep.subr.mxu0 %v2583_v60 }
 0x312   : > { %4402 = vmatpush3.msra.mxu1 %v2209_v53 }
 0x313   : > { %4403 = vmatprep.subr.mxu1 %v2224_v54 }
 0x314   : > { %4404 = vmatpush3.msra.mxu1 %v2208_v55  ;;  %v2550_v55 = vld [vmem:[#allocation14 + $0x70] sm:$0xff] }
 0x315   : > { %4405 = vmatprep.subr.mxu1 %v2223_v57 }
 0x316   : > { %4406 = vmatpush3.msra.mxu1 %v2207_v58  ;;  %v2565_v58 = vld [vmem:[#allocation14 + $0xe8] sm:$0xff] }
 0x317   : > { %4455 = vmatprep.subr.mxu1 %v2567_v59 }
 0x3a7   : > { %v4890_v63 = vpop.f32.mrf.mxu0 }
 0x3a9   : > { %v2112_v6 = vpop.f32.mrf.mxu0 }
 0x3ab   : > { %v4893_v13 = vpop.f32.mrf.mxu0 }
 0x3ad   : > { %v2122_v22 = vpop.f32.mrf.mxu0 }
 0x3af   : > { %v4327_v61 = vpop.f32.mrf.mxu1  ;;  %v4896_v41 = vpop.f32.mrf.mxu0 }
 0x3b1   : > { %v4328_v0 = vpop.f32.mrf.mxu1  ;;  %v2132_v35 = vpop.f32.mrf.mxu0 }
 0x3b2   : > { %v4329_v2 = vadd.f32 %v4328_v0, %v4327_v61 }
 0x3b3   : > { %v4330_v3 = vpop.f32.mrf.mxu1  ;;  %v4899_v61 = vpop.f32.mrf.mxu0 }
 0x3b4   : > { %v2008_v4 = vadd.f32 %v4329_v2, %v6511_v1 }
 0x3b5   : > { %v4331_v7 = vpop.f32.mrf.mxu1 }
 0x3b6   : > { %v2113_v8 = vadd.f32 %v2112_v6, %v2008_v4  ;;  %v4332_v9 = vadd.f32 %v4331_v7, %v4330_v3  ;;  %v2549_v7 = vld [vmem:[#allocation14 + $0x68] sm:$0xff] }
 0x3b7   : > { %v4333_v10 = vpop.f32.mrf.mxu1 }
 0x3b8   : > { %vm2151_vm0 = vcmp.gt.f32.partialorder %v2113_v8, 0.0  ;;  %v2159_v11 = vmul.f32 0.01, %v2113_v8  ;;  %v2013_v12 = vadd.f32 %v4332_v9, %v6511_v1  ;;  %v2564_v9 = vld [vmem:[#allocation14 + $0xe0] sm:$0xff] }
 0x3b9   : > { %v4334_v14 = vpop.f32.mrf.mxu1 }
 0x3ba   : > { %v2167_v15 = vsel %vm2151_vm0, %v2113_v8, %v2159_v11  ;;  %v2118_v16 = vadd.f32 %v4890_v63, %v2013_v12  ;;  %v4335_v18 = vadd.f32 %v4334_v14, %v4333_v10  ;;  %v2142_v12 = vpop.f32.mrf.mxu0 }
 0x3bb   : > { %2175 = vst [vmem:[#allocation2 + $0x8] sm:$0xff] %v2167_v15  ;;  %v4336_v19 = vpop.f32.mrf.mxu1  ;;  %4932 = vmatprep.mubr.f32.mxu0 %v2167_v15 }
 0x3bc   : > { %vm2152_vm1 = vcmp.gt.f32.partialorder %v2118_v16, 0.0  ;;  %v2160_v20 = vmul.f32 0.01, %v2118_v16  ;;  %v2018_v21 = vadd.f32 %v4335_v18, %v6511_v1 }
 0x3bd   : > { %v4337_v23 = vpop.f32.mrf.mxu1 }
 0x3be   : > { %v2168_v25 = vsel %vm2152_vm1, %v2118_v16, %v2160_v20  ;;  %v2123_v26 = vadd.f32 %v2122_v22, %v2018_v21  ;;  %v4338_v27 = vadd.f32 %v4337_v23, %v4336_v19  ;;  %v2548_v20 = vld [vmem:[#allocation14 + $0x60] sm:$0xff]  ;;  %v2563_v21 = vld [vmem:[#allocation14 + $0xd8] sm:$0xff] }
 0x3bf   : > { %2176 = vst [vmem:[#allocation2 + $0x10] sm:$0xff] %v2168_v25  ;;  %v4339_v5 = vpop.f32.mrf.mxu1  ;;  %4933 = vmatmul.mubr.f32.vlgmr.msra.gmra.mxu0 %v2168_v25 }
 0x3c0   : > { %vm2153_vm2 = vcmp.gt.f32.partialorder %v2123_v26, 0.0  ;;  %v2161_v31 = vmul.f32 0.01, %v2123_v26  ;;  %v2023_v40 = vadd.f32 %v4338_v27, %v6511_v1  ;;  %4945 = vmatpush3.msra.mxu0 %v2583_v60 }
 0x3c1   : > { %v4340_v42 = vpop.f32.mrf.mxu1  ;;  %4946 = vmatprep.subr.mxu0 %v2582_v29 }
 0x3c2   : > { %v2169_v44 = vsel %vm2153_vm2, %v2123_v26, %v2161_v31  ;;  %v2128_v45 = vadd.f32 %v4893_v13, %v2023_v40  ;;  %v4341_v47 = vadd.f32 %v4340_v42, %v4339_v5  ;;  %v2191_v48 = vld [vmem:[#allocation2 + $0x6] sm:$0xff]  ;;  %4947 = vmatpush3.msra.mxu0 %v2582_v29  ;;  %v2547_v5 = vld [vmem:[#allocation14 + $0x58] sm:$0xff] }
 0x3c3   : > { %v2183_v49 = vld [vmem:[#allocation2 + $0x4] sm:$0xff]  ;;  %2177 = vst [vmem:[#allocation2 + $0x20] sm:$0xff] %v2169_v44  ;;  %v4342_v30 = vpop.f32.mrf.mxu1  ;;  %2326 = vmatprep.mubr.f32.mxu1 %v2191_v48  ;;  %4935 = vmatprep.mubr.f32.mxu0 %v2169_v44  ;;  %v2579_v48 = vld [vmem:[#allocation14 + $0x158] sm:$0xff] }
 0x3c4   : > { %vm2154_vm3 = vcmp.gt.f32.partialorder %v2128_v45, 0.0  ;;  %v2162_v33 = vmul.f32 0.01, %v2128_v45  ;;  %v2028_v34 = vadd.f32 %v4341_v47, %v6511_v1  ;;  %2327 = vmatmul.mubr.f32.vlgmr.msra.gmra.mxu1 %v2183_v49  ;;  %4948 = vmatprep.subr.mxu0 %v2581_v43  ;;  %v2580_v47 = vld [vmem:[#allocation14 + $0x160] sm:$0xff]  ;;  %v2578_v49 = vld [vmem:[#allocation14 + $0x150] sm:$0xff] }
 0x3c5   : > { %v4343_v28 = vpop.f32.mrf.mxu1  ;;  %4456 = vmatpush3.msra.mxu1 %v2551_v50  ;;  %4949 = vmatpush3.msra.mxu0 %v2581_v43  ;;  %v2577_v50 = vld [vmem:[#allocation14 + $0x148] sm:$0xff] }
 0x3c6   : > { %v2170_v38 = vsel %vm2154_vm3, %v2128_v45, %v2162_v33  ;;  %v2133_v39 = vadd.f32 %v2132_v35, %v2028_v34  ;;  %v4344_v52 = vadd.f32 %v4343_v28, %v4342_v30  ;;  %v2192_v53 = vld [vmem:[#allocation2 + $0xe] sm:$0xff]  ;;  %4457 = vmatprep.subr.mxu1 %v2566_v32  ;;  %4950 = vmatprep.subr.mxu0 %v2580_v47  ;;  %v2576_v33 = vld [vmem:[#allocation14 + $0x140] sm:$0xff]  ;;  %v2575_v28 = vld [vmem:[#allocation14 + $0x138] sm:$0xff] }
 0x3c7   : > { %v2184_v54 = vld [vmem:[#allocation2 + $0xc] sm:$0xff]  ;;  %2178 = vst [vmem:[#allocation2 + $0x28] sm:$0xff] %v2170_v38  ;;  %v4345_v57 = vpop.f32.mrf.mxu1  ;;  %2331 = vmatprep.mubr.f32.mxu1 %v2192_v53  ;;  %4936 = vmatmul.mubr.f32.gmra.mxu0 %v2170_v38  ;;  %v2560_v38 = vld [vmem:[#allocation14 + $0xc0] sm:$0xff] }
 0x3c8   : > { %vm2155_vm4 = vcmp.gt.f32.partialorder %v2133_v39, 0.0  ;;  %v2163_v59 = vmul.f32 0.01, %v2133_v39  ;;  %v2033_v60 = vadd.f32 %v4344_v52, %v6511_v1  ;;  %2332 = vmatmul.mubr.f32.gmra.mxu1 %v2184_v54  ;;  %4951 = vmatpush3.msra.mxu0 %v2580_v47  ;;  %v2562_v30 = vld [vmem:[#allocation14 + $0xd0] sm:$0xff]  ;;  %v2561_v34 = vld [vmem:[#allocation14 + $0xc8] sm:$0xff]  ;;  %v2544_v52 = vld [vmem:[#allocation14 + $0x40] sm:$0xff] }
 0x3c9   : > { %v4346_v63 = vpop.f32.mrf.mxu1  ;;  %4458 = vmatpush3.msra.mxu1 %v2550_v55  ;;  %4952 = vmatprep.subr.mxu0 %v2579_v48  ;;  %v2546_v32 = vld [vmem:[#allocation14 + $0x50] sm:$0xff]  ;;  %v2545_v35 = vld [vmem:[#allocation14 + $0x48] sm:$0xff]  ;;  %v2559_v54 = vld [vmem:[#allocation14 + $0xb8] sm:$0xff] }
 0x3ca   : > { %v2171_v0 = vsel %vm2155_vm4, %v2133_v39, %v2163_v59  ;;  %v2138_v2 = vadd.f32 %v4896_v41, %v2033_v60  ;;  %v4347_v3 = vadd.f32 %v4346_v63, %v4345_v57  ;;  %v2193_v4 = vld [vmem:[#allocation2 + $0x1e] sm:$0xff]  ;;  %4459 = vmatprep.subr.mxu1 %v2565_v58  ;;  %4953 = vmatpush3.msra.mxu0 %v2579_v48  ;;  %v2574_v39 = vld [vmem:[#allocation14 + $0x130] sm:$0xff]  ;;  %v2573_v53 = vld [vmem:[#allocation14 + $0x128] sm:$0xff] }
 0x3cb   : > { %v2185_v6 = vld [vmem:[#allocation2 + $0x1c] sm:$0xff]  ;;  %2179 = vst [vmem:[#allocation2 + $0x38] sm:$0xff] %v2171_v0  ;;  %v4348_v8 = vpop.f32.mrf.mxu1  ;;  %2336 = vmatprep.mubr.f32.mxu1 %v2193_v4  ;;  %4938 = vmatprep.mubr.f32.mxu0 %v2171_v0  ;;  %v2558_v58 = vld [vmem:[#allocation14 + $0xb0] sm:$0xff]  ;;  %v2541_v63 = vld [vmem:[#allocation14 + $0x28] sm:$0xff] }
 0x3cc   : > { %vm2156_vm5 = vcmp.gt.f32.partialorder %v2138_v2, 0.0  ;;  %v2164_v10 = vmul.f32 0.01, %v2138_v2  ;;  %v2038_v11 = vadd.f32 %v4347_v3, %v6511_v1  ;;  %2337 = vmatmul.mubr.f32.gmra.mxu1 %v2185_v6  ;;  %4954 = vmatprep.subr.mxu0 %v2578_v49  ;;  %v2543_v55 = vld [vmem:[#allocation14 + $0x38] sm:$0xff]  ;;  %v2572_v57 = vld [vmem:[#allocation14 + $0x120] sm:$0xff]  ;;  %v2542_v59 = vld [vmem:[#allocation14 + $0x30] sm:$0xff] }
 0x3cd   : > { %v4349_v13 = vpop.f32.mrf.mxu1  ;;  %4460 = vmatpush3.msra.mxu1 %v2549_v7  ;;  %4955 = vmatpush3.msra.mxu0 %v2578_v49  ;;  %v2571_v60 = vld [vmem:[#allocation14 + $0x118] sm:$0xff]  ;;  %v2570_v0 = vld [vmem:[#allocation14 + $0x110] sm:$0xff]  ;;  %v2540_v3 = vld [vmem:[#allocation14 + $0x20] sm:$0xff] }
 0x3ce   : > { %v2172_v14 = vsel %vm2156_vm5, %v2138_v2, %v2164_v10  ;;  %v2143_v15 = vadd.f32 %v2142_v12, %v2038_v11  ;;  %v4350_v16 = vadd.f32 %v4349_v13, %v4348_v8  ;;  %v2194_v18 = vld [vmem:[#allocation2 + $0x26] sm:$0xff]  ;;  %4461 = vmatprep.subr.mxu1 %v2564_v9  ;;  %4956 = vmatprep.subr.mxu0 %v2577_v50  ;;  %v2555_v6 = vld [vmem:[#allocation14 + $0x98] sm:$0xff]  ;;  %v2554_v9 = vld [vmem:[#allocation14 + $0x90] sm:$0xff] }
 0x3cf   : > { %v2186_v19 = vld [vmem:[#allocation2 + $0x24] sm:$0xff]  ;;  %2180 = vst [vmem:[#allocation2 + $0x40] sm:$0xff] %v2172_v14  ;;  %2341 = vmatprep.mubr.f32.mxu1 %v2194_v18  ;;  %4939 = vmatmul.mubr.f32.gmra.mxu0 %v2172_v14  ;;  %v2539_v7 = vld [vmem:[#allocation14 + $0x18] sm:$0xff]  ;;  %v2538_v10 = vld [vmem:[#allocation14 + $0x10] sm:$0xff] }
 0x3d0   : > { %vm2157_vm6 = vcmp.gt.f32.partialorder %v2143_v15, 0.0  ;;  %v2165_v22 = vmul.f32 0.01, %v2143_v15  ;;  %v2043_v23 = vadd.f32 %v4350_v16, %v6511_v1  ;;  %2342 = vmatmul.mubr.f32.gmra.mxu1 %v2186_v19  ;;  %4957 = vmatpush3.msra.mxu0 %v2577_v50  ;;  %v2556_v2 = vld [vmem:[#allocation14 + $0xa0] sm:$0xff]  ;;  %v2569_v4 = vld [vmem:[#allocation14 + $0x108] sm:$0xff]  ;;  %v2904_v16 = vld [vmem:[#allocation15 + $0x178] sm:$0xff] }
 0x3d1   : > { %4462 = vmatpush3.msra.mxu1 %v2548_v20  ;;  %4958 = vmatprep.subr.mxu0 %v2576_v33  ;;  %v2568_v8 = vld [vmem:[#allocation14 + $0x100] sm:$0xff]  ;;  %v2553_v11 = vld [vmem:[#allocation14 + $0x88] sm:$0xff] }
 0x3d2   : > { %v2173_v25 = vsel %vm2157_vm6, %v2143_v15, %v2165_v22  ;;  %v2148_v26 = vadd.f32 %v4899_v61, %v2043_v23  ;;  %v2195_v27 = vld [vmem:[#allocation2 + $0x36] sm:$0xff]  ;;  %4463 = vmatprep.subr.mxu1 %v2563_v21  ;;  %4959 = vmatpush3.msra.mxu0 %v2576_v33  ;;  %v2557_v61 = vld [vmem:[#allocation14 + $0xa8] sm:$0xff]  ;;  %v2552_v13 = vld [vmem:[#allocation14 + $0x80] sm:$0xff] }
 0x3d3   : > { %v2187_v29 = vld [vmem:[#allocation2 + $0x34] sm:$0xff]  ;;  %2181 = vst [vmem:[#allocation2 + $0x50] sm:$0xff] %v2173_v25  ;;  %2346 = vmatprep.mubr.f32.mxu1 %v2195_v27  ;;  %4941 = vmatprep.mubr.f32.mxu0 %v2173_v25  ;;  %v2537_v12 = vld [vmem:[#allocation14 + $0x8] sm:$0xff]  ;;  %v2536_v14 = vld [vmem:[#allocation14] sm:$0xff] }
 0x3d4   : > { %vm2158_vm7 = vcmp.gt.f32.partialorder %v2148_v26, 0.0  ;;  %v2166_v31 = vmul.f32 0.01, %v2148_v26  ;;  %2347 = vmatmul.mubr.f32.gmra.mxu1 %v2187_v29  ;;  %4960 = vmatprep.subr.mxu0 %v2575_v28  ;;  %v2888_v15 = vld [vmem:[#allocation15 + $0xf8] sm:$0xff]  ;;  %v6524_v21 = vld [vmem:[%s6915_s15] ss:$0 sm:$0xff] }
 0x3d5   : > { %4464 = vmatpush3.msra.mxu1 %v2547_v5  ;;  %4961 = vmatpush3.msra.mxu0 %v2575_v28  ;;  %s5805_s15 = scalar_lea.vmem %s3817_s13, 64 }
 0x3d6   : > { %v2174_v40 = vsel %vm2158_vm7, %v2148_v26, %v2166_v31  ;;  %v2196_v41 = vld [vmem:[#allocation2 + $0x3e] sm:$0xff]  ;;  %4465 = vmatprep.subr.mxu1 %v2562_v30  ;;  %4962 = vmatprep.subr.mxu0 %v2574_v39  ;;  %p5806_p4 = scmp.ne.s32.totalorder %s3817_s13, %s5805_s15 }
 0x3d7   : > { %v2188_v42 = vld [vmem:[#allocation2 + $0x3c] sm:$0xff]  ;;  %2182 = vst [vmem:[#allocation2 + $0x58] sm:$0xff] %v2174_v40  ;;  %2351 = vmatprep.mubr.f32.mxu1 %v2196_v41  ;;  %4942 = vmatmul.mubr.f32.gmra.mxu0 %v2174_v40 }
 0x3d8   : > { %2352 = vmatmul.mubr.f32.gmra.mxu1 %v2188_v42  ;;  %4963 = vmatpush3.msra.mxu0 %v2574_v39  ;;  %p5807_p6 = pnand %p5806_p4, %p6921_p2 }
 0x3d9   : > { %4466 = vmatpush3.msra.mxu1 %v2546_v32  ;;  %4964 = vmatprep.subr.mxu0 %v2573_v53 }
 0x3da   : > { %v2197_v1 = vld [vmem:[#allocation2 + $0x4e] sm:$0xff]  ;;  %4467 = vmatprep.subr.mxu1 %v2561_v34  ;;  %4965 = vmatpush3.msra.mxu0 %v2573_v53  ;;  %p5808_p8 = pneg %p5807_p6 }
 0x3db   : > { %v2189_v43 = vld [vmem:[#allocation2 + $0x4c] sm:$0xff]  ;;  %2356 = vmatprep.mubr.f32.mxu1 %v2197_v1  ;;  %4468 = vmatpush3.msra.mxu1 %v2545_v35 }
 0x3dc   : > { %2357 = vmatmul.mubr.f32.gmra.mxu1 %v2189_v43  ;;  %4469 = vmatprep.subr.mxu1 %v2560_v38 }
 0x3dd   : > { %4470 = vmatpush3.msra.mxu1 %v2544_v52  ;;  %4966 = vmatprep.subr.mxu0 %v2572_v57  ;;  %v2903_v52 = vld [vmem:[#allocation15 + $0x170] sm:$0xff] }
 0x3de   : > { %v2198_v44 = vld [vmem:[#allocation2 + $0x56] sm:$0xff]  ;;  %4471 = vmatprep.subr.mxu1 %v2559_v54  ;;  %4967 = vmatpush3.msra.mxu0 %v2572_v57 }
 0x3df   : > { %v2190_v45 = vld [vmem:[#allocation2 + $0x54] sm:$0xff]  ;;  %2361 = vmatprep.mubr.f32.mxu1 %v2198_v44  ;;  %4472 = vmatpush3.msra.mxu1 %v2543_v55 }
 0x3e0   : > { %2362 = vmatmul.mubr.f32.gmra.mxu1 %v2190_v45  ;;  %4473 = vmatprep.subr.mxu1 %v2558_v58 }
 0x3e1   : > { %4474 = vmatpush3.msra.mxu1 %v2542_v59  ;;  %4968 = vmatprep.subr.mxu0 %v2571_v60 }
 0x3e2   : > { %4475 = vmatprep.subr.mxu1 %v2557_v61  ;;  %4969 = vmatpush3.msra.mxu0 %v2571_v60  ;;  %v2902_v60 = vld [vmem:[#allocation15 + $0x168] sm:$0xff] }
 0x3e3   : > { %4476 = vmatpush3.msra.mxu1 %v2541_v63  ;;  %4970 = vmatprep.subr.mxu0 %v2570_v0 }
 0x3e4   : > { %4477 = vmatprep.subr.mxu1 %v2556_v2  ;;  %4971 = vmatpush3.msra.mxu0 %v2570_v0  ;;  %v2872_v2 = vld [vmem:[#allocation15 + $0x78] sm:$0xff] }
 0x3e5   : > { %4478 = vmatpush3.msra.mxu1 %v2540_v3  ;;  %4972 = vmatprep.subr.mxu0 %v2569_v4 }
 0x3e6   : > { %4479 = vmatprep.subr.mxu1 %v2555_v6  ;;  %4973 = vmatpush3.msra.mxu0 %v2569_v4  ;;  %v2887_v6 = vld [vmem:[#allocation15 + $0xf0] sm:$0xff] }
 0x3e7   : > { %4480 = vmatpush3.msra.mxu1 %v2539_v7  ;;  %4974 = vmatprep.subr.mxu0 %v2568_v8 }
 0x3e8   : > { %4481 = vmatprep.subr.mxu1 %v2554_v9  ;;  %4975 = vmatpush3.msra.mxu0 %v2568_v8 }
 0x3e9   : > { %4482 = vmatpush3.msra.mxu1 %v2538_v10  ;;  %4988 = vmatprep.subr.mxu0 %v2904_v16  ;;  %v6546_v10 = vld [vmem:[#allocation2] sm:$0xff] }
 0x3ea   : > { %4483 = vmatprep.subr.mxu1 %v2553_v11 }
 0x3eb   : > { %4484 = vmatpush3.msra.mxu1 %v2537_v12 }
 0x3ec   : > { %4485 = vmatprep.subr.mxu1 %v2552_v13 }
 0x3ed   : > { %4486 = vmatpush3.msra.mxu1 %v2536_v14 }
 0x3ee   : > { %4535 = vmatprep.subr.mxu1 %v2888_v15 }
 0x47f   : > { %v4934_v20 = vpop.f32.mrf.mxu0 }
 0x481   : > { %v2433_v26 = vpop.f32.mrf.mxu0 }
 0x484   : > { %v4407_v18 = vpop.f32.mrf.mxu1 }
 0x486   : > { %v4408_v19 = vpop.f32.mrf.mxu1 }
 0x487   : > { %v4409_v22 = vadd.f32 %v4408_v19, %v4407_v18  ;;  %v4937_v1 = vpop.f32.mrf.mxu0 }
 0x488   : > { %v4410_v23 = vpop.f32.mrf.mxu1 }
 0x489   : > { %v2329_v25 = vadd.f32 %v4409_v22, %v6524_v21  ;;  %v2443_v30 = vpop.f32.mrf.mxu0 }
 0x48a   : > { %v4411_v27 = vpop.f32.mrf.mxu1 }
 0x48b   : > { %v2434_v29 = vadd.f32 %v2433_v26, %v2329_v25  ;;  %v4412_v5 = vadd.f32 %v4411_v27, %v4410_v23 }
 0x48c   : > { %v4413_v31 = vpop.f32.mrf.mxu1 }
 0x48d   : > { %vm2472_vm8 = vcmp.gt.f32.partialorder %v2434_v29, 0.0  ;;  %v2480_v40 = vmul.f32 0.01, %v2434_v29  ;;  %v2334_v41 = vadd.f32 %v4412_v5, %v6524_v21 }
 0x48e   : > { %v4414_v42 = vpop.f32.mrf.mxu1 }
 0x48f   : > { %v2488_v43 = vsel %vm2472_vm8, %v2434_v29, %v2480_v40  ;;  %v2439_v44 = vadd.f32 %v4934_v20, %v2334_v41  ;;  %v4415_v45 = vadd.f32 %v4414_v42, %v4413_v31  ;;  %v4940_v54 = vpop.f32.mrf.mxu0  ;;  %v2870_v31 = vld [vmem:[#allocation15 + $0x68] sm:$0xff]  ;;  %v2885_v42 = vld [vmem:[#allocation15 + $0xe0] sm:$0xff]  ;;  %vm5946_vm8 = vmmov 0  }
 0x490   : > { %v6529_v47 = vadd.f32 %v2488_v43, %v6469_v24  ;;  %v4416_v48 = vpop.f32.mrf.mxu1 }
 0x491   : > { %vm2473_vm9 = vcmp.gt.f32.partialorder %v2439_v44, 0.0  ;;  %v2481_v49 = vmul.f32 0.01, %v2439_v44  ;;  %v2339_v50 = vadd.f32 %v4415_v45, %v6524_v21  ;;  %v2453_v3 = vpop.f32.mrf.mxu0 }
 0x492   : > { %2504 = vst [vmem:[#allocation2 + $0x8] sm:$0xff] %v6529_v47  ;;  %v4417_v32 = vpop.f32.mrf.mxu1  ;;  %4976 = vmatprep.mubr.f32.mxu0 %v6529_v47 }
 0x493   : > { %v2489_v33 = vsel %vm2473_vm9, %v2439_v44, %v2481_v49  ;;  %v2444_v34 = vadd.f32 %v2443_v30, %v2339_v50  ;;  %v4418_v35 = vadd.f32 %v4417_v32, %v4416_v48  ;;  %v2869_v50 = vld [vmem:[#allocation15 + $0x60] sm:$0xff]  ;;  %v2884_v30 = vld [vmem:[#allocation15 + $0xd8] sm:$0xff] }
 0x494   : > { %v6535_v28 = vadd.f32 %v2489_v33, %v6465_v17  ;;  %v4419_v38 = vpop.f32.mrf.mxu1 }
 0x495   : > { %vm2474_vm10 = vcmp.gt.f32.partialorder %v2444_v34, 0.0  ;;  %v2482_v24 = vmul.f32 0.01, %v2444_v34  ;;  %v2344_v39 = vadd.f32 %v4418_v35, %v6524_v21  ;;  %v2868_v35 = vld [vmem:[#allocation15 + $0x58] sm:$0xff] }
 0x496   : > { %2505 = vst [vmem:[#allocation2 + $0x10] sm:$0xff] %v6535_v28  ;;  %v4420_v53 = vpop.f32.mrf.mxu1  ;;  %4977 = vmatmul.mubr.f32.vlgmr.msra.gmra.mxu0 %v6535_v28 }
 0x497   : > { %v2490_v55 = vsel %vm2474_vm10, %v2444_v34, %v2482_v24  ;;  %v2449_v57 = vadd.f32 %v4937_v1, %v2344_v39  ;;  %v4421_v58 = vadd.f32 %v4420_v53, %v4419_v38  ;;  %4989 = vmatpush3.msra.mxu0 %v2904_v16  ;;  %v2871_v16 = vld [vmem:[#allocation15 + $0x70] sm:$0xff]  ;;  %v4943_v19 = vpop.f32.mrf.mxu0 }
 0x498   : > { %v6541_v59 = vadd.f32 %v2490_v55, %v6480_v46  ;;  %v4422_v17 = vpop.f32.mrf.mxu1  ;;  %4990 = vmatprep.subr.mxu0 %v2903_v52  ;;  %v2901_v46 = vld [vmem:[#allocation15 + $0x160] sm:$0xff]  ;;  %v2883_v38 = vld [vmem:[#allocation15 + $0xd0] sm:$0xff] }
 0x499   : > { %vm2475_vm11 = vcmp.gt.f32.partialorder %v2449_v57, 0.0  ;;  %v2483_v61 = vmul.f32 0.01, %v2449_v57  ;;  %v2349_v63 = vadd.f32 %v4421_v58, %v6524_v21  ;;  %v2520_v0 = vld [vmem:[#allocation2 + $0x4] sm:$0xff]  ;;  %4991 = vmatpush3.msra.mxu0 %v2903_v52  ;;  %v2463_v40 = vpop.f32.mrf.mxu0  ;;  %v2867_v52 = vld [vmem:[#allocation15 + $0x50] sm:$0xff] }
 0x49a   : > { %2506 = vst [vmem:[#allocation2 + $0x20] sm:$0xff] %v6541_v59  ;;  %v4423_v4 = vpop.f32.mrf.mxu1  ;;  %2655 = vmatprep.mubr.f32.mxu1 %v2520_v0  ;;  %4979 = vmatprep.mubr.f32.mxu0 %v6541_v59  ;;  %v2899_v55 = vld [vmem:[#allocation15 + $0x150] sm:$0xff]  ;;  %v2897_v58 = vld [vmem:[#allocation15 + $0x140] sm:$0xff] }
 0x49b   : > { %v2491_v7 = vsel %vm2475_vm11, %v2449_v57, %v2483_v61  ;;  %v2454_v8 = vadd.f32 %v2453_v3, %v2349_v63  ;;  %v4424_v9 = vadd.f32 %v4423_v4, %v4422_v17  ;;  %2656 = vmatmul.mubr.f32.vlgmr.msra.gmra.mxu1 %v6546_v10  ;;  %4992 = vmatprep.subr.mxu0 %v2902_v60  ;;  %v2898_v57 = vld [vmem:[#allocation15 + $0x148] sm:$0xff]  ;;  %v2896_v61 = vld [vmem:[#allocation15 + $0x138] sm:$0xff]  ;;  %v2881_v63 = vld [vmem:[#allocation15 + $0xc0] sm:$0xff] }
 0x49c   : > { %v6550_v11 = vadd.f32 %v2491_v7, %v6473_v37  ;;  %v4425_v12 = vpop.f32.mrf.mxu1  ;;  %4536 = vmatpush3.msra.mxu1 %v2872_v2  ;;  %4993 = vmatpush3.msra.mxu0 %v2902_v60  ;;  %v2886_v37 = vld [vmem:[#allocation15 + $0xe8] sm:$0xff]  ;;  %v2865_v0 = vld [vmem:[#allocation15 + $0x40] sm:$0xff]  ;;  %v2895_v2 = vld [vmem:[#allocation15 + $0x130] sm:$0xff] }
 0x49d   : > { %vm2476_vm12 = vcmp.gt.f32.partialorder %v2454_v8, 0.0  ;;  %v2484_v13 = vmul.f32 0.01, %v2454_v8  ;;  %v2354_v14 = vadd.f32 %v4424_v9, %v6524_v21  ;;  %v2521_v15 = vld [vmem:[#allocation2 + $0xc] sm:$0xff]  ;;  %4537 = vmatprep.subr.mxu1 %v2887_v6  ;;  %4994 = vmatprep.subr.mxu0 %v2901_v46  ;;  %v2880_v3 = vld [vmem:[#allocation15 + $0xb8] sm:$0xff] }
 0x49e   : > { %2507 = vst [vmem:[#allocation2 + $0x28] sm:$0xff] %v6550_v11  ;;  %v4426_v18 = vpop.f32.mrf.mxu1  ;;  %2660 = vmatprep.mubr.f32.mxu1 %v2521_v15  ;;  %4980 = vmatmul.mubr.f32.gmra.mxu0 %v6550_v11  ;;  %v2882_v17 = vld [vmem:[#allocation15 + $0xc8] sm:$0xff]  ;;  %v2864_v6 = vld [vmem:[#allocation15 + $0x38] sm:$0xff]  ;;  %v2879_v7 = vld [vmem:[#allocation15 + $0xb0] sm:$0xff] }
 0x49f   : > { %v2492_v20 = vsel %vm2476_vm12, %v2454_v8, %v2484_v13  ;;  %v2459_v22 = vadd.f32 %v4940_v54, %v2354_v14  ;;  %v4427_v23 = vadd.f32 %v4426_v18, %v4425_v12  ;;  %2661 = vmatmul.mubr.f32.gmra.mxu1 %v6529_v47  ;;  %4995 = vmatpush3.msra.mxu0 %v2901_v46  ;;  %v2866_v60 = vld [vmem:[#allocation15 + $0x48] sm:$0xff]  ;;  %v2893_v46 = vld [vmem:[#allocation15 + $0x120] sm:$0xff]  ;;  %v2863_v8 = vld [vmem:[#allocation15 + $0x30] sm:$0xff] }
 0x4a0   : > { %v6557_v25 = vadd.f32 %v2492_v20, %v6492_v36  ;;  %v4428_v26 = vpop.f32.mrf.mxu1  ;;  %4538 = vmatpush3.msra.mxu1 %v2871_v16  ;;  %v2894_v4 = vld [vmem:[#allocation15 + $0x128] sm:$0xff]  ;;  %v2892_v9 = vld [vmem:[#allocation15 + $0x118] sm:$0xff]  ;;  %v2891_v14 = vld [vmem:[#allocation15 + $0x110] sm:$0xff] }
 0x4a1   : > { %vm2477_vm13 = vcmp.gt.f32.partialorder %v2459_v22, 0.0  ;;  %v2485_v27 = vmul.f32 0.01, %v2459_v22  ;;  %v2359_v29 = vadd.f32 %v4427_v23, %v6524_v21  ;;  %v2522_v5 = vld [vmem:[#allocation2 + $0x1c] sm:$0xff]  ;;  %4539 = vmatprep.subr.mxu1 %v2886_v37  ;;  %v2878_v12 = vld [vmem:[#allocation15 + $0xa8] sm:$0xff]  ;;  %v2859_v23 = vld [vmem:[#allocation15 + $0x10] sm:$0xff] }
 0x4a2   : > { %2508 = vst [vmem:[#allocation2 + $0x38] sm:$0xff] %v6557_v25  ;;  %v4429_v41 = vpop.f32.mrf.mxu1  ;;  %2665 = vmatprep.mubr.f32.mxu1 %v2522_v5  ;;  %4982 = vmatprep.mubr.f32.mxu0 %v6557_v25  ;;  %v2862_v13 = vld [vmem:[#allocation15 + $0x28] sm:$0xff]  ;;  %v2877_v15 = vld [vmem:[#allocation15 + $0xa0] sm:$0xff]  ;;  %v2860_v37 = vld [vmem:[#allocation15 + $0x18] sm:$0xff] }
 0x4a3   : > { %v2493_v1 = vsel %vm2477_vm13, %v2459_v22, %v2485_v27  ;;  %v2464_v36 = vadd.f32 %v2463_v40, %v2359_v29  ;;  %v4430_v43 = vadd.f32 %v4429_v41, %v4428_v26  ;;  %2666 = vmatmul.mubr.f32.gmra.mxu1 %v6546_v10  ;;  %v2861_v16 = vld [vmem:[#allocation15 + $0x20] sm:$0xff]  ;;  %v2890_v18 = vld [vmem:[#allocation15 + $0x108] sm:$0xff]  ;;  %v2875_v22 = vld [vmem:[#allocation15 + $0x90] sm:$0xff] }
 0x4a4   : > { %v6564_v44 = vadd.f32 %v2493_v1, %v6485_v51  ;;  %4540 = vmatpush3.msra.mxu1 %v2870_v31  ;;  %v2889_v20 = vld [vmem:[#allocation15 + $0x100] sm:$0xff]  ;;  %v2874_v26 = vld [vmem:[#allocation15 + $0x88] sm:$0xff]  ;;  %v3161_v31 = vld [vmem:[#allocation17 + $0x78] sm:$0xff] }
 0x4a5   : > { %vm2478_vm14 = vcmp.gt.f32.partialorder %v2464_v36, 0.0  ;;  %v2486_v45 = vmul.f32 0.01, %v2464_v36  ;;  %v2364_v48 = vadd.f32 %v4430_v43, %v6524_v21  ;;  %v2523_v49 = vld [vmem:[#allocation2 + $0x24] sm:$0xff]  ;;  %4541 = vmatprep.subr.mxu1 %v2885_v42  ;;  %v6588_v1 = vld [vmem:[%s6916_s3] ss:$0 sm:$0xff] }
 0x4a6   : > { %2509 = vst [vmem:[#allocation2 + $0x40] sm:$0xff] %v6564_v44  ;;  %2670 = vmatprep.mubr.f32.mxu1 %v2523_v49  ;;  %4983 = vmatmul.mubr.f32.gmra.mxu0 %v6564_v44  ;;  %v2858_v27 = vld [vmem:[#allocation15 + $0x8] sm:$0xff]  ;;  %v2873_v29 = vld [vmem:[#allocation15 + $0x80] sm:$0xff]  ;;  %s5811_s3 = scalar_lea.vmem %s5810_s0, 128 }
 0x4a7   : > { %v2494_v32 = vsel %vm2478_vm14, %v2464_v36, %v2486_v45  ;;  %v2469_v33 = vadd.f32 %v4943_v19, %v2364_v48  ;;  %2671 = vmatmul.mubr.f32.gmra.mxu1 %v6541_v59  ;;  %v2876_v19 = vld [vmem:[#allocation15 + $0x98] sm:$0xff]  ;;  %v2857_v5 = vld [vmem:[#allocation15] sm:$0xff]  ;;  %p5813_p11 = scmp.lt.s32.totalorder %s5811_s3, %s5805_s15 }
 0x4a8   : > { %v6571_v51 = vadd.f32 %v2494_v32, %v6503_v62  ;;  %4542 = vmatpush3.msra.mxu1 %v2869_v50 }
 0x4a9   : > { %vm2479_vm15 = vcmp.gt.f32.partialorder %v2469_v33, 0.0  ;;  %v2487_v34 = vmul.f32 0.01, %v2469_v33  ;;  %v2524_v21 = vld [vmem:[#allocation2 + $0x34] sm:$0xff]  ;;  %4543 = vmatprep.subr.mxu1 %v2884_v30  ;;  %p5814_p12 = por %p5813_p11, %p5812_p7 }
 0x4aa   : > { %2510 = vst [vmem:[#allocation2 + $0x50] sm:$0xff] %v6571_v51  ;;  %2675 = vmatprep.mubr.f32.mxu1 %v2524_v21  ;;  %4985 = vmatprep.mubr.f32.mxu0 %v6571_v51 }
 0x4ab   : > { %v2495_v24 = vsel %vm2479_vm15, %v2469_v33, %v2487_v34  ;;  %2676 = vmatmul.mubr.f32.gmra.mxu1 %v6546_v10  ;;  %p5815_p0 = pnand %p5814_p12, %p5808_p8 }
 0x4ac   : > { %v6577_v39 = vadd.f32 %v2495_v24, %v6496_v56  ;;  %4544 = vmatpush3.msra.mxu1 %v2868_v35  ;;  %v2900_v56 = vld [vmem:[#allocation15 + $0x158] sm:$0xff] }
 0x4ad   : > { %v2525_v62 = vld [vmem:[#allocation2 + $0x3c] sm:$0xff]  ;;  %4545 = vmatprep.subr.mxu1 %v2883_v38  ;;  %4996 = vmatprep.subr.mxu0 %v2900_v56 }
 0x4ae   : > { %2511 = vst [vmem:[#allocation2 + $0x58] sm:$0xff] %v6577_v39  ;;  %2680 = vmatprep.mubr.f32.mxu1 %v2525_v62  ;;  %4986 = vmatmul.mubr.f32.gmra.mxu0 %v6577_v39 }
 0x4af   : > { %2681 = vmatmul.mubr.f32.gmra.mxu1 %v6557_v25  ;;  %4997 = vmatpush3.msra.mxu0 %v2900_v56 }
 0x4b0   : > { %4546 = vmatpush3.msra.mxu1 %v2867_v52  ;;  %4998 = vmatprep.subr.mxu0 %v2899_v55 }
 0x4b1   : > { %v2526_v53 = vld [vmem:[#allocation2 + $0x4c] sm:$0xff]  ;;  %4999 = vmatpush3.msra.mxu0 %v2899_v55  ;;  %4547 = vmatprep.subr.mxu1 %v2882_v17 }
 0x4b2   : > { %2685 = vmatprep.mubr.f32.mxu1 %v2526_v53  ;;  %5000 = vmatprep.subr.mxu0 %v2898_v57 }
 0x4b3   : > { %2686 = vmatmul.mubr.f32.gmra.mxu1 %v6546_v10  ;;  %5001 = vmatpush3.msra.mxu0 %v2898_v57 }
 0x4b4   : > { %5002 = vmatprep.subr.mxu0 %v2897_v58  ;;  %4548 = vmatpush3.msra.mxu1 %v2866_v60 }
 0x4b5   : > { %v2527_v54 = vld [vmem:[#allocation2 + $0x54] sm:$0xff]  ;;  %5003 = vmatpush3.msra.mxu0 %v2897_v58  ;;  %4549 = vmatprep.subr.mxu1 %v2881_v63 }
 0x4b6   : > { %2690 = vmatprep.mubr.f32.mxu1 %v2527_v54  ;;  %5004 = vmatprep.subr.mxu0 %v2896_v61 }
 0x4b7   : > { %2691 = vmatmul.mubr.f32.gmra.mxu1 %v6571_v51  ;;  %5005 = vmatpush3.msra.mxu0 %v2896_v61 }
 0x4b8   : > { %5006 = vmatprep.subr.mxu0 %v2895_v2  ;;  %4550 = vmatpush3.msra.mxu1 %v2865_v0 }
 0x4b9   : > { %5007 = vmatpush3.msra.mxu0 %v2895_v2  ;;  %4551 = vmatprep.subr.mxu1 %v2880_v3 }
 0x4ba   : > { %5008 = vmatprep.subr.mxu0 %v2894_v4  ;;  %4552 = vmatpush3.msra.mxu1 %v2864_v6 }
 0x4bb   : > { %5009 = vmatpush3.msra.mxu0 %v2894_v4  ;;  %4553 = vmatprep.subr.mxu1 %v2879_v7 }
 0x4bc   : > { %5010 = vmatprep.subr.mxu0 %v2893_v46  ;;  %4554 = vmatpush3.msra.mxu1 %v2863_v8  ;;  %v3160_v8 = vld [vmem:[#allocation17 + $0x70] sm:$0xff] }
 0x4bd   : > { %5011 = vmatpush3.msra.mxu0 %v2893_v46  ;;  %4555 = vmatprep.subr.mxu1 %v2878_v12 }
 0x4be   : > { %5012 = vmatprep.subr.mxu0 %v2892_v9  ;;  %4556 = vmatpush3.msra.mxu1 %v2862_v13 }
 0x4bf   : > { %5013 = vmatpush3.msra.mxu0 %v2892_v9  ;;  %4557 = vmatprep.subr.mxu1 %v2877_v15  ;;  %v3159_v15 = vld [vmem:[#allocation17 + $0x68] sm:$0xff] }
 0x4c0   : > { %5014 = vmatprep.subr.mxu0 %v2891_v14  ;;  %4558 = vmatpush3.msra.mxu1 %v2861_v16 }
 0x4c1   : > { %5015 = vmatpush3.msra.mxu0 %v2891_v14  ;;  %4559 = vmatprep.subr.mxu1 %v2876_v19 }
 0x4c2   : > { %5016 = vmatprep.subr.mxu0 %v2890_v18  ;;  %4560 = vmatpush3.msra.mxu1 %v2860_v37 }
 0x4c3   : > { %5017 = vmatpush3.msra.mxu0 %v2890_v18  ;;  %4561 = vmatprep.subr.mxu1 %v2875_v22  ;;  %v3158_v22 = vld [vmem:[#allocation17 + $0x60] sm:$0xff] }
 0x4c4   : > { %5018 = vmatprep.subr.mxu0 %v2889_v20  ;;  %4562 = vmatpush3.msra.mxu1 %v2859_v23 }
 0x4c5   : > { %5019 = vmatpush3.msra.mxu0 %v2889_v20  ;;  %4563 = vmatprep.subr.mxu1 %v2874_v26 }
 0x4c6   : > { %5076 = vmatprep.subr.mxu0 %v6546_v10  ;;  %4564 = vmatpush3.msra.mxu1 %v2858_v27 }
 0x4c7   : > { %4565 = vmatprep.subr.mxu1 %v2873_v29 }
 0x4c8   : > { %4566 = vmatpush3.msra.mxu1 %v2857_v5  ;;  %v3157_v5 = vld [vmem:[#allocation17 + $0x58] sm:$0xff] }
 0x4c9   : > { %5032 = vmatprep.subr.mxu1 %v3161_v31 }
 0x556   : > { %v4978_v42 = vpop.f32.mrf.mxu0 }
 0x558   : > { %v2762_v48 = vpop.f32.mrf.mxu0 }
 0x55b   : > { %v4487_v40 = vpop.f32.mrf.mxu1 }
 0x55d   : > { %v4488_v41 = vpop.f32.mrf.mxu1 }
 0x55e   : > { %v4489_v36 = vadd.f32 %v4488_v41, %v4487_v40  ;;  %v4981_v35 = vpop.f32.mrf.mxu0 }
 0x55f   : > { %v4490_v43 = vpop.f32.mrf.mxu1 }
 0x560   : > { %v2658_v45 = vadd.f32 %v4489_v36, %v6588_v1  ;;  %v2772_v56 = vpop.f32.mrf.mxu0 }
 0x561   : > { %v4491_v49 = vpop.f32.mrf.mxu1 }
 0x562   : > { %v2763_v50 = vadd.f32 %v2762_v48, %v2658_v45  ;;  %v4492_v30 = vadd.f32 %v4491_v49, %v4490_v43  ;;  %v3156_v43 = vld [vmem:[#allocation17 + $0x50] sm:$0xff] }
 0x563   : > { %v4493_v32 = vpop.f32.mrf.mxu1 }
 0x564   : > { %vm2801_vm0 = vcmp.gt.f32.partialorder %v2763_v50, 0.0  ;;  %v2809_v33 = vmul.f32 0.01, %v2763_v50  ;;  %v2663_v34 = vadd.f32 %v4492_v30, %v6588_v1  ;;  %v3155_v30 = vld [vmem:[#allocation17 + $0x48] sm:$0xff] }
 0x565   : > { %v4494_v21 = vpop.f32.mrf.mxu1 }
 0x566   : > { %v2817_v38 = vsel %vm2801_vm0, %v2763_v50, %v2809_v33  ;;  %v2768_v24 = vadd.f32 %v4978_v42, %v2663_v34  ;;  %v4495_v62 = vadd.f32 %v4494_v21, %v4493_v32  ;;  %v4984_v2 = vpop.f32.mrf.mxu0 }
 0x567   : > { %2825 = vst [vmem:[#allocation2 + $0x8] sm:$0xff] %v2817_v38  ;;  %v4496_v52 = vpop.f32.mrf.mxu1  ;;  %5020 = vmatprep.mubr.f32.mxu0 %v2817_v38 }
 0x568   : > { %vm2802_vm1 = vcmp.gt.f32.partialorder %v2768_v24, 0.0  ;;  %v2810_v53 = vmul.f32 0.01, %v2768_v24  ;;  %v2668_v54 = vadd.f32 %v4495_v62, %v6588_v1  ;;  %v2782_v13 = vpop.f32.mrf.mxu0  ;;  %v3153_v62 = vld [vmem:[#allocation17 + $0x38] sm:$0xff] }
 0x569   : > { %v4497_v55 = vpop.f32.mrf.mxu1 }
 0x56a   : > { %v2818_v57 = vsel %vm2802_vm1, %v2768_v24, %v2810_v53  ;;  %v2773_v58 = vadd.f32 %v2772_v56, %v2668_v54  ;;  %v4498_v17 = vadd.f32 %v4497_v55, %v4496_v52  ;;  %v3152_v56 = vld [vmem:[#allocation17 + $0x30] sm:$0xff]  ;;  %vm3337_vm1 = vcmask 1041409  }
 0x56b   : > { %2826 = vst [vmem:[#allocation2 + $0x10] sm:$0xff] %v2818_v57  ;;  %v4499_v60 = vpop.f32.mrf.mxu1  ;;  %5021 = vmatmul.mubr.f32.vlgmr.msra.gmra.mxu0 %v2818_v57 }
 0x56c   : > { %vm2803_vm2 = vcmp.gt.f32.partialorder %v2773_v58, 0.0  ;;  %v2811_v61 = vmul.f32 0.01, %v2773_v58  ;;  %v2673_v63 = vadd.f32 %v4498_v17, %v6588_v1  ;;  %v3150_v17 = vld [vmem:[#allocation17 + $0x20] sm:$0xff] }
 0x56d   : > { %v4500_v0 = vpop.f32.mrf.mxu1 }
 0x56e   : > { %v6594_v3 = vsel %vm2803_vm2, %v2773_v58, %v2811_v61  ;;  %v2778_v4 = vadd.f32 %v4981_v35, %v2673_v63  ;;  %v4501_v6 = vadd.f32 %v4500_v0, %v4499_v60  ;;  %v2841_v46 = vld [vmem:[#allocation2 + $0x4] sm:$0xff]  ;;  %v4987_v29 = vpop.f32.mrf.mxu0  ;;  %v3149_v60 = vld [vmem:[#allocation17 + $0x18] sm:$0xff]  ;;  %v3148_v63 = vld [vmem:[#allocation17 + $0x10] sm:$0xff]  ;;  %vm3339_vm2 = vcmask 1042434  }
 0x56f   : > { %2827 = vst [vmem:[#allocation2 + $0x20] sm:$0xff] %v6594_v3  ;;  %v4502_v7 = vpop.f32.mrf.mxu1  ;;  %2976 = vmatprep.mubr.f32.mxu1 %v2841_v46  ;;  %5023 = vmatprep.mubr.f32.mxu0 %v6594_v3  ;;  %v3154_v35 = vld [vmem:[#allocation17 + $0x40] sm:$0xff]  ;;  %v3147_v0 = vld [vmem:[#allocation17 + $0x8] sm:$0xff] }
 0x570   : > { %vm2804_vm3 = vcmp.gt.f32.partialorder %v2778_v4, 0.0  ;;  %v2812_v9 = vmul.f32 0.01, %v2778_v4  ;;  %v2678_v12 = vadd.f32 %v4501_v6, %v6588_v1  ;;  %2977 = vmatmul.mubr.f32.vlgmr.msra.gmra.mxu1 %v6546_v10  ;;  %v2792_v49 = vpop.f32.mrf.mxu0  ;;  %v3316_v6 = vld [vmem:[#allocation18 + $0x30] sm:$0xff]  ;;  %v3315_v46 = vld [vmem:[#allocation18 + $0x28] sm:$0xff] }
 0x571   : > { %5033 = vmatpush3.msra.mxu1 %v3161_v31  ;;  %v4503_v14 = vpop.f32.mrf.mxu1 }
 0x572   : > { %v2820_v16 = vsel %vm2804_vm3, %v2778_v4, %v2812_v9  ;;  %v2783_v18 = vadd.f32 %v2782_v13, %v2678_v12  ;;  %v4504_v19 = vadd.f32 %v4503_v14, %v4502_v7  ;;  %5034 = vmatprep.subr.mxu1 %v3160_v8  ;;  %v2842_v37 = vld [vmem:[#allocation2 + $0xc] sm:$0xff]  ;;  %v3325_v4 = vld [vmem:[#allocation18 + $0x78] sm:$0xff]  ;;  %v3314_v7 = vld [vmem:[#allocation18 + $0x20] sm:$0xff]  ;;  %vm3341_vm3 = vcmask 1043459  }
 0x573   : > { %2828 = vst [vmem:[#allocation2 + $0x28] sm:$0xff] %v2820_v16  ;;  %5035 = vmatpush3.msra.mxu1 %v3160_v8  ;;  %v4505_v20 = vpop.f32.mrf.mxu1  ;;  %2981 = vmatprep.mubr.f32.mxu1 %v2842_v37  ;;  %v3313_v8 = vld [vmem:[#allocation18 + $0x18] sm:$0xff]  ;;  %v3312_v9 = vld [vmem:[#allocation18 + $0x10] sm:$0xff]  ;;  %v3311_v12 = vld [vmem:[#allocation18 + $0x8] sm:$0xff] }
 0x574   : > { %vm2805_vm4 = vcmp.gt.f32.partialorder %v2783_v18, 0.0  ;;  %v2813_v23 = vmul.f32 0.01, %v2783_v18  ;;  %v2683_v26 = vadd.f32 %v4504_v19, %v6588_v1  ;;  %5036 = vmatprep.subr.mxu1 %v3159_v15  ;;  %2982 = vmatmul.mubr.f32.gmra.mxu1 %v2817_v38  ;;  %v3310_v13 = vld [vmem:[#allocation18] sm:$0xff]  ;;  %v3430_v14 = vld [vmem:[#allocation20 + $0x78] sm:$0xff]  ;;  %v3425_v37 = vld [vmem:[#allocation20 + $0x50] sm:$0xff] }
 0x575   : > { %5037 = vmatpush3.msra.mxu1 %v3159_v15  ;;  %v4506_v27 = vpop.f32.mrf.mxu1  ;;  %5024 = vmatmul.mubr.f32.gmra.mxu0 %v2820_v16  ;;  %v3429_v15 = vld [vmem:[#allocation20 + $0x70] sm:$0xff]  ;;  %v3428_v16 = vld [vmem:[#allocation20 + $0x68] sm:$0xff]  ;;  %v3426_v19 = vld [vmem:[#allocation20 + $0x58] sm:$0xff] }
 0x576   : > { %v2821_v31 = vsel %vm2805_vm4, %v2783_v18, %v2813_v23  ;;  %v2788_v40 = vadd.f32 %v4984_v2, %v2683_v26  ;;  %v4507_v41 = vadd.f32 %v4506_v27, %v4505_v20  ;;  %5038 = vmatprep.subr.mxu1 %v3158_v22  ;;  %v2843_v42 = vld [vmem:[#allocation2 + $0x1c] sm:$0xff]  ;;  %5077 = vmatpush3.msra.mxu0 %v3325_v4  ;;  %v3424_v20 = vld [vmem:[#allocation20 + $0x48] sm:$0xff]  ;;  %v3421_v26 = vld [vmem:[#allocation20 + $0x30] sm:$0xff] }
 0x577   : > { %2829 = vst [vmem:[#allocation2 + $0x38] sm:$0xff] %v2821_v31  ;;  %5039 = vmatpush3.msra.mxu1 %v3158_v22  ;;  %v4508_v36 = vpop.f32.mrf.mxu1  ;;  %2986 = vmatprep.mubr.f32.mxu1 %v2843_v42  ;;  %v3427_v18 = vld [vmem:[#allocation20 + $0x60] sm:$0xff]  ;;  %v3422_v23 = vld [vmem:[#allocation20 + $0x38] sm:$0xff]  ;;  %v3420_v27 = vld [vmem:[#allocation20 + $0x28] sm:$0xff] }
 0x578   : > { %vm2806_vm5 = vcmp.gt.f32.partialorder %v2788_v40, 0.0  ;;  %v2814_v45 = vmul.f32 0.01, %v2788_v40  ;;  %5040 = vmatprep.subr.mxu1 %v3157_v5  ;;  %v2688_v48 = vadd.f32 %v4507_v41, %v6588_v1  ;;  %2987 = vmatmul.mubr.f32.gmra.mxu1 %v6546_v10  ;;  %v3423_v22 = vld [vmem:[#allocation20 + $0x40] sm:$0xff] }
 0x579   : > { %5041 = vmatpush3.msra.mxu1 %v3157_v5  ;;  %v4509_v50 = vpop.f32.mrf.mxu1  ;;  %5026 = vmatprep.mubr.f32.mxu0 %v2821_v31  ;;  %v3418_v5 = vld [vmem:[#allocation20 + $0x18] sm:$0xff] }
 0x57a   : > { %v2822_v32 = vsel %vm2806_vm5, %v2788_v40, %v2814_v45  ;;  %v2793_v33 = vadd.f32 %v2792_v49, %v2688_v48  ;;  %v4510_v34 = vadd.f32 %v4509_v50, %v4508_v36  ;;  %5042 = vmatprep.subr.mxu1 %v3156_v43  ;;  %v2844_v21 = vld [vmem:[#allocation2 + $0x24] sm:$0xff]  ;;  %5078 = vmatprep.subr.mxu0 %v6546_v10 }
 0x57b   : > { %2830 = vst [vmem:[#allocation2 + $0x40] sm:$0xff] %v2822_v32  ;;  %5043 = vmatpush3.msra.mxu1 %v3156_v43  ;;  %2991 = vmatprep.mubr.f32.mxu1 %v2844_v21 }
 0x57c   : > { %vm2807_vm6 = vcmp.gt.f32.partialorder %v2793_v33, 0.0  ;;  %v2815_v38 = vmul.f32 0.01, %v2793_v33  ;;  %v2693_v24 = vadd.f32 %v4510_v34, %v6588_v1  ;;  %5044 = vmatprep.subr.mxu1 %v3155_v30  ;;  %2992 = vmatmul.mubr.f32.gmra.mxu1 %v6594_v3  ;;  %v3151_v1 = vld [vmem:[#allocation17 + $0x28] sm:$0xff]  ;;  %v3146_v3 = vld [vmem:[#allocation17] sm:$0xff] }
 0x57d   : > { %5045 = vmatpush3.msra.mxu1 %v3155_v30  ;;  %5027 = vmatmul.mubr.f32.gmra.mxu0 %v2822_v32  ;;  %v4097_v34 = vld [vmem:[%s6917_s14] ss:$0 sm:$0xff] }
 0x57e   : > { %v2823_v52 = vsel %vm2807_vm6, %v2793_v33, %v2815_v38  ;;  %v2798_v53 = vadd.f32 %v4987_v29, %v2693_v24  ;;  %5046 = vmatprep.subr.mxu1 %v3154_v35  ;;  %v2845_v54 = vld [vmem:[#allocation2 + $0x34] sm:$0xff]  ;;  %v3419_v29 = vld [vmem:[#allocation20 + $0x20] sm:$0xff] }
 0x57f   : > { %2831 = vst [vmem:[#allocation2 + $0x50] sm:$0xff] %v2823_v52  ;;  %5047 = vmatpush3.msra.mxu1 %v3154_v35  ;;  %2996 = vmatprep.mubr.f32.mxu1 %v2845_v54 }
 0x580   : > { %vm2808_vm7 = vcmp.gt.f32.partialorder %v2798_v53, 0.0  ;;  %v2816_v55 = vmul.f32 0.01, %v2798_v53  ;;  %5048 = vmatprep.subr.mxu1 %v3153_v62  ;;  %2997 = vmatmul.mubr.f32.gmra.mxu1 %v6546_v10 }
 0x581   : > { %5049 = vmatpush3.msra.mxu1 %v3153_v62  ;;  %5029 = vmatprep.mubr.f32.mxu0 %v2823_v52 }
 0x582   : > { %v2824_v57 = vsel %vm2808_vm7, %v2798_v53, %v2816_v55  ;;  %5050 = vmatprep.subr.mxu1 %v3152_v56  ;;  %v2846_v58 = vld [vmem:[#allocation2 + $0x3c] sm:$0xff] }
 0x583   : > { %2832 = vst [vmem:[#allocation2 + $0x58] sm:$0xff] %v2824_v57  ;;  %5051 = vmatpush3.msra.mxu1 %v3152_v56  ;;  %3001 = vmatprep.mubr.f32.mxu1 %v2846_v58 }
 0x584   : > { %5052 = vmatprep.subr.mxu1 %v3151_v1  ;;  %3002 = vmatmul.mubr.f32.gmra.mxu1 %v2821_v31  ;;  %v3417_v31 = vld [vmem:[#allocation20 + $0x10] sm:$0xff] }
 0x585   : > { %5053 = vmatpush3.msra.mxu1 %v3151_v1  ;;  %5030 = vmatmul.mubr.f32.gmra.mxu0 %v2824_v57 }
 0x586   : > { %5054 = vmatprep.subr.mxu1 %v3150_v17  ;;  %v2847_v61 = vld [vmem:[#allocation2 + $0x4c] sm:$0xff]  ;;  %5108 = vmatprep.mubr.msk.f32.mxu0 %vm5946_vm8, %v6546_v10 }
 0x587   : > { %5055 = vmatpush3.msra.mxu1 %v3150_v17  ;;  %3006 = vmatprep.mubr.f32.mxu1 %v2847_v61 }
 0x588   : > { %5056 = vmatprep.subr.mxu1 %v3149_v60  ;;  %3007 = vmatmul.mubr.f32.gmra.mxu1 %v6546_v10 }
 0x589   : > { %5057 = vmatpush3.msra.mxu1 %v3149_v60 }
 0x58a   : > { %5058 = vmatprep.subr.mxu1 %v3148_v63  ;;  %v2848_v2 = vld [vmem:[#allocation2 + $0x54] sm:$0xff] }
 0x58b   : > { %5059 = vmatpush3.msra.mxu1 %v3148_v63  ;;  %3011 = vmatprep.mubr.f32.mxu1 %v2848_v2 }
 0x58c   : > { %5060 = vmatprep.subr.mxu1 %v3147_v0  ;;  %3012 = vmatmul.mubr.f32.gmra.mxu1 %v2823_v52 }
 0x58d   : > { %5061 = vmatpush3.msra.mxu1 %v3147_v0  ;;  %5064 = vmatprep.mubr.f32.mxu1 %v6529_v47  ;;  %v3324_v47 = vld [vmem:[#allocation18 + $0x70] sm:$0xff] }
 0x58e   : > { %5062 = vmatprep.subr.mxu1 %v3146_v3  ;;  %5079 = vmatpush3.msra.mxu0 %v3324_v47 }
 0x58f   : > { %5063 = vmatpush3.msra.mxu1 %v3146_v3  ;;  %5080 = vmatprep.subr.mxu0 %v6546_v10 }
 0x590   : > { %5065 = vmatmul.mubr.f32.vlgmr.msra.gmra.mxu1 %v6535_v28  ;;  %5111 = vmatprep.subr.mxu1 %v6546_v10  ;;  %v3323_v28 = vld [vmem:[#allocation18 + $0x68] sm:$0xff] }
 0x591   : > { %5067 = vmatprep.mubr.f32.mxu1 %v6541_v59  ;;  %5081 = vmatpush3.msra.mxu0 %v3323_v28  ;;  %v3322_v59 = vld [vmem:[#allocation18 + $0x60] sm:$0xff] }
 0x592   : > { %5082 = vmatprep.subr.mxu0 %v6546_v10  ;;  %5112 = vmatpush3.msra.mxu1 %v3430_v14  ;;  %v6656_v28 = vld [vmem:[%s6918_s16] ss:$0 sm:$0xff] }
 0x593   : > { %5083 = vmatpush3.msra.mxu0 %v3322_v59  ;;  %5113 = vmatprep.subr.mxu1 %v6546_v10 }
 0x594   : > { %5068 = vmatmul.mubr.f32.gmra.mxu1 %v6550_v11  ;;  %5084 = vmatprep.subr.mxu0 %v6546_v10  ;;  %v3321_v11 = vld [vmem:[#allocation18 + $0x58] sm:$0xff] }
 0x595   : > { %5070 = vmatprep.mubr.f32.mxu1 %v6557_v25  ;;  %5085 = vmatpush3.msra.mxu0 %v3321_v11  ;;  %v3320_v25 = vld [vmem:[#allocation18 + $0x50] sm:$0xff] }
 0x596   : > { %5086 = vmatprep.subr.mxu0 %v6546_v10  ;;  %5114 = vmatpush3.msra.mxu1 %v3429_v15 }
 0x597   : > { %5087 = vmatpush3.msra.mxu0 %v3320_v25  ;;  %5115 = vmatprep.subr.mxu1 %v6546_v10 }
 0x598   : > { %5071 = vmatmul.mubr.f32.gmra.mxu1 %v6564_v44  ;;  %5088 = vmatprep.subr.mxu0 %v6546_v10  ;;  %v3319_v44 = vld [vmem:[#allocation18 + $0x48] sm:$0xff] }
 0x599   : > { %5073 = vmatprep.mubr.f32.mxu1 %v6571_v51  ;;  %5089 = vmatpush3.msra.mxu0 %v3319_v44  ;;  %v3318_v51 = vld [vmem:[#allocation18 + $0x40] sm:$0xff] }
 0x59a   : > { %5090 = vmatprep.subr.mxu0 %v6546_v10  ;;  %5116 = vmatpush3.msra.mxu1 %v3428_v16 }
 0x59b   : > { %5091 = vmatpush3.msra.mxu0 %v3318_v51  ;;  %5117 = vmatprep.subr.mxu1 %v6546_v10 }
 0x59c   : > { %5074 = vmatmul.mubr.f32.gmra.mxu1 %v6577_v39  ;;  %5092 = vmatprep.subr.mxu0 %v6546_v10  ;;  %v3317_v39 = vld [vmem:[#allocation18 + $0x38] sm:$0xff] }
 0x59d   : > { %5093 = vmatpush3.msra.mxu0 %v3317_v39  ;;  %5143 = vmatprep.mubr.msk.f32.mxu1 %vm5946_vm8, %v6546_v10 }
 0x59e   : > { %5094 = vmatprep.subr.mxu0 %v6546_v10  ;;  %5118 = vmatpush3.msra.mxu1 %v3427_v18 }
 0x59f   : > { %5095 = vmatpush3.msra.mxu0 %v3316_v6  ;;  %5119 = vmatprep.subr.mxu1 %v6546_v10 }
 0x5a0   : > { %5096 = vmatprep.subr.mxu0 %v6546_v10  ;;  %5120 = vmatpush3.msra.mxu1 %v3426_v19 }
 0x5a1   : > { %5097 = vmatpush3.msra.mxu0 %v3315_v46  ;;  %5121 = vmatprep.subr.mxu1 %v6546_v10 }
 0x5a2   : > { %5098 = vmatprep.subr.mxu0 %v6546_v10  ;;  %5122 = vmatpush3.msra.mxu1 %v3425_v37 }
 0x5a3   : > { %5099 = vmatpush3.msra.mxu0 %v3314_v7  ;;  %5123 = vmatprep.subr.mxu1 %v6546_v10 }
 0x5a4   : > { %5100 = vmatprep.subr.mxu0 %v6546_v10  ;;  %5124 = vmatpush3.msra.mxu1 %v3424_v20 }
 0x5a5   : > { %5101 = vmatpush3.msra.mxu0 %v3313_v8  ;;  %5125 = vmatprep.subr.mxu1 %v6546_v10 }
 0x5a6   : > { %5102 = vmatprep.subr.mxu0 %v6546_v10  ;;  %5126 = vmatpush3.msra.mxu1 %v3423_v22 }
 0x5a7   : > { %5103 = vmatpush3.msra.mxu0 %v3312_v9  ;;  %5127 = vmatprep.subr.mxu1 %v6546_v10 }
 0x5a8   : > { %5104 = vmatprep.subr.mxu0 %v6546_v10  ;;  %5128 = vmatpush3.msra.mxu1 %v3422_v23 }
 0x5a9   : > { %5105 = vmatpush3.msra.mxu0 %v3311_v12  ;;  %5129 = vmatprep.subr.mxu1 %v6546_v10 }
 0x5aa   : > { %5106 = vmatprep.subr.mxu0 %v6546_v10  ;;  %5130 = vmatpush3.msra.mxu1 %v3421_v26 }
 0x5ab   : > { %5107 = vmatpush3.msra.mxu0 %v3310_v13  ;;  %5131 = vmatprep.subr.mxu1 %v6546_v10 }
 0x5ac   : > { %5146 = vmatprep.subr.mxu0 %v6546_v10  ;;  %5132 = vmatpush3.msra.mxu1 %v3420_v27 }
 0x5ad   : > { %5133 = vmatprep.subr.mxu1 %v6546_v10 }
 0x5ae   : > { %5134 = vmatpush3.msra.mxu1 %v3419_v29 }
 0x5af   : > { %5135 = vmatprep.subr.mxu1 %v6546_v10 }
 0x5b0   : > { %5136 = vmatpush3.msra.mxu1 %v3418_v5 }
 0x5b1   : > { %5137 = vmatprep.subr.mxu1 %v6546_v10 }
 0x5b2   : > { %5138 = vmatpush3.msra.mxu1 %v3417_v31 }
 0x5b3   : > { %5139 = vmatprep.subr.mxu1 %v6546_v10 }
 0x62b   : > { %v5022_v30 = vpop.f32.mrf.mxu0 }
 0x62d   : > { %v3083_v38 = vpop.f32.mrf.mxu0 }
 0x630   : > { %v4567_v40 = vpop.f32.mrf.mxu1 }
 0x632   : > { %v4568_v41 = vpop.f32.mrf.mxu1 }
 0x633   : > { %v4569_v32 = vadd.f32 %v4568_v41, %v4567_v40 }
 0x634   : > { %v4570_v42 = vpop.f32.mrf.mxu1 }
 0x635   : > { %v2979_v10 = vadd.f32 %v4569_v32, %v4097_v34  ;;  %v5025_v52 = vpop.f32.mrf.mxu0 }
 0x636   : > { %v4571_v36 = vpop.f32.mrf.mxu1 }
 0x637   : > { %v4572_v21 = vadd.f32 %v4571_v36, %v4570_v42  ;;  %v3084_v55 = vadd.f32 %v3083_v38, %v2979_v10  ;;  %v3093_v58 = vpop.f32.mrf.mxu0 }
 0x638   : > { %v4573_v43 = vpop.f32.mrf.mxu1 }
 0x639   : > { %v2984_v54 = vadd.f32 %v4572_v21, %v4097_v34  ;;  %v3130_v3 = vmul.f32 0.01, %v3084_v55  ;;  %vm3122_vm9 = vcmp.gt.f32.partialorder %v3084_v55, 0.0 }
 0x63a   : > { %v4574_v45 = vpop.f32.mrf.mxu1 }
 0x63b   : > { %v4575_v24 = vadd.f32 %v4574_v45, %v4573_v43  ;;  %v3089_v61 = vadd.f32 %v5022_v30, %v2984_v54  ;;  %v3138_v9 = vsel %vm3122_vm9, %v3084_v55, %v3130_v3 }
 0x63c   : > { %v4576_v48 = vpop.f32.mrf.mxu1 }
 0x63d   : > { %v2989_v1 = vadd.f32 %v4575_v24, %v4097_v34  ;;  %v5028_v2 = vpop.f32.mrf.mxu0  ;;  %v3131_v51 = vmul.f32 0.01, %v3089_v61  ;;  %vm3123_vm10 = vcmp.gt.f32.partialorder %v3089_v61, 0.0 }
 0x63e   : > { %v4577_v49 = vpop.f32.mrf.mxu1 }
 0x63f   : > { %v4578_v53 = vadd.f32 %v4577_v49, %v4576_v48  ;;  %v3094_v4 = vadd.f32 %v3093_v58, %v2989_v1  ;;  %v3103_v6 = vpop.f32.mrf.mxu0  ;;  %v3139_v37 = vsel %vm3123_vm10, %v3089_v61, %v3131_v51 }
 0x640   : > { %v4579_v50 = vpop.f32.mrf.mxu1 }
 0x641   : > { %v2994_v17 = vadd.f32 %v4578_v53, %v4097_v34  ;;  %v3132_v8 = vmul.f32 0.01, %v3094_v4  ;;  %vm3124_vm11 = vcmp.gt.f32.partialorder %v3094_v4, 0.0 }
 0x642   : > { %v4580_v33 = vpop.f32.mrf.mxu1 }
 0x643   : > { %v4581_v60 = vadd.f32 %v4580_v33, %v4579_v50  ;;  %v3099_v59 = vadd.f32 %v5025_v52, %v2994_v17  ;;  %v3140_v29 = vsel %vm3124_vm11, %v3094_v4, %v3132_v8 }
 0x644   : > { %v4582_v35 = vpop.f32.mrf.mxu1 }
 0x645   : > { %v2999_v11 = vadd.f32 %v4581_v60, %v4097_v34  ;;  %v5031_v14 = vpop.f32.mrf.mxu0  ;;  %v3133_v16 = vmul.f32 0.01, %v3099_v59  ;;  %vm3125_vm12 = vcmp.gt.f32.partialorder %v3099_v59, 0.0 }
 0x646   : > { %v4583_v62 = vpop.f32.mrf.mxu1 }
 0x647   : > { %v4584_v63 = vadd.f32 %v4583_v62, %v4582_v35  ;;  %v3104_v13 = vadd.f32 %v3103_v6, %v2999_v11  ;;  %v3113_v31 = vpop.f32.mrf.mxu0  ;;  %v3141_v41 = vsel %vm3125_vm12, %v3099_v59, %v3133_v16 }
 0x648   : > { %v4585_v56 = vpop.f32.mrf.mxu1 }
 0x649   : > { %v3004_v25 = vadd.f32 %v4584_v63, %v4097_v34  ;;  %vm3126_vm13 = vcmp.gt.f32.partialorder %v3104_v13, 0.0  ;;  %v3134_v36 = vmul.f32 0.01, %v3104_v13 }
 0x64a   : > { %v4586_v57 = vpop.f32.mrf.mxu1 }
 0x64b   : > { %v4587_v44 = vadd.f32 %v4586_v57, %v4585_v56  ;;  %v3109_v18 = vadd.f32 %v5028_v2, %v3004_v25  ;;  %v3142_v24 = vsel %vm3126_vm13, %v3104_v13, %v3134_v36  ;;  %v3519_v36 = vld [vmem:[#allocation21 + $0x40] sm:$0xff] }
 0x64c   : > { %v4588_v0 = vpop.f32.mrf.mxu1 }
 0x64d   : > { %v3009_v19 = vadd.f32 %v4587_v44, %v4097_v34  ;;  %vm3127_vm14 = vcmp.gt.f32.partialorder %v3109_v18, 0.0  ;;  %v3135_v45 = vmul.f32 0.01, %v3109_v18 }
 0x64e   : > { %v4589_v47 = vpop.f32.mrf.mxu1 }
 0x64f   : > { %v4590_v46 = vadd.f32 %v4589_v47, %v4588_v0  ;;  %v3114_v43 = vadd.f32 %v3113_v31, %v3009_v19  ;;  %v3143_v10 = vsel %vm3127_vm14, %v3109_v18, %v3135_v45  ;;  %v3523_v31 = vld [vmem:[#allocation21 + $0x60] sm:$0xff]  ;;  %v3517_v45 = vld [vmem:[#allocation21 + $0x30] sm:$0xff] }
 0x650   : > { %v5066_v39 = vpop.f32.mrf.mxu1 }
 0x651   : > { %v3241_v7 = vadd.f32 %v5066_v39, %v6656_v28  ;;  %v3014_v22 = vadd.f32 %v4590_v46, %v4097_v34  ;;  %v3136_v38 = vmul.f32 0.01, %v3114_v43  ;;  %vm3128_vm15 = vcmp.gt.f32.partialorder %v3114_v43, 0.0 }
 0x652   : > { %v3235_v12 = vpop.f32.mrf.mxu1 }
 0x653   : > { %v3236_v15 = vadd.f32 %v6656_v28, %v3235_v12  ;;  %v3275_v23 = vadd.f32 %v3241_v7, %v3139_v37  ;;  %v3119_v49 = vadd.f32 %v5031_v14, %v3014_v22  ;;  %v3144_v2 = vsel %vm3128_vm15, %v3114_v43, %v3136_v38  ;;  %v6667_v22 = vld [vmem:[#allocation2] sm:$0xff]  ;;  %v3518_v43 = vld [vmem:[#allocation21 + $0x38] sm:$0xff] }
 0x654   : > { %v5069_v20 = vpop.f32.mrf.mxu1  ;;  %v3511_v38 = vld [vmem:[#allocation21] sm:$0xff] }
 0x655   : > { %v3274_v26 = vadd.f32 %v3236_v15, %v3138_v9  ;;  %v3251_v27 = vadd.f32 %v5069_v20, %v6656_v28  ;;  %v3137_v56 = vmul.f32 0.01, %v3119_v49  ;;  %vm3129_vm0 = vcmp.gt.f32.partialorder %v3119_v49, 0.0 }
 0x656   : > { %v3245_v5 = vpop.f32.mrf.mxu1 }
 0x657   : > { %v3282_v40 = vmax.f32 %v3274_v26, %v3275_v23  ;;  %v3246_v42 = vadd.f32 %v6656_v28, %v3245_v5  ;;  %v3277_v50 = vadd.f32 %v3251_v27, %v3141_v41  ;;  %v3145_v0 = vsel %vm3129_vm0, %v3119_v49, %v3137_v56  ;;  %v3416_v23 = vld [vmem:[#allocation20 + $0x8] sm:$0xff]  ;;  %v3415_v26 = vld [vmem:[#allocation20] sm:$0xff]  ;;  %v3526_v27 = vld [vmem:[#allocation21 + $0x78] sm:$0xff] }
 0x658   : > { %v5072_v48 = vpop.f32.mrf.mxu1  ;;  %5140 = vmatpush3.msra.mxu1 %v3416_v23  ;;  %v3524_v5 = vld [vmem:[#allocation21 + $0x68] sm:$0xff]  ;;  %v3521_v41 = vld [vmem:[#allocation21 + $0x50] sm:$0xff]  ;;  %v3515_v49 = vld [vmem:[#allocation21 + $0x20] sm:$0xff] }
 0x659   : > { %v3276_v30 = vadd.f32 %v3246_v42, %v3140_v29  ;;  %v3261_v32 = vadd.f32 %v5072_v48, %v6656_v28  ;;  %v3283_v33 = vrot.slane %v3282_v40, 4  ;;  %5141 = vmatprep.subr.mxu1 %v6667_v22  ;;  %v3525_v29 = vld [vmem:[#allocation21 + $0x70] sm:$0xff]  ;;  %v3520_v42 = vld [vmem:[#allocation21 + $0x48] sm:$0xff] }
 0x65a   : > { %v3255_v34 = vpop.f32.mrf.mxu1  ;;  %5142 = vmatpush3.msra.mxu1 %v3415_v26  ;;  %v3516_v48 = vld [vmem:[#allocation21 + $0x28] sm:$0xff]  ;;  %v3705_v23 = vld [vmem:[#allocation24 + $0x10] sm:$0xff] }
 0x65b   : > { %v3289_v21 = vmax.f32 %v3276_v30, %v3277_v50  ;;  %v3256_v35 = vadd.f32 %v6656_v28, %v3255_v34  ;;  %v3279_v53 = vadd.f32 %v3261_v32, %v3143_v10  ;;  %v3284_v55 = vmax.f32 %v3282_v40, %v3283_v33  ;;  %5181 = vmatprep.subr.mxu1 %v6667_v22  ;;  %v3522_v40 = vld [vmem:[#allocation21 + $0x58] sm:$0xff]  ;;  %v4099_v30 = vld [vmem:[%s6826_s18] ss:$0 sm:$0xff]  ;;  %v3616_v56 = vld [vmem:[#allocation23 + $0x48] sm:$0xff] }
 0x65c   : > { %v5075_v62 = vpop.f32.mrf.mxu1  ;;  %v3514_v50 = vld [vmem:[#allocation21 + $0x18] sm:$0xff]  ;;  %v3704_v26 = vld [vmem:[#allocation24 + $0x8] sm:$0xff] }
 0x65d   : > { %v3290_v52 = vrot.slane %v3289_v21, 4  ;;  %v3278_v54 = vadd.f32 %v3256_v35, %v3142_v24  ;;  %v3271_v1 = vadd.f32 %v5075_v62, %v6656_v28  ;;  %v3285_v3 = vrot.slane %v3284_v55, 2  ;;  %v3512_v35 = vld [vmem:[#allocation21 + $0x8] sm:$0xff]  ;;  %v3622_v10 = vld [vmem:[#allocation23 + $0x78] sm:$0xff]  ;;  %v3621_v24 = vld [vmem:[#allocation23 + $0x70] sm:$0xff] }
 0x65e   : > { %v3265_v57 = vpop.f32.mrf.mxu1  ;;  %v3620_v62 = vld [vmem:[#allocation23 + $0x68] sm:$0xff] }
 0x65f   : > { %v3291_v58 = vmax.f32 %v3289_v21, %v3290_v52  ;;  %v3296_v17 = vmax.f32 %v3278_v54, %v3279_v53  ;;  %v3266_v60 = vadd.f32 %v6656_v28, %v3265_v57  ;;  %v3281_v4 = vadd.f32 %v3271_v1, %v3145_v0  ;;  %v3513_v21 = vld [vmem:[#allocation21 + $0x10] sm:$0xff]  ;;  %v3619_v52 = vld [vmem:[#allocation23 + $0x60] sm:$0xff]  ;;  %v3618_v53 = vld [vmem:[#allocation23 + $0x58] sm:$0xff] }
 0x660   : > { %v3286_v51 = vmax.f32 %v3284_v55, %v3285_v3  ;;  %v3617_v54 = vld [vmem:[#allocation23 + $0x50] sm:$0xff]  ;;  %v3615_v55 = vld [vmem:[#allocation23 + $0x40] sm:$0xff]  ;;  %v3614_v1 = vld [vmem:[#allocation23 + $0x38] sm:$0xff] }
 0x661   : > { %v3292_v61 = vrot.slane %v3291_v58, 2  ;;  %v3297_v63 = vrot.slane %v3296_v17, 4  ;;  %v3280_v47 = vadd.f32 %v3266_v60, %v3144_v2  ;;  %v3613_v57 = vld [vmem:[#allocation23 + $0x30] sm:$0xff]  ;;  %v3610_v60 = vld [vmem:[#allocation23 + $0x18] sm:$0xff] }
 0x662   : > { %v3287_v9 = vrot.slane %v3286_v51, 1 }
 0x663   : > { %v3298_v59 = vmax.f32 %v3296_v17, %v3297_v63  ;;  %v3293_v11 = vmax.f32 %v3291_v58, %v3292_v61  ;;  %v3303_v25 = vmax.f32 %v3280_v47, %v3281_v4  ;;  %v3612_v58 = vld [vmem:[#allocation23 + $0x28] sm:$0xff]  ;;  %v3611_v17 = vld [vmem:[#allocation23 + $0x20] sm:$0xff]  ;;  %v3609_v47 = vld [vmem:[#allocation23 + $0x10] sm:$0xff] }
 0x664   : > { %v3288_v15 = vmax.f32 %v3286_v51, %v3287_v9  ;;  %v4100_v61 = vld [vmem:[%s6828_s20] ss:$0 sm:$0xff]  ;;  %v3716_v51 = vld [vmem:[#allocation24 + $0x68] sm:$0xff]  ;;  %v3710_v9 = vld [vmem:[#allocation24 + $0x38] sm:$0xff] }
 0x665   : > { %v3299_v44 = vrot.slane %v3298_v59, 2  ;;  %v3304_v39 = vrot.slane %v3303_v25, 4  ;;  %v3294_v46 = vrot.slane %v3293_v11, 1 }
 0x667   : > { %v3300_v6 = vmax.f32 %v3298_v59, %v3299_v44  ;;  %v3305_v7 = vmax.f32 %v3303_v25, %v3304_v39  ;;  %v3295_v28 = vmax.f32 %v3293_v11, %v3294_v46  ;;  %v3608_v59 = vld [vmem:[#allocation23 + $0x8] sm:$0xff]  ;;  %v3607_v11 = vld [vmem:[#allocation23] sm:$0xff]  ;;  %v3718_v25 = vld [vmem:[#allocation24 + $0x78] sm:$0xff] }
 0x668   : > { %v3717_v44 = vld [vmem:[#allocation24 + $0x70] sm:$0xff]  ;;  %v3715_v39 = vld [vmem:[#allocation24 + $0x60] sm:$0xff] }
 0x669   : > { %v3301_v8 = vrot.slane %v3300_v6, 1  ;;  %v3306_v12 = vrot.slane %v3305_v7, 2  ;;  %v3338_v19 = vsel %vm3337_vm1, %v3295_v28, %v3288_v15  ;;  %v3713_v46 = vld [vmem:[#allocation24 + $0x50] sm:$0xff]  ;;  %v3708_v28 = vld [vmem:[#allocation24 + $0x28] sm:$0xff]  ;;  %v4101_v15 = vld [vmem:[%s6830_s22] ss:$0 sm:$0xff] }
 0x66b   : > { %v3307_v13 = vmax.f32 %v3305_v7, %v3306_v12  ;;  %v3302_v14 = vmax.f32 %v3300_v6, %v3301_v8  ;;  %v3714_v6 = vld [vmem:[#allocation24 + $0x58] sm:$0xff]  ;;  %v3712_v7 = vld [vmem:[#allocation24 + $0x48] sm:$0xff]  ;;  %v3711_v8 = vld [vmem:[#allocation24 + $0x40] sm:$0xff] }
 0x66c   : > { %v3709_v12 = vld [vmem:[#allocation24 + $0x30] sm:$0xff] }
 0x66d   : > { %v3308_v16 = vrot.slane %v3307_v13, 1  ;;  %v3340_v37 = vsel %vm3339_vm2, %v3302_v14, %v3338_v19  ;;  %v3706_v14 = vld [vmem:[#allocation24 + $0x18] sm:$0xff] }
 0x66f   : > { %v3309_v18 = vmax.f32 %v3307_v13, %v3308_v16  ;;  %v3707_v13 = vld [vmem:[#allocation24 + $0x20] sm:$0xff] }
 0x671   : > { %v3342_v20 = vsel %vm3341_vm3, %v3309_v18, %v3340_v37 }
 0x672   : > { %5109 = vmatmul.mubr.f32.vlgmr.msra.gmra.mxu0 %v3342_v20 }
 0x673   : > { %5178 = vmatprep.mubr.msk.f32.mxu0 %vm5946_vm8, %v6667_v22  ;;  %5147 = vmatpush3.msra.mxu0 %v3526_v27  ;;  %v3703_v27 = vld [vmem:[#allocation24] sm:$0xff] }
 0x674   : > { %5148 = vmatprep.subr.mxu0 %v6667_v22 }
 0x675   : > { %5149 = vmatpush3.msra.mxu0 %v3525_v29  ;;  %v4102_v29 = vld [vmem:[%s6919_s7] ss:$0 sm:$0xff] }
 0x676   : > { %5150 = vmatprep.subr.mxu0 %v6667_v22 }
 0x677   : > { %5151 = vmatpush3.msra.mxu0 %v3524_v5 }
 0x678   : > { %5152 = vmatprep.subr.mxu0 %v6667_v22 }
 0x679   : > { %5153 = vmatpush3.msra.mxu0 %v3523_v31 }
 0x67a   : > { %5154 = vmatprep.subr.mxu0 %v6667_v22 }
 0x67b   : > { %5155 = vmatpush3.msra.mxu0 %v3522_v40 }
 0x67c   : > { %5156 = vmatprep.subr.mxu0 %v6667_v22 }
 0x67d   : > { %5157 = vmatpush3.msra.mxu0 %v3521_v41 }
 0x67e   : > { %5158 = vmatprep.subr.mxu0 %v6667_v22 }
 0x67f   : > { %5159 = vmatpush3.msra.mxu0 %v3520_v42 }
 0x680   : > { %5160 = vmatprep.subr.mxu0 %v6667_v22 }
 0x681   : > { %5161 = vmatpush3.msra.mxu0 %v3519_v36 }
 0x682   : > { %5162 = vmatprep.subr.mxu0 %v6667_v22 }
 0x683   : > { %5163 = vmatpush3.msra.mxu0 %v3518_v43 }
 0x684   : > { %5164 = vmatprep.subr.mxu0 %v6667_v22 }
 0x685   : > { %5165 = vmatpush3.msra.mxu0 %v3517_v45 }
 0x686   : > { %5166 = vmatprep.subr.mxu0 %v6667_v22 }
 0x687   : > { %5167 = vmatpush3.msra.mxu0 %v3516_v48 }
 0x688   : > { %5168 = vmatprep.subr.mxu0 %v6667_v22 }
 0x689   : > { %5169 = vmatpush3.msra.mxu0 %v3515_v49 }
 0x68a   : > { %5170 = vmatprep.subr.mxu0 %v6667_v22 }
 0x68b   : > { %5171 = vmatpush3.msra.mxu0 %v3514_v50 }
 0x68c   : > { %5172 = vmatprep.subr.mxu0 %v6667_v22 }
 0x68d   : > { %5173 = vmatpush3.msra.mxu0 %v3513_v21 }
 0x68e   : > { %5174 = vmatprep.subr.mxu0 %v6667_v22 }
 0x68f   : > { %5175 = vmatpush3.msra.mxu0 %v3512_v35 }
 0x690   : > { %5176 = vmatprep.subr.mxu0 %v6667_v22 }
 0x691   : > { %5177 = vmatpush3.msra.mxu0 %v3511_v38 }
 0x692   : > { %5216 = vmatprep.subr.mxu0 %v6667_v22 }
 0x732   : > { %v3410_v32 = vpop.f32.mrf.mxu0 }
 0x733   : > { %v3411_v33 = vadd.f32 %v4099_v30, %v3410_v32 }
 0x734   : > { %v5110_v34 = vpop.f32.mrf.mxu0 }
 0x735   : > { %3414 = vst [vmem:[%s6692_s23] sm:$0xf] %v3411_v33  ;;  %5144 = vmatmul.mubr.f32.vlgmr.msra.gmra.mxu1 %v3411_v33 }
 0x736   : > { %5213 = vmatprep.mubr.msk.f32.mxu1 %vm5946_vm8, %v6667_v22  ;;  %5182 = vmatpush3.msra.mxu1 %v3622_v10 }
 0x737   : > { %5183 = vmatprep.subr.mxu1 %v6667_v22 }
 0x738   : > { %5184 = vmatpush3.msra.mxu1 %v3621_v24 }
 0x739   : > { %5185 = vmatprep.subr.mxu1 %v6667_v22 }
 0x73a   : > { %5186 = vmatpush3.msra.mxu1 %v3620_v62 }
 0x73b   : > { %5187 = vmatprep.subr.mxu1 %v6667_v22 }
 0x73c   : > { %5188 = vmatpush3.msra.mxu1 %v3619_v52 }
 0x73d   : > { %5189 = vmatprep.subr.mxu1 %v6667_v22 }
 0x73e   : > { %5190 = vmatpush3.msra.mxu1 %v3618_v53 }
 0x73f   : > { %5191 = vmatprep.subr.mxu1 %v6667_v22 }
 0x740   : > { %5192 = vmatpush3.msra.mxu1 %v3617_v54 }
 0x741   : > { %5193 = vmatprep.subr.mxu1 %v6667_v22 }
 0x742   : > { %5194 = vmatpush3.msra.mxu1 %v3616_v56 }
 0x743   : > { %5195 = vmatprep.subr.mxu1 %v6667_v22 }
 0x744   : > { %5196 = vmatpush3.msra.mxu1 %v3615_v55 }
 0x745   : > { %5197 = vmatprep.subr.mxu1 %v6667_v22 }
 0x746   : > { %5198 = vmatpush3.msra.mxu1 %v3614_v1 }
 0x747   : > { %5199 = vmatprep.subr.mxu1 %v6667_v22 }
 0x748   : > { %5200 = vmatpush3.msra.mxu1 %v3613_v57 }
 0x749   : > { %5201 = vmatprep.subr.mxu1 %v6667_v22 }
 0x74a   : > { %5202 = vmatpush3.msra.mxu1 %v3612_v58 }
 0x74b   : > { %5203 = vmatprep.subr.mxu1 %v6667_v22 }
 0x74c   : > { %5204 = vmatpush3.msra.mxu1 %v3611_v17 }
 0x74d   : > { %5205 = vmatprep.subr.mxu1 %v6667_v22 }
 0x74e   : > { %5206 = vmatpush3.msra.mxu1 %v3610_v60 }
 0x74f   : > { %5207 = vmatprep.subr.mxu1 %v6667_v22 }
 0x750   : > { %5208 = vmatpush3.msra.mxu1 %v3609_v47 }
 0x751   : > { %5209 = vmatprep.subr.mxu1 %v6667_v22 }
 0x752   : > { %5210 = vmatpush3.msra.mxu1 %v3608_v59 }
 0x753   : > { %5211 = vmatprep.subr.mxu1 %v6667_v22 }
 0x754   : > { %5212 = vmatpush3.msra.mxu1 %v3607_v11 }
 0x7f5   : > { %v3504_v63 = vpop.f32.mrf.mxu1 }
 0x7f6   : > { %v3505_v0 = vadd.f32 %v4100_v61, %v3504_v63 }
 0x7f7   : > { %v5145_v2 = vpop.f32.mrf.mxu1 }
 0x7f8   : > { %vm3508_vm4 = vcmp.gt.f32.partialorder %v3505_v0, 0.0  ;;  %v3509_v3 = vmul.f32 0.01, %v3505_v0 }
 0x7fa   : > { %v3510_v4 = vsel %vm3508_vm4, %v3505_v0, %v3509_v3 }
 0x7fb   : > { %5179 = vmatmul.mubr.f32.vlgmr.msra.gmra.mxu0 %v3510_v4 }
 0x7fc   : > { %5248 = vmatprep.mubr.msk.f32.mxu0 %vm5946_vm8, %v6667_v22  ;;  %5217 = vmatpush3.msra.mxu0 %v3718_v25 }
 0x7fd   : > { %5218 = vmatprep.subr.mxu0 %v6667_v22 }
 0x7fe   : > { %5219 = vmatpush3.msra.mxu0 %v3717_v44 }
 0x7ff   : > { %5220 = vmatprep.subr.mxu0 %v6667_v22 }
 0x800   : > { %5221 = vmatpush3.msra.mxu0 %v3716_v51 }
 0x801   : > { %5222 = vmatprep.subr.mxu0 %v6667_v22 }
 0x802   : > { %5223 = vmatpush3.msra.mxu0 %v3715_v39 }
 0x803   : > { %5224 = vmatprep.subr.mxu0 %v6667_v22 }
 0x804   : > { %5225 = vmatpush3.msra.mxu0 %v3714_v6 }
 0x805   : > { %5226 = vmatprep.subr.mxu0 %v6667_v22 }
 0x806   : > { %5227 = vmatpush3.msra.mxu0 %v3713_v46 }
 0x807   : > { %5228 = vmatprep.subr.mxu0 %v6667_v22 }
 0x808   : > { %5229 = vmatpush3.msra.mxu0 %v3712_v7 }
 0x809   : > { %5230 = vmatprep.subr.mxu0 %v6667_v22 }
 0x80a   : > { %5231 = vmatpush3.msra.mxu0 %v3711_v8 }
 0x80b   : > { %5232 = vmatprep.subr.mxu0 %v6667_v22 }
 0x80c   : > { %5233 = vmatpush3.msra.mxu0 %v3710_v9 }
 0x80d   : > { %5234 = vmatprep.subr.mxu0 %v6667_v22 }
 0x80e   : > { %5235 = vmatpush3.msra.mxu0 %v3709_v12 }
 0x80f   : > { %5236 = vmatprep.subr.mxu0 %v6667_v22 }
 0x810   : > { %5237 = vmatpush3.msra.mxu0 %v3708_v28 }
 0x811   : > { %5238 = vmatprep.subr.mxu0 %v6667_v22 }
 0x812   : > { %5239 = vmatpush3.msra.mxu0 %v3707_v13 }
 0x813   : > { %5240 = vmatprep.subr.mxu0 %v6667_v22 }
 0x814   : > { %5241 = vmatpush3.msra.mxu0 %v3706_v14 }
 0x815   : > { %5242 = vmatprep.subr.mxu0 %v6667_v22 }
 0x816   : > { %5243 = vmatpush3.msra.mxu0 %v3705_v23 }
 0x817   : > { %5244 = vmatprep.subr.mxu0 %v6667_v22 }
 0x818   : > { %5245 = vmatpush3.msra.mxu0 %v3704_v26 }
 0x819   : > { %5246 = vmatprep.subr.mxu0 %v6667_v22 }
 0x81a   : > { %5247 = vmatpush3.msra.mxu0 %v3703_v27 }
 0x8bb   : > { %v3600_v16 = vpop.f32.mrf.mxu0 }
 0x8bc   : > { %v3601_v18 = vadd.f32 %v4101_v15, %v3600_v16 }
 0x8bd   : > { %v5180_v19 = vpop.f32.mrf.mxu0 }
 0x8be   : > { %vm3604_vm5 = vcmp.gt.f32.partialorder %v3601_v18, 0.0  ;;  %v3605_v37 = vmul.f32 0.01, %v3601_v18 }
 0x8c0   : > { %v3606_v20 = vsel %vm3604_vm5, %v3601_v18, %v3605_v37 }
 0x8c1   : > { %5214 = vmatmul.mubr.f32.vlgmr.msra.gmra.mxu1 %v3606_v20 }
 0x981   : > { %v3696_v5 = vpop.f32.mrf.mxu1 }
 0x982   : > { %v3697_v31 = vadd.f32 %v4102_v29, %v3696_v5 }
 0x983   : > { %v5215_v40 = vpop.f32.mrf.mxu1 }
 0x984   : > { %vm3700_vm6 = vcmp.gt.f32.partialorder %v3697_v31, 0.0  ;;  %v3701_v41 = vmul.f32 0.01, %v3697_v31 }
 0x986   : > { %v3702_v42 = vsel %vm3700_vm6, %v3697_v31, %v3701_v41 }
 0x987   : > { %5249 = vmatmul.mubr.f32.vlgmr.msra.gmra.mxu0 %v3702_v42 }
 0x988   : > { %5818 = shalt.err (!%p5815_p0)
}
 0x989   : > { %s5819_s7 = scalar_lea.hbm %s3814_s26, 64  ;;  %s5823_s29 = scalar_lea.hbm %s6920_s19, 128 }
 0x98a   : > { %p5820_p5 = scmp.ne.s32.totalorder %s3814_s26, %s5819_s7  ;;  %p5824_p9 = scmp.lt.s32.totalorder %s3814_s26, %s6920_s19 }
 0x98b   : > { %p5825_p1 = scmp.lt.s32.totalorder %s5823_s29, %s5819_s7 }
 0x98c   : > { %p5821_p13 = pnand %p5820_p5, %p6921_p2 }
 0x98d   : > { %p5826_p3 = por %p5825_p1, %p5824_p9 }
 0x98e   : > { %p5822_p10 = pneg %p5821_p13 }
 0x990   : > { %p5827_p4 = pnand %p5826_p3, %p5822_p10 }
 0x992   : > { %5830 = shalt.err (!%p5827_p4)
}
 0x993   : > { %5305 = dma.vmem_to_hbm [thread:$0]  (%p6921_p2), %s3817_s13, 64, %s3814_s26, %s3798_s11  }
 0x994   : > { %s6922_s0 = sld [smem:[#allocation61_spill]]  ;;  %s6923_s3 = sshll.u32 %s6354_s21, 2 }
 0x995   : > { %s1063_s23 = scalar_lea.vmem [#allocation27], %s6923_s3  ;;  %s6924_s6 = sshll.u32 %s6115_s10, 6 }
 0x996   : > { %s3829_s27 = sshll.u32 %s1063_s23, 4  ;;  %s6925_s29 = sld [smem:[#allocation63_spill]]  ;;  %s3830_s27 = int_to_ptr.vmem [resolvable:$true] %s3829_s27 }
 0x997   : > { %s3803_s16 = scalar_lea.sflag [#allocation28], %s6354_s21  ;;  %s5831_s26 = scalar_lea.vmem %s3830_s27, 64 }
 0x998   : > { %p5832_p6 = scmp.ne.s32.totalorder %s3830_s27, %s5831_s26  ;;  %s5948_s13 = smov [#allocation27]  }
 0x999   : > { %s5835_s11 = sshll.u32 %s5948_s13, 4  ;;  %s5836_s11 = int_to_ptr.vmem [resolvable:$false] %s5835_s11 }
 0x99a   : > { %v4103_v22 = vld [vmem:[%s6922_s0] ss:$0 sm:$0xff]  ;;  %p5833_p8 = pnand %p5832_p6, %p6921_p2  ;;  %s5837_s15 = scalar_lea.vmem %s5836_s11, 128 }
 0x99b   : > { %p5838_p11 = scmp.lt.s32.totalorder %s3830_s27, %s5836_s11  ;;  %p5839_p12 = scmp.lt.s32.totalorder %s5837_s15, %s5831_s26 }
 0x99c   : > { %s6771_s14 = scalar_lea.hbm %s6925_s29, %s6924_s6  ;;  %p5834_p7 = pneg %p5833_p8 }
 0x99d   : > { %p5840_p0 = por %p5839_p12, %p5838_p11 }
 0x99f   : > { %p5841_p5 = pnand %p5840_p0, %p5834_p7 }
 0xa47   : > { %v3792_v36 = vpop.f32.mrf.mxu0 }
 0xa48   : > { %v3793_v43 = vadd.f32 %v4103_v22, %v3792_v36 }
 0xa49   : > { %v5250_v45 = vpop.f32.mrf.mxu0 }
 0xa4a   : > { %3796 = vst [vmem:[%s1063_s23] sm:$0xf] %v3793_v43 }
 0xa4b   : > { %5844 = shalt.err (!%p5841_p5)
}
 0xa4c   : > { %s5845_s10 = scalar_lea.hbm %s6771_s14, 64  ;;  %s5849_s0 = scalar_lea.hbm %s6925_s29, 128 }
 0xa4d   : > { %p5846_p13 = scmp.ne.s32.totalorder %s6771_s14, %s5845_s10  ;;  %p5850_p1 = scmp.lt.s32.totalorder %s6771_s14, %s6925_s29 }
 0xa4e   : > { %p5851_p3 = scmp.lt.s32.totalorder %s5849_s0, %s5845_s10 }
 0xa4f   : > { %p5847_p10 = pnand %p5846_p13, %p6921_p2 }
 0xa50   : > { %p5852_p4 = por %p5851_p3, %p5850_p1 }
 0xa51   : > { %p5848_p9 = pneg %p5847_p10 }
 0xa53   : > { %p5853_p6 = pnand %p5852_p4, %p5848_p9 }
 0xa55   : > { %5856 = shalt.err (!%p5853_p6)
}
 0xa56   : > { %5306 = dma.vmem_to_hbm [thread:$0]  (%p6921_p2), %s3830_s27, 64, %s6771_s14, %s3803_s16  }
 0xa57 PF: > { %s3841_s6 = sand.u32 1, %s5915_s8   ;;  %p6926_p8 = scmp.ne.s32.totalorder %s6890_s28, 0 }
 0xa58   : > { %p6927_p7 = scmp.ge.s32.totalorder %s5927_s30, 2  ;;  %s3842_s2 = scalar_lea.sflag [#allocation5], %s3841_s6 }
 0xa5a   : > { %p5354_p11 = pnand %p6927_p7, %p6926_p8 }
 0xa5c   : > { %p5355_p12 = pneg %p5354_p11 }
 0xa5e   : > { %5906 = dma.done.wait (%p5355_p12), %s3842_s2, 64  }
 0xa5f   : > { %5908 = vsyncadd (%p5355_p12), %s3842_s2, 4294967232  ;;  %s3851_s7 = scalar_lea.sflag [#allocation28], %s3841_s6 }
 0xa60   : > { %5910 = dma.done.wait (%p5355_p12), %s3851_s7, 64  }
 0xa61   : > { %5912 = vsyncadd (%p5355_p12), %s3851_s7, 4294967232  ;;  %p52_p2 = scmp.ge.s32.totalorder %s6285_s1, 4   ;;  %s6928_s8 = smov %s5919_s5 }
 0xa62   : > { %s6929_s5 = smov %s5923_s9  ;;  %s6930_s9 = smov %s6297_s12 }
 0xa63   : > { %s6931_s30 = smov %s6285_s1  ;;  %54 = sbr.rel (!%p52_p2) target bundleno = 40 (0x28), region = 242 }
 0xa68   :  { %3856 = vsyncpa [#allocation4], 1 }
 0xa69   :  { %3858 = vsyncpa [#allocation4 + $0x1], 1 }
 0xa6a   :  { %3859 = vsyncpa [#allocation7], 1 }
 0xa6b   :  { %3860 = vsyncpa [#allocation10], 1 }
 0xa6c   :  { %3861 = vsyncpa [#allocation13], 1 }
 0xa6d   :  { %3862 = vsyncpa [#allocation16], 1 }
 0xa6e   :  { %3863 = vsyncpa [#allocation19], 1 }
 0xa6f   :  { %3864 = vsyncpa [#allocation22], 1 }
 0xa70   :  { %3865 = vsyncpa [#allocation25], 1 }
 0xa71   :  { %3866 = vsyncpa [#allocation5], 1 }
 0xa72   :  { %3868 = vsyncpa [#allocation5 + $0x1], 1 }
 0xa73   :  { %3869 = vsyncpa [#allocation28], 1 }
 0xa74   :  { %3871 = vsyncpa [#allocation28 + $0x1], 1 }

</bundles_post_ra>
